<compile_context>
chip_gen: v5e
topology: v5e:2x2
jax: 0.10.0
libtpu: 0.0.40
codegen_flags: <defaults>
</compile_context>

<pallas_src>
import functools

import jax
import jax.numpy as jnp
from jax.experimental import pallas as pl
from jax.experimental.pallas import tpu as pltpu

_EPS = 1e-5
_VMEM_LIMIT = 32 * 1024 * 1024


# ----------------------------------------------------------------------------
# Shared in-kernel helpers
# ----------------------------------------------------------------------------
def _zero_border(pad_ref, off):
    """Zero only the halo of the padded scratch; the interior is fully
    overwritten each image, so a whole-scratch memset is pure vst waste."""
    Hp, Wp, C = pad_ref.shape
    z_row = jnp.zeros((1, Wp, C), pad_ref.dtype)
    z_col = jnp.zeros((Hp, 1, C), pad_ref.dtype)
    if off == 1:                        # pad (1,1,1,1): all four sides
        pad_ref[0:1, :, :] = z_row
        pad_ref[:, 0:1, :] = z_col
    pad_ref[Hp - 1:Hp, :, :] = z_row    # bottom row  (both pad modes)
    pad_ref[:, Wp - 1:Wp, :] = z_col    # right column (both pad modes)


def _accumulate_taps(pad_ref, w_ref, Ho, Wo, cin, taps):
    """9 tap-wise bf16 MXU dots, f32 accumulation (no im2col scratch)."""
    tcout = w_ref.shape[-1]
    acc = jnp.zeros((Ho * Wo, tcout), jnp.float32)
    for t, (ro, co, ch) in enumerate(taps):
        lhs = pad_ref[ro:ro + Ho, co:co + Wo, ch:ch + cin].reshape(Ho * Wo, cin)
        acc = acc + jnp.dot(lhs, w_ref[t * cin:(t + 1) * cin, :],
                            preferred_element_type=jnp.float32)
    return acc


# ----------------------------------------------------------------------------
# Kernel 1: relu(BN0(x)) -> zero-pad -> 3x3 conv (stride 1 or 2)
#           + per-image BN1-statistic partials from the f32 accumulator
# ----------------------------------------------------------------------------
def _bn_relu_conv0_kernel(x_ref, s_ref, b_ref, w_ref, o_ref, sum_ref, ssq_ref,
                          pad_ref, *, stride, cin):
    """stride==1: x_ref is (H, W, cin),  pad (1,1,1,1) via the scratch border.
       stride==2: x_ref is space-to-depth (H/2, W/2, 4*cin); channel groups are
       ordered (row-parity, col-parity, cin), so every tap is a contiguous
       slice of the padded scratch -- no strided loads anywhere."""
    Hi, Wi, _ = x_ref.shape
    Ho, Wo, tcout = o_ref.shape
    off = 1 if stride == 1 else 0

    # pad_ref depends only on the image (grid axis 0): compute it once per
    # image (Cout-tile index 0); it persists in VMEM across the Cout axis.
    @pl.when(pl.program_id(1) == 0)
    def _():
        _zero_border(pad_ref, off)
        pad_ref[off:off + Hi, off:off + Wi, :] = jnp.maximum(
            x_ref[...] * s_ref[...] + b_ref[...], 0.0).astype(pad_ref.dtype)

    if stride == 1:
        taps = [(ky, kx, 0) for ky in range(3) for kx in range(3)]
    else:  # stride 2: tap -> (row offset, col offset, parity channel group)
        taps = [(ky // 2, kx // 2, (2 * (ky % 2) + (kx % 2)) * cin)
                for ky in range(3) for kx in range(3)]
    acc = _accumulate_taps(pad_ref, w_ref, Ho, Wo, cin, taps)

    o_ref[...] = acc.reshape(Ho, Wo, tcout).astype(o_ref.dtype)   # f in bf16
    # BN1 batch-statistic partials (per image, per Cout tile) -- removes the
    # XLA full-HBM pass over f.  (Single-pass sum/sum^2 is fine here: f is
    # roughly zero-mean after the conv.)
    sum_ref[...] = jnp.sum(acc, axis=0, keepdims=True)
    ssq_ref[...] = jnp.sum(acc * acc, axis=0, keepdims=True)


# ----------------------------------------------------------------------------
# Kernel 2: relu(BN1(f)) -> pad(1) -> 3x3 conv (stride 1) -> + residual
# ----------------------------------------------------------------------------
def _bn_relu_conv1_shortcut_kernel(f_ref, s1_ref, b1_ref, w1_ref,
                                   x_ref, s0_ref, b0_ref, ws_ref,
                                   xo_ref, fk_ref, pad_ref, xk_ref):
    Hf, Wf, cmid = f_ref.shape
    _, _, tcout = fk_ref.shape
    cin = xk_ref.shape[-1]

    @pl.when(pl.program_id(1) == 0)
    def _():
        _zero_border(pad_ref, 1)
        pad_ref[1:1 + Hf, 1:1 + Wf, :] = jnp.maximum(
            f_ref[...] * s1_ref[...] + b1_ref[...], 0.0).astype(pad_ref.dtype)
        # relu(BN0(x)) for the 1x1 shortcut, stashed once per image in bf16.
        xk_ref[...] = jnp.maximum(
            x_ref[...] * s0_ref[...] + b0_ref[...], 0.0).astype(xk_ref.dtype)

    taps = [(ky, kx, 0) for ky in range(3) for kx in range(3)]
    acc = _accumulate_taps(pad_ref, w1_ref, Hf, Wf, cmid, taps)
    fk_ref[...] = acc.reshape(Hf, Wf, tcout)
    # 1x1 shortcut AFTER f_k is stored so the f32 conv accumulator is not
    # held live across a second matmul (avoids vreg spills); re-reading f_k
    # uses vld slots, which have slack.
    sc = jnp.dot(xk_ref[...].reshape(Hf * Wf, cin), ws_ref[...],
                 preferred_element_type=jnp.float32)
    xo_ref[...] = fk_ref[...] + sc.reshape(Hf, Wf, tcout)


def _bn_relu_conv1_identity_kernel(f_ref, s1_ref, b1_ref, w1_ref, x_ref,
                                   xo_ref, fk_ref, pad_ref):
    Hf, Wf, cmid = f_ref.shape
    _, _, tcout = fk_ref.shape

    @pl.when(pl.program_id(1) == 0)
    def _():
        _zero_border(pad_ref, 1)
        pad_ref[1:1 + Hf, 1:1 + Wf, :] = jnp.maximum(
            f_ref[...] * s1_ref[...] + b1_ref[...], 0.0).astype(pad_ref.dtype)

    taps = [(ky, kx, 0) for ky in range(3) for kx in range(3)]
    acc = _accumulate_taps(pad_ref, w1_ref, Hf, Wf, cmid, taps)
    fk_ref[...] = acc.reshape(Hf, Wf, tcout)
    xo_ref[...] = fk_ref[...] + x_ref[...]          # identity residual: raw x


# ----------------------------------------------------------------------------
# pallas_call wrappers  (grid = (batch, Cout tiles))
# ----------------------------------------------------------------------------
def conv0_bn_relu_fused(x_in, scale, bias, w_flat, *, stride, cin, tile_cout):
    N, Hi, Wi, Cg = x_in.shape
    cout = w_flat.shape[-1]
    num_j = cout // tile_cout
    pad_amt = 2 if stride == 1 else 1
    kern = functools.partial(_bn_relu_conv0_kernel, stride=stride, cin=cin)
    return pl.pallas_call(
        kern,
        out_shape=(jax.ShapeDtypeStruct((N, Hi, Wi, cout), jnp.bfloat16),
                   jax.ShapeDtypeStruct((N, 1, cout), jnp.float32),
                   jax.ShapeDtypeStruct((N, 1, cout), jnp.float32)),
        grid=(N, num_j),
        in_specs=[
            pl.BlockSpec((None, Hi, Wi, Cg), lambda n, j: (n, 0, 0, 0)),
            pl.BlockSpec((1, 1, Cg), lambda n, j: (0, 0, 0)),
            pl.BlockSpec((1, 1, Cg), lambda n, j: (0, 0, 0)),
            pl.BlockSpec((9 * cin, tile_cout), lambda n, j: (0, j)),
        ],
        out_specs=[
            pl.BlockSpec((None, Hi, Wi, tile_cout), lambda n, j: (n, 0, 0, j)),
            pl.BlockSpec((None, 1, tile_cout), lambda n, j: (n, 0, j)),
            pl.BlockSpec((None, 1, tile_cout), lambda n, j: (n, 0, j)),
        ],
        scratch_shapes=[
            pltpu.VMEM((Hi + pad_amt, Wi + pad_amt, Cg), jnp.bfloat16),
        ],
        compiler_params=pltpu.CompilerParams(
            dimension_semantics=("parallel", "arbitrary"),
            vmem_limit_bytes=_VMEM_LIMIT),
    )(x_in, scale.reshape(1, 1, Cg), bias.reshape(1, 1, Cg), w_flat)


def conv1_residual_shortcut(f, s1, b1, w1_flat, xres, s0, b0, ws, *, tile_cout):
    N, Hf, Wf, Cmid = f.shape
    cout = w1_flat.shape[-1]
    cin = ws.shape[0]
    num_j = cout // tile_cout
    return pl.pallas_call(
        _bn_relu_conv1_shortcut_kernel,
        out_shape=(jax.ShapeDtypeStruct((N, Hf, Wf, cout), jnp.float32),
                   jax.ShapeDtypeStruct((N, Hf, Wf, cout), jnp.float32)),
        grid=(N, num_j),
        in_specs=[
            pl.BlockSpec((None, Hf, Wf, Cmid), lambda n, j: (n, 0, 0, 0)),
            pl.BlockSpec((1, 1, Cmid), lambda n, j: (0, 0, 0)),
            pl.BlockSpec((1, 1, Cmid), lambda n, j: (0, 0, 0)),
            pl.BlockSpec((9 * Cmid, tile_cout), lambda n, j: (0, j)),
            # only the first `cin` channels of the (possibly space-to-depth)
            # residual source are DMA'd: channel block index pinned to 0.
            pl.BlockSpec((None, Hf, Wf, cin), lambda n, j: (n, 0, 0, 0)),
            pl.BlockSpec((1, 1, cin), lambda n, j: (0, 0, 0)),
            pl.BlockSpec((1, 1, cin), lambda n, j: (0, 0, 0)),
            pl.BlockSpec((cin, tile_cout), lambda n, j: (0, j)),
        ],
        out_specs=[
            pl.BlockSpec((None, Hf, Wf, tile_cout), lambda n, j: (n, 0, 0, j)),
            pl.BlockSpec((None, Hf, Wf, tile_cout), lambda n, j: (n, 0, 0, j)),
        ],
        scratch_shapes=[
            pltpu.VMEM((Hf + 2, Wf + 2, Cmid), jnp.bfloat16),
            pltpu.VMEM((Hf, Wf, cin), jnp.bfloat16),
        ],
        compiler_params=pltpu.CompilerParams(
            dimension_semantics=("parallel", "arbitrary"),
            vmem_limit_bytes=_VMEM_LIMIT),
    )(f, s1.reshape(1, 1, Cmid), b1.reshape(1, 1, Cmid), w1_flat,
      xres, s0.reshape(1, 1, cin), b0.reshape(1, 1, cin), ws)


def conv1_residual_identity(f, s1, b1, w1_flat, x, *, tile_cout):
    N, Hf, Wf, Cmid = f.shape
    cout = w1_flat.shape[-1]
    num_j = cout // tile_cout
    return pl.pallas_call(
        _bn_relu_conv1_identity_kernel,
        out_shape=(jax.ShapeDtypeStruct((N, Hf, Wf, cout), jnp.float32),
                   jax.ShapeDtypeStruct((N, Hf, Wf, cout), jnp.float32)),
        grid=(N, num_j),
        in_specs=[
            pl.BlockSpec((None, Hf, Wf, Cmid), lambda n, j: (n, 0, 0, 0)),
            pl.BlockSpec((1, 1, Cmid), lambda n, j: (0, 0, 0)),
            pl.BlockSpec((1, 1, Cmid), lambda n, j: (0, 0, 0)),
            pl.BlockSpec((9 * Cmid, tile_cout), lambda n, j: (0, j)),
            pl.BlockSpec((None, Hf, Wf, tile_cout), lambda n, j: (n, 0, 0, j)),
        ],
        out_specs=[
            pl.BlockSpec((None, Hf, Wf, tile_cout), lambda n, j: (n, 0, 0, j)),
            pl.BlockSpec((None, Hf, Wf, tile_cout), lambda n, j: (n, 0, 0, j)),
        ],
        scratch_shapes=[
            pltpu.VMEM((Hf + 2, Wf + 2, Cmid), jnp.bfloat16),
        ],
        compiler_params=pltpu.CompilerParams(
            dimension_semantics=("parallel", "arbitrary"),
            vmem_limit_bytes=_VMEM_LIMIT),
    )(f, s1.reshape(1, 1, Cmid), b1.reshape(1, 1, Cmid), w1_flat, x)


# ----------------------------------------------------------------------------
# Block forward (thin glue in plain JAX, hot path in the two fused kernels)
# ----------------------------------------------------------------------------
def _space_to_depth2(x):
    """(N, H, W, C) -> (N, H/2, W/2, 4C), channel groups ordered
    (row-parity, col-parity, C) -- makes stride-2 conv taps contiguous."""
    N, H, W, C = x.shape
    x = x.reshape(N, H // 2, 2, W // 2, 2, C)
    x = jnp.transpose(x, (0, 1, 3, 2, 4, 5))
    return x.reshape(N, H // 2, W // 2, 4 * C)


def block_ini_forward(x_and_f, params, stride):
    """JAX/Pallas equivalent of _BlockIni.forward (inputs/outputs NCHW)."""
    x_nchw = x_and_f[0]
    in_planes = x_nchw.shape[1]
    out_planes = params["w0"].shape[-1]
    has_shortcut = in_planes != out_planes

    x = jnp.transpose(x_nchw, (0, 2, 3, 1)).astype(jnp.float32)   # NCHW -> NHWC
    N, H, W, _ = x.shape

    # BN0 training-mode batch stats: two-pass mean/var (no E[x^2]-E[x]^2
    # cancellation), folded to per-channel scale/bias.
    mu0 = jnp.mean(x, axis=(0, 1, 2))
    var0 = jnp.mean(jnp.square(x - mu0), axis=(0, 1, 2))
    s0 = params["gamma0"] * jax.lax.rsqrt(var0 + _EPS)
    b0 = params["beta0"] - mu0 * s0

    w0_flat = params["w0"].reshape(9 * in_planes, out_planes).astype(jnp.bfloat16)
    w1_flat = params["w1"].reshape(9 * out_planes, out_planes).astype(jnp.bfloat16)
    tile_cout = 128 if out_planes % 128 == 0 else out_planes

    if stride == 1:
        x_in, s0_in, b0_in = x, s0, b0
    elif stride == 2:
        if H % 2 or W % 2:
            raise ValueError("stride-2 path requires even H and W.")
        x_in = _space_to_depth2(x)
        s0_in, b0_in = jnp.tile(s0, 4), jnp.tile(b0, 4)
    else:
        raise ValueError("Unsupported `stride`.")

    # BN0 + ReLU + explicit pad + conv_0 + BN1-stat partials, one kernel.
    f, fsum, fssq = conv0_bn_relu_fused(
        x_in, s0_in, b0_in, w0_flat, stride=stride, cin=in_planes,
        tile_cout=tile_cout)

    cnt = f.shape[0] * f.shape[1] * f.shape[2]
    mu1 = jnp.sum(fsum, axis=(0, 1)) / cnt
    var1 = jnp.maximum(jnp.sum(fssq, axis=(0, 1)) / cnt - mu1 * mu1, 0.0)
    s1 = params["gamma1"] * jax.lax.rsqrt(var1 + _EPS)
    b1 = params["beta1"] - mu1 * s1

    if has_shortcut:
        ws = params["ws"].astype(jnp.bfloat16)
        # Kernel 2 recomputes relu(BN0(x)) for the 1x1 shortcut (cheaper than
        # writing xk to HBM and reading it back).
        x_kp1, f_k = conv1_residual_shortcut(
            f, s1, b1, w1_flat, x_in, s0, b0, ws, tile_cout=tile_cout)
    else:
        if stride != 1:
            raise ValueError("Identity shortcut requires stride == 1.")
        x_kp1, f_k = conv1_residual_identity(
            f, s1, b1, w1_flat, x, tile_cout=tile_cout)

    x_kp1_nchw = jnp.transpose(x_kp1, (0, 3, 1, 2))
    f_k_nchw = jnp.transpose(f_k, (0, 3, 1, 2))
    return [x_kp1_nchw, f_k_nchw] + list(x_and_f[1:])


# ----------------------------------------------------------------------------
# Pure-JAX reference (ground truth) and deterministic params
# ----------------------------------------------------------------------------
def reference_forward(x_nchw, params, stride):
    x = jnp.transpose(x_nchw, (0, 2, 3, 1)).astype(jnp.float32)
    in_p, out_p = x.shape[-1], params["w0"].shape[-1]
    has_shortcut = in_p != out_p

    def bn_relu_ref(t, g, b):
        mu = jnp.mean(t, axis=(0, 1, 2))
        var = jnp.mean(jnp.square(t - mu), axis=(0, 1, 2))
        return jax.nn.relu((t - mu) * jax.lax.rsqrt(var + _EPS) * g + b)

    dn = ('NHWC', 'HWIO', 'NHWC')
    xk = bn_relu_ref(x, params["gamma0"], params["beta0"])
    hw = ((1, 1), (1, 1)) if stride == 1 else ((0, 1), (0, 1))
    v = jnp.pad(xk, ((0, 0), hw[0], hw[1], (0, 0)))
    f = jax.lax.conv_general_dilated(v, params["w0"], (stride, stride),
                                     'VALID', dimension_numbers=dn)
    fk = bn_relu_ref(f, params["gamma1"], params["beta1"])
    v1 = jnp.pad(fk, ((0, 0), (1, 1), (1, 1), (0, 0)))
    f_k = jax.lax.conv_general_dilated(v1, params["w1"], (1, 1),
                                       'VALID', dimension_numbers=dn)
    if has_shortcut:
        ws = params["ws"].reshape(1, 1, in_p, out_p)
        xs = jax.lax.conv_general_dilated(xk, ws, (stride, stride),
                                          'VALID', dimension_numbers=dn)
    else:
        xs = x
    x_kp1 = xs + f_k
    return jnp.transpose(x_kp1, (0, 3, 1, 2)), jnp.transpose(f_k, (0, 3, 1, 2))


def make_params(key, in_planes, out_planes):
    ks = jax.random.split(key, 7)

    def conv_w(k, kh, kw, cin, cout):
        fan_in = kh * kw * cin
        return (jax.random.normal(k, (kh, kw, cin, cout), jnp.float32)
                * jnp.sqrt(2.0 / fan_in))

    p = {
        "gamma0": 1.0 + 0.1 * jax.random.normal(ks[0], (in_planes,), jnp.float32),
        "beta0": 0.1 * jax.random.normal(ks[1], (in_planes,), jnp.float32),
        "w0": conv_w(ks[2], 3, 3, in_planes, out_planes),
        "gamma1": 1.0 + 0.1 * jax.random.normal(ks[3], (out_planes,), jnp.float32),
        "beta1": 0.1 * jax.random.normal(ks[4], (out_planes,), jnp.float32),
        "w1": conv_w(ks[5], 3, 3, out_planes, out_planes),
    }
    if in_planes != out_planes:
        p["ws"] = (jax.random.normal(ks[6], (in_planes, out_planes), jnp.float32)
                   * jnp.sqrt(2.0 / in_planes))
    return p


# ----------------------------------------------------------------------------
if __name__ == "__main__":
    key = jax.random.PRNGKey(0)
    kx1, kx2, kp1, kp2 = jax.random.split(key, 4)

    # Lane-dense demo widths (multiples of 128) so all channel slices are
    # tile-aligned; spatial kept small (16x16, batch 2).
    # Case 1: projection shortcut (128 -> 256), stride 1.
    x1 = jax.random.normal(kx1, (2, 128, 16, 16), jnp.float32)        # NCHW
    p1 = make_params(kp1, 128, 256)
    out1 = jax.block_until_ready(block_ini_forward([x1], p1, stride=1))
    assert out1[0].shape == (2, 256, 16, 16) and out1[1].shape == (2, 256, 16, 16)
    rx1, rf1 = reference_forward(x1, p1, 1)
    err1 = max(float(jnp.max(jnp.abs(out1[0] - rx1))),
               float(jnp.max(jnp.abs(out1[1] - rf1))))
    assert err1 < 5e-2, f"shortcut stride-1 mismatch vs reference: {err1}"

    # Case 2: identity shortcut (128 -> 128), stride 1, extra tensor carried
    # through the list (exercises the list passthrough semantics).
    x2 = jax.random.normal(kx2, (2, 128, 16, 16), jnp.float32)
    p2 = make_params(kp2, 128, 128)
    out2 = jax.block_until_ready(
        block_ini_forward([x2, out1[1]], p2, stride=1))
    assert len(out2) == 3 and out2[0].shape == (2, 128, 16, 16)
    rx2, rf2 = reference_forward(x2, p2, 1)
    err2 = max(float(jnp.max(jnp.abs(out2[0] - rx2))),
               float(jnp.max(jnp.abs(out2[1] - rf2))))
    assert err2 < 5e-2, f"identity stride-1 mismatch vs reference: {err2}"

    # Case 3: projection shortcut (128 -> 256), stride 2 (downsampling path).
    out3 = jax.block_until_ready(block_ini_forward([x1], p1, stride=2))
    assert out3[0].shape == (2, 256, 8, 8) and out3[1].shape == (2, 256, 8, 8)
    rx3, rf3 = reference_forward(x1, p1, 2)
    err3 = max(float(jnp.max(jnp.abs(out3[0] - rx3))),
               float(jnp.max(jnp.abs(out3[1] - rf3))))
    assert err3 < 5e-2, f"shortcut stride-2 mismatch vs reference: {err3}"

    print("KERNEL_OK")
</pallas_src>

<mosaic_0001>
module attributes {stable_mosaic.version = 11 : i64} {
  func.func @_bn_relu_conv0_kernel(%arg0: i32, %arg1: i32, %arg2: memref<1x16x16x128xf32, #tpu.memory_space<vmem>>, %arg3: memref<1x1x128xf32, #tpu.memory_space<vmem>>, %arg4: memref<1x1x128xf32, #tpu.memory_space<vmem>>, %arg5: memref<1152x128xbf16, #tpu.memory_space<vmem>>, %arg6: memref<1x16x16x128xbf16, #tpu.memory_space<vmem>>, %arg7: memref<1x1x128xf32, #tpu.memory_space<vmem>>, %arg8: memref<1x1x128xf32, #tpu.memory_space<vmem>>, %arg9: memref<18x18x128xbf16, #tpu.memory_space<vmem>>) attributes {dimension_semantics = [#tpu.dimension_semantics<parallel>, #tpu.dimension_semantics<arbitrary>], iteration_bounds = array<i64: 2, 2>, scalar_prefetch = 0 : i64, scratch_operands = 1 : i64, tpu.core_type = #tpu.core_type<tc>, window_params = [{transform_indices = @transform_0, window_bounds = array<i64: 1, 16, 16, 128>}, {pipeline_mode = #tpu.pipeline_mode<synchronous>, transform_indices = @transform_1, window_bounds = array<i64: 1, 1, 128>}, {pipeline_mode = #tpu.pipeline_mode<synchronous>, transform_indices = @transform_2, window_bounds = array<i64: 1, 1, 128>}, {transform_indices = @transform_3, window_bounds = array<i64: 1152, 128>}, {transform_indices = @transform_4, window_bounds = array<i64: 1, 16, 16, 128>}, {transform_indices = @transform_5, window_bounds = array<i64: 1, 1, 128>}, {transform_indices = @transform_6, window_bounds = array<i64: 1, 1, 128>}]} {
    %c0_i32 = arith.constant 0 : i32
    %0 = arith.cmpi eq, %arg1, %c0_i32 : i32
    %1 = arith.extui %0 : i1 to i32
    %c0_i32_0 = arith.constant 0 : i32
    %2 = arith.cmpi ne, %1, %c0_i32_0 : i32
    scf.if %2 {
      %cst_56 = arith.constant 0.000000e+00 : bf16
      %65 = vector.broadcast %cst_56 : bf16 to vector<1x18x128xbf16>
      %cst_57 = arith.constant 0.000000e+00 : bf16
      %66 = vector.broadcast %cst_57 : bf16 to vector<18x1x128xbf16>
      %c0_58 = arith.constant 0 : index
      %c0_59 = arith.constant 0 : index
      %c0_60 = arith.constant 0 : index
      %67 = vector.load %arg9[%c0_58, %c0_59, %c0_60] : memref<18x18x128xbf16, #tpu.memory_space<vmem>>, vector<1x18x128xbf16>
      tpu.vector_store %arg9[%c0_58, %c0_59, %c0_60], %65 {strides = array<i32>} : memref<18x18x128xbf16, #tpu.memory_space<vmem>>, vector<1x18x128xbf16>,
      %c0_61 = arith.constant 0 : index
      %c0_62 = arith.constant 0 : index
      %c0_63 = arith.constant 0 : index
      %68 = vector.load %arg9[%c0_61, %c0_62, %c0_63] : memref<18x18x128xbf16, #tpu.memory_space<vmem>>, vector<18x1x128xbf16>
      tpu.vector_store %arg9[%c0_61, %c0_62, %c0_63], %66 {strides = array<i32>} : memref<18x18x128xbf16, #tpu.memory_space<vmem>>, vector<18x1x128xbf16>,
      %c17 = arith.constant 17 : index
      %c0_64 = arith.constant 0 : index
      %c0_65 = arith.constant 0 : index
      %69 = vector.load %arg9[%c17, %c0_64, %c0_65] : memref<18x18x128xbf16, #tpu.memory_space<vmem>>, vector<1x18x128xbf16>
      tpu.vector_store %arg9[%c17, %c0_64, %c0_65], %65 {strides = array<i32>} : memref<18x18x128xbf16, #tpu.memory_space<vmem>>, vector<1x18x128xbf16>,
      %c0_66 = arith.constant 0 : index
      %c17_67 = arith.constant 17 : index
      %c0_68 = arith.constant 0 : index
      %70 = vector.load %arg9[%c0_66, %c17_67, %c0_68] : memref<18x18x128xbf16, #tpu.memory_space<vmem>>, vector<18x1x128xbf16>
      tpu.vector_store %arg9[%c0_66, %c17_67, %c0_68], %66 {strides = array<i32>} : memref<18x18x128xbf16, #tpu.memory_space<vmem>>, vector<18x1x128xbf16>,
      %c0_69 = arith.constant 0 : index
      %c0_70 = arith.constant 0 : index
      %c0_71 = arith.constant 0 : index
      %c0_72 = arith.constant 0 : index
      %71 = vector.load %arg2[%c0_69, %c0_70, %c0_71, %c0_72] : memref<1x16x16x128xf32, #tpu.memory_space<vmem>>, vector<1x16x16x128xf32>
      %72 = vector.shape_cast %71 : vector<1x16x16x128xf32> to vector<16x16x128xf32>
      %c0_73 = arith.constant 0 : index
      %c0_74 = arith.constant 0 : index
      %c0_75 = arith.constant 0 : index
      %73 = vector.load %arg3[%c0_73, %c0_74, %c0_75] : memref<1x1x128xf32, #tpu.memory_space<vmem>>, vector<1x1x128xf32>
      %74 = vector.broadcast %73 : vector<1x1x128xf32> to vector<16x16x128xf32>
      %75 = arith.mulf %72, %74 : vector<16x16x128xf32>
      %c0_76 = arith.constant 0 : index
      %c0_77 = arith.constant 0 : index
      %c0_78 = arith.constant 0 : index
      %76 = vector.load %arg4[%c0_76, %c0_77, %c0_78] : memref<1x1x128xf32, #tpu.memory_space<vmem>>, vector<1x1x128xf32>
      %77 = vector.broadcast %76 : vector<1x1x128xf32> to vector<16x16x128xf32>
      %78 = arith.addf %75, %77 : vector<16x16x128xf32>
      %cst_79 = arith.constant 0.000000e+00 : f32
      %79 = vector.broadcast %cst_79 : f32 to vector<16x16x128xf32>
      %80 = arith.maximumf %78, %79 : vector<16x16x128xf32>
      %81 = arith.truncf %80 : vector<16x16x128xf32> to vector<16x16x128xbf16>
      %c1_80 = arith.constant 1 : index
      %c1_81 = arith.constant 1 : index
      %c0_82 = arith.constant 0 : index
      %82 = vector.load %arg9[%c1_80, %c1_81, %c0_82] : memref<18x18x128xbf16, #tpu.memory_space<vmem>>, vector<16x16x128xbf16>
      tpu.vector_store %arg9[%c1_80, %c1_81, %c0_82], %81 {strides = array<i32>} : memref<18x18x128xbf16, #tpu.memory_space<vmem>>, vector<16x16x128xbf16>,
    } else {
    }
    %cst = arith.constant 0.000000e+00 : f32
    %3 = vector.broadcast %cst : f32 to vector<256x128xf32>
    %c0 = arith.constant 0 : index
    %c0_1 = arith.constant 0 : index
    %c0_2 = arith.constant 0 : index
    %4 = vector.load %arg9[%c0, %c0_1, %c0_2] : memref<18x18x128xbf16, #tpu.memory_space<vmem>>, vector<16x16x128xbf16>
    %5 = vector.shape_cast %4 : vector<16x16x128xbf16> to vector<256x128xbf16>
    %c0_3 = arith.constant 0 : index
    %c0_4 = arith.constant 0 : index
    %6 = vector.load %arg5[%c0_3, %c0_4] : memref<1152x128xbf16, #tpu.memory_space<vmem>>, vector<128x128xbf16>
    %cst_5 = arith.constant dense<0.000000e+00> : vector<256x128xf32>
    %7 = tpu.matmul %5, %6, %cst_5 {dimension_numbers = #tpu.dot_dimension_numbers<[1], [0], [0], [1], [0, 0, 1, 1], [], []>} : vector<256x128xbf16>, vector<128x128xbf16>, vector<256x128xf32> -> vector<256x128xf32>
    %8 = arith.addf %3, %7 : vector<256x128xf32>
    %c0_6 = arith.constant 0 : index
    %c1 = arith.constant 1 : index
    %c0_7 = arith.constant 0 : index
    %9 = vector.load %arg9[%c0_6, %c1, %c0_7] : memref<18x18x128xbf16, #tpu.memory_space<vmem>>, vector<16x16x128xbf16>
    %10 = vector.shape_cast %9 : vector<16x16x128xbf16> to vector<256x128xbf16>
    %c128 = arith.constant 128 : index
    %c0_8 = arith.constant 0 : index
    %11 = vector.load %arg5[%c128, %c0_8] : memref<1152x128xbf16, #tpu.memory_space<vmem>>, vector<128x128xbf16>
    %cst_9 = arith.constant dense<0.000000e+00> : vector<256x128xf32>
    %12 = tpu.matmul %10, %11, %cst_9 {dimension_numbers = #tpu.dot_dimension_numbers<[1], [0], [0], [1], [0, 0, 1, 1], [], []>} : vector<256x128xbf16>, vector<128x128xbf16>, vector<256x128xf32> -> vector<256x128xf32>
    %13 = arith.addf %8, %12 : vector<256x128xf32>
    %c0_10 = arith.constant 0 : index
    %c2 = arith.constant 2 : index
    %c0_11 = arith.constant 0 : index
    %14 = vector.load %arg9[%c0_10, %c2, %c0_11] : memref<18x18x128xbf16, #tpu.memory_space<vmem>>, vector<16x16x128xbf16>
    %15 = vector.shape_cast %14 : vector<16x16x128xbf16> to vector<256x128xbf16>
    %c256 = arith.constant 256 : index
    %c0_12 = arith.constant 0 : index
    %16 = vector.load %arg5[%c256, %c0_12] : memref<1152x128xbf16, #tpu.memory_space<vmem>>, vector<128x128xbf16>
    %cst_13 = arith.constant dense<0.000000e+00> : vector<256x128xf32>
    %17 = tpu.matmul %15, %16, %cst_13 {dimension_numbers = #tpu.dot_dimension_numbers<[1], [0], [0], [1], [0, 0, 1, 1], [], []>} : vector<256x128xbf16>, vector<128x128xbf16>, vector<256x128xf32> -> vector<256x128xf32>
    %18 = arith.addf %13, %17 : vector<256x128xf32>
    %c1_14 = arith.constant 1 : index
    %c0_15 = arith.constant 0 : index
    %c0_16 = arith.constant 0 : index
    %19 = vector.load %arg9[%c1_14, %c0_15, %c0_16] : memref<18x18x128xbf16, #tpu.memory_space<vmem>>, vector<16x16x128xbf16>
    %20 = vector.shape_cast %19 : vector<16x16x128xbf16> to vector<256x128xbf16>
    %c384 = arith.constant 384 : index
    %c0_17 = arith.constant 0 : index
    %21 = vector.load %arg5[%c384, %c0_17] : memref<1152x128xbf16, #tpu.memory_space<vmem>>, vector<128x128xbf16>
    %cst_18 = arith.constant dense<0.000000e+00> : vector<256x128xf32>
    %22 = tpu.matmul %20, %21, %cst_18 {dimension_numbers = #tpu.dot_dimension_numbers<[1], [0], [0], [1], [0, 0, 1, 1], [], []>} : vector<256x128xbf16>, vector<128x128xbf16>, vector<256x128xf32> -> vector<256x128xf32>
    %23 = arith.addf %18, %22 : vector<256x128xf32>
    %c1_19 = arith.constant 1 : index
    %c1_20 = arith.constant 1 : index
    %c0_21 = arith.constant 0 : index
    %24 = vector.load %arg9[%c1_19, %c1_20, %c0_21] : memref<18x18x128xbf16, #tpu.memory_space<vmem>>, vector<16x16x128xbf16>
    %25 = vector.shape_cast %24 : vector<16x16x128xbf16> to vector<256x128xbf16>
    %c512 = arith.constant 512 : index
    %c0_22 = arith.constant 0 : index
    %26 = vector.load %arg5[%c512, %c0_22] : memref<1152x128xbf16, #tpu.memory_space<vmem>>, vector<128x128xbf16>
    %cst_23 = arith.constant dense<0.000000e+00> : vector<256x128xf32>
    %27 = tpu.matmul %25, %26, %cst_23 {dimension_numbers = #tpu.dot_dimension_numbers<[1], [0], [0], [1], [0, 0, 1, 1], [], []>} : vector<256x128xbf16>, vector<128x128xbf16>, vector<256x128xf32> -> vector<256x128xf32>
    %28 = arith.addf %23, %27 : vector<256x128xf32>
    %c1_24 = arith.constant 1 : index
    %c2_25 = arith.constant 2 : index
    %c0_26 = arith.constant 0 : index
    %29 = vector.load %arg9[%c1_24, %c2_25, %c0_26] : memref<18x18x128xbf16, #tpu.memory_space<vmem>>, vector<16x16x128xbf16>
    %30 = vector.shape_cast %29 : vector<16x16x128xbf16> to vector<256x128xbf16>
    %c640 = arith.constant 640 : index
    %c0_27 = arith.constant 0 : index
    %31 = vector.load %arg5[%c640, %c0_27] : memref<1152x128xbf16, #tpu.memory_space<vmem>>, vector<128x128xbf16>
    %cst_28 = arith.constant dense<0.000000e+00> : vector<256x128xf32>
    %32 = tpu.matmul %30, %31, %cst_28 {dimension_numbers = #tpu.dot_dimension_numbers<[1], [0], [0], [1], [0, 0, 1, 1], [], []>} : vector<256x128xbf16>, vector<128x128xbf16>, vector<256x128xf32> -> vector<256x128xf32>
    %33 = arith.addf %28, %32 : vector<256x128xf32>
    %c2_29 = arith.constant 2 : index
    %c0_30 = arith.constant 0 : index
    %c0_31 = arith.constant 0 : index
    %34 = vector.load %arg9[%c2_29, %c0_30, %c0_31] : memref<18x18x128xbf16, #tpu.memory_space<vmem>>, vector<16x16x128xbf16>
    %35 = vector.shape_cast %34 : vector<16x16x128xbf16> to vector<256x128xbf16>
    %c768 = arith.constant 768 : index
    %c0_32 = arith.constant 0 : index
    %36 = vector.load %arg5[%c768, %c0_32] : memref<1152x128xbf16, #tpu.memory_space<vmem>>, vector<128x128xbf16>
    %cst_33 = arith.constant dense<0.000000e+00> : vector<256x128xf32>
    %37 = tpu.matmul %35, %36, %cst_33 {dimension_numbers = #tpu.dot_dimension_numbers<[1], [0], [0], [1], [0, 0, 1, 1], [], []>} : vector<256x128xbf16>, vector<128x128xbf16>, vector<256x128xf32> -> vector<256x128xf32>
    %38 = arith.addf %33, %37 : vector<256x128xf32>
    %c2_34 = arith.constant 2 : index
    %c1_35 = arith.constant 1 : index
    %c0_36 = arith.constant 0 : index
    %39 = vector.load %arg9[%c2_34, %c1_35, %c0_36] : memref<18x18x128xbf16, #tpu.memory_space<vmem>>, vector<16x16x128xbf16>
    %40 = vector.shape_cast %39 : vector<16x16x128xbf16> to vector<256x128xbf16>
    %c896 = arith.constant 896 : index
    %c0_37 = arith.constant 0 : index
    %41 = vector.load %arg5[%c896, %c0_37] : memref<1152x128xbf16, #tpu.memory_space<vmem>>, vector<128x128xbf16>
    %cst_38 = arith.constant dense<0.000000e+00> : vector<256x128xf32>
    %42 = tpu.matmul %40, %41, %cst_38 {dimension_numbers = #tpu.dot_dimension_numbers<[1], [0], [0], [1], [0, 0, 1, 1], [], []>} : vector<256x128xbf16>, vector<128x128xbf16>, vector<256x128xf32> -> vector<256x128xf32>
    %43 = arith.addf %38, %42 : vector<256x128xf32>
    %c2_39 = arith.constant 2 : index
    %c2_40 = arith.constant 2 : index
    %c0_41 = arith.constant 0 : index
    %44 = vector.load %arg9[%c2_39, %c2_40, %c0_41] : memref<18x18x128xbf16, #tpu.memory_space<vmem>>, vector<16x16x128xbf16>
    %45 = vector.shape_cast %44 : vector<16x16x128xbf16> to vector<256x128xbf16>
    %c1024 = arith.constant 1024 : index
    %c0_42 = arith.constant 0 : index
    %46 = vector.load %arg5[%c1024, %c0_42] : memref<1152x128xbf16, #tpu.memory_space<vmem>>, vector<128x128xbf16>
    %cst_43 = arith.constant dense<0.000000e+00> : vector<256x128xf32>
    %47 = tpu.matmul %45, %46, %cst_43 {dimension_numbers = #tpu.dot_dimension_numbers<[1], [0], [0], [1], [0, 0, 1, 1], [], []>} : vector<256x128xbf16>, vector<128x128xbf16>, vector<256x128xf32> -> vector<256x128xf32>
    %48 = arith.addf %43, %47 : vector<256x128xf32>
    %49 = vector.shape_cast %48 : vector<256x128xf32> to vector<16x16x128xf32>
    %50 = arith.truncf %49 : vector<16x16x128xf32> to vector<16x16x128xbf16>
    %c0_44 = arith.constant 0 : index
    %c0_45 = arith.constant 0 : index
    %c0_46 = arith.constant 0 : index
    %c0_47 = arith.constant 0 : index
    %51 = vector.load %arg6[%c0_44, %c0_45, %c0_46, %c0_47] : memref<1x16x16x128xbf16, #tpu.memory_space<vmem>>, vector<1x16x16x128xbf16>
    %52 = vector.shape_cast %51 : vector<1x16x16x128xbf16> to vector<16x16x128xbf16>
    %53 = vector.shape_cast %50 : vector<16x16x128xbf16> to vector<1x16x16x128xbf16>
    tpu.vector_store %arg6[%c0_44, %c0_45, %c0_46, %c0_47], %53 {strides = array<i32>} : memref<1x16x16x128xbf16, #tpu.memory_space<vmem>>, vector<1x16x16x128xbf16>,
    %cst_48 = arith.constant dense<0.000000e+00> : vector<128xf32>
    %54 = vector.multi_reduction <add>, %48, %cst_48 [0] : vector<256x128xf32> to vector<128xf32>
    %55 = vector.shape_cast %54 : vector<128xf32> to vector<1x128xf32>
    %c0_49 = arith.constant 0 : index
    %c0_50 = arith.constant 0 : index
    %c0_51 = arith.constant 0 : index
    %56 = vector.load %arg7[%c0_49, %c0_50, %c0_51] : memref<1x1x128xf32, #tpu.memory_space<vmem>>, vector<1x1x128xf32>
    %57 = vector.shape_cast %56 : vector<1x1x128xf32> to vector<1x128xf32>
    %58 = vector.shape_cast %55 : vector<1x128xf32> to vector<1x1x128xf32>
    tpu.vector_store %arg7[%c0_49, %c0_50, %c0_51], %58 {strides = array<i32>} : memref<1x1x128xf32, #tpu.memory_space<vmem>>, vector<1x1x128xf32>,
    %59 = arith.mulf %48, %48 : vector<256x128xf32>
    %cst_52 = arith.constant dense<0.000000e+00> : vector<128xf32>
    %60 = vector.multi_reduction <add>, %59, %cst_52 [0] : vector<256x128xf32> to vector<128xf32>
    %61 = vector.shape_cast %60 : vector<128xf32> to vector<1x128xf32>
    %c0_53 = arith.constant 0 : index
    %c0_54 = arith.constant 0 : index
    %c0_55 = arith.constant 0 : index
    %62 = vector.load %arg8[%c0_53, %c0_54, %c0_55] : memref<1x1x128xf32, #tpu.memory_space<vmem>>, vector<1x1x128xf32>
    %63 = vector.shape_cast %62 : vector<1x1x128xf32> to vector<1x128xf32>
    %64 = vector.shape_cast %61 : vector<1x128xf32> to vector<1x1x128xf32>
    tpu.vector_store %arg8[%c0_53, %c0_54, %c0_55], %64 {strides = array<i32>} : memref<1x1x128xf32, #tpu.memory_space<vmem>>, vector<1x1x128xf32>,
    return
  }
  func.func @transform_0(%arg0: i32, %arg1: i32) -> (i32, i32, i32, i32) {
    %c0_i32 = arith.constant 0 : i32
    %c0_i32_0 = arith.constant 0 : i32
    %c0_i32_1 = arith.constant 0 : i32
    %c0_i32_2 = arith.constant 0 : i32
    return %arg0, %c0_i32, %c0_i32_0, %c0_i32_1 : i32, i32, i32, i32
  }
  func.func @transform_1(%arg0: i32, %arg1: i32) -> (i32, i32, i32) {
    %c0_i32 = arith.constant 0 : i32
    %c0_i32_0 = arith.constant 0 : i32
    %c0_i32_1 = arith.constant 0 : i32
    %c0_i32_2 = arith.constant 0 : i32
    return %c0_i32, %c0_i32_0, %c0_i32_1 : i32, i32, i32
  }
  func.func @transform_2(%arg0: i32, %arg1: i32) -> (i32, i32, i32) {
    %c0_i32 = arith.constant 0 : i32
    %c0_i32_0 = arith.constant 0 : i32
    %c0_i32_1 = arith.constant 0 : i32
    %c0_i32_2 = arith.constant 0 : i32
    return %c0_i32, %c0_i32_0, %c0_i32_1 : i32, i32, i32
  }
  func.func @transform_3(%arg0: i32, %arg1: i32) -> (i32, i32) {
    %c0_i32 = arith.constant 0 : i32
    %c0_i32_0 = arith.constant 0 : i32
    return %c0_i32, %arg1 : i32, i32
  }
  func.func @transform_4(%arg0: i32, %arg1: i32) -> (i32, i32, i32, i32) {
    %c0_i32 = arith.constant 0 : i32
    %c0_i32_0 = arith.constant 0 : i32
    %c0_i32_1 = arith.constant 0 : i32
    return %arg0, %c0_i32, %c0_i32_0, %arg1 : i32, i32, i32, i32
  }
  func.func @transform_5(%arg0: i32, %arg1: i32) -> (i32, i32, i32) {
    %c0_i32 = arith.constant 0 : i32
    %c0_i32_0 = arith.constant 0 : i32
    return %arg0, %c0_i32, %arg1 : i32, i32, i32
  }
  func.func @transform_6(%arg0: i32, %arg1: i32) -> (i32, i32, i32) {
    %c0_i32 = arith.constant 0 : i32
    %c0_i32_0 = arith.constant 0 : i32
    return %arg0, %c0_i32, %arg1 : i32, i32, i32
  }
}

</mosaic_0001>

<bundles_post_ra>
// kernel: tpu_custom_call.1
= control target key start
LH: loop header
LB: loop body
LE: loop exit
PB: predicated region body
PF: predicated region fallthrough
CT: control target
= control target key end

     0   :  { %s8646_s0 = inlined_call_operand.hbm [shape: f32[2,16,16,128], index: 0, kind: input, shape index: {}]   ;;  %s8647_s1 = inlined_call_operand.hbm [shape: f32[1,1,128], index: 1, kind: input, shape index: {}]   ;;  %s8648_s2 = inlined_call_operand.vmem [shape: f32[1,1,128], index: 2, kind: input, shape index: {}]   ;;  %s8649_s3 = inlined_call_operand.hbm [shape: bf16[1152,256], index: 3, kind: input, shape index: {}]   ;;  %s8650_s4 = inlined_call_operand.hbm [shape: bf16[2,16,16,256], index: 4, kind: output, shape index: {0}]   ;;  %s8651_s5 = inlined_call_operand.hbm [shape: f32[2,1,256], index: 5, kind: output, shape index: {1}]   ;;  %s8652_s6 = inlined_call_operand.hbm [shape: f32[2,1,256], index: 6, kind: output, shape index: {2}]  }
   0x1   :  { %8665 = sst [smem:[#allocation32_spill]] %s8646_s0 }
   0x2   :  { %8666 = sst [smem:[#allocation33_spill]] %s8647_s1 }
   0x3   :  { %8667 = sst [smem:[#allocation34_spill]] %s8648_s2 }
   0x4   :  { %8668 = sst [smem:[#allocation35_spill]] %s8650_s4 }
   0x5   :  { %8669 = sst [smem:[#allocation36_spill]] %s8651_s5 }
   0x6   :  { %8670 = sst [smem:[#allocation37_spill]] %s8652_s6 }
   0x7   :  { %12 = vsyncpa [#allocation4], 0 }
   0x8   :  { %14 = vsyncpa [#allocation4 + $0x1], 0 }
   0x9   :  { %15 = vsyncpa [#allocation7], 0 }
   0xa   :  { %16 = vsyncpa [#allocation5], 0 }
   0xb   :  { %18 = vsyncpa [#allocation5 + $0x1], 0 }
   0xc   :  { %19 = vsyncpa [#allocation11], 0 }
   0xd   :  { %21 = vsyncpa [#allocation11 + $0x1], 0  ;;  %s6999_s21 = smov 0   ;;  %s7001_s22 = smov 0  }
   0xe   :  { %s7003_s23 = smov 0   ;;  %s7005_s24 = smov 0  }
   0xf   :  { %s7007_s25 = smov 0   ;;  %s7009_s26 = smov 0  }
  0x10   :  { %s7011_s27 = smov 0   ;;  %s7013_s28 = smov 0  }
  0x11   :  { %s7015_s29 = smov 0   ;;  %s7017_s30 = smov 0  }
  0x12   :  { %s7019_s7 = smov 0   ;;  %s7021_s8 = smov 0  }
  0x13   :  { %s7023_s9 = smov 0   ;;  %s7025_s10 = smov 0  }
  0x14 LB: > { %8671 = sst [smem:[#allocation18_spill]] %s6909_s23  ;;  %s36_s11 = sadd.s32 1, %s6945_s8  ;;  %s6953_s10 = sphi %s7025_s10, %s27_s10   ;;  %s6949_s9 = sphi %s7023_s9, %s8730_s9   ;;  %s6945_s8 = sphi %s7021_s8, %s8740_s8   ;;  %s6941_s7 = sphi %s7019_s7, %s8728_s7   ;;  %s6937_s30 = sphi %s7017_s30, %s8739_s30   ;;  %s6933_s29 = sphi %s7015_s29, %s8727_s29   ;;  %s6929_s28 = sphi %s7013_s28, %s8738_s28   ;;  %s6925_s27 = sphi %s7011_s27, %s8737_s27   ;;  %s6921_s26 = sphi %s7009_s26, %s8736_s26   ;;  %s6917_s25 = sphi %s7007_s25, %s8735_s25   ;;  %s6913_s24 = sphi %s7005_s24, %s8734_s24   ;;  %s6909_s23 = sphi %s7003_s23, %s8724_s23   ;;  %s6905_s22 = sphi %s7001_s22, %s8733_s22   ;;  %s6901_s21 = sphi %s6999_s21, %s8732_s21  }
  0x15   : > { %8672 = sst [smem:[#allocation19_spill]] %s6933_s29  ;;  %s39_s12 = sadd.s32 1, %s6949_s9 }
  0x16   : > { %8673 = sst [smem:[#allocation20_spill]] %s6941_s7  ;;  %p37_p0 = scmp.ge.s32.totalorder %s36_s11, 2 }
  0x17   : > { %8674 = sst [smem:[#allocation21_spill]] %s6949_s9  ;;  %s46_s13 = sadd.s32 1, %s6933_s29 }
  0x18   : > { %p53_p1 = scmp.ne.s32.totalorder %s6933_s29, %s6929_s28  ;;  %p54_p2 = scmp.eq.s32.totalorder %s6953_s10, 0 }
  0x19   : > { %s8742_s11 = smov (%p37_p0, %s36_s11), 0  ;;  %s8744_s12 = smov (!%p37_p0, %s39_s12), %s6949_s9 }
  0x1a   : > { %8675 = sst [smem:[#allocation22_spill]] %s8742_s11  ;;  %p7080_p3 = por %p54_p2, %p53_p1 }
  0x1b   : > { %s7086_s15 = ssub.s32 %s6945_s8, %s8742_s11  ;;  %p41_p4 = scmp.ge.s32.totalorder %s8744_s12, 2 }
  0x1c   : > { %p112_p5 = scmp.eq.s32.totalorder %s7086_s15, 0  ;;  %p6469_p6 = scmp.lt.s32.totalorder %s6953_s10, 4 }
  0x1d   : > { %s8746_s12 = smov (%p41_p4, %s8744_s12), 0  ;;  %s250_s16 = sand.u32 1, %s6953_s10  }
  0x1e   : > { %8677 = sst [smem:[#allocation23_spill]] %s8746_s12  ;;  %s252_s17 = sand.u32 1, %s6933_s29  }
  0x1f   : > { %s43_s18 = ssub.s32 %s6949_s9, %s8746_s12  ;;  %s5647_s11 = sshll.u32 %s252_s17, 8 }
  0x20   : > { %p44_p7 = scmp.eq.s32.totalorder %s43_s18, 0  ;;  %s139_s19 = sor.u32 %s7086_s15, %s43_s18 }
  0x21   : > { %p7097_p8 = scmp.eq.s32.totalorder %s139_s19, 0  ;;  %s6191_s5 = sshll.u32 %s6949_s9, 8 }
  0x22   : > { %s7102_s6 = scalar_select %p44_p7, %s6933_s29, %s46_s13  }
  0x23   : > { %s8680_s0 = sld [smem:[#allocation32_spill]]  ;;  %s254_s18 = scalar_lea.vmem [#allocation3], %s5647_s11 }
  0x24   : > { %8679 = sst [smem:[#allocation24_spill]] %s7102_s6  ;;  %s262_s12 = sshll.u32 %s254_s18, 4  ;;  %s263_s12 = int_to_ptr.vmem [resolvable:$true] %s262_s12 }
  0x25   : > { %p6452_p9 = pnand %p6469_p6, %p7080_p3  ;;  %s7112_s4 = scalar_lea.sflag [#allocation4], %s250_s16 }
  0x26   : > { %s6956_s7 = smov 8   ;;  %s8659_s11 = sadd.s32 4294967294, %s6953_s10  }
  0x27   : > { %p59_p10 = scmp.ne.s32.totalorder %s6929_s28, %s6925_s27  ;;  %s114_s13 = sadd.s32 1, %s6921_s26 }
  0x28   : > { %s7128_s14 = scalar_select %p112_p5, %s6921_s26, %s114_s13  }
  0x29   : > { %s259_s2 = scalar_lea.hbm %s8680_s0, %s6191_s5  ;;  %s8660_s5 = smov 128  }
  0x2a   : > { %s260_s19 = sshll.u32 %s259_s2, 4  ;;  %s7118_s2 = sadd.s32 4294967295, %s6953_s10   ;;  %s261_s19 = int_to_ptr.hbm [resolvable:$true] %s260_s19 }
  0x2b   : > { %6454 = dma.hbm_to_vmem [thread:$0]  (!%p6452_p9), %s261_s19, 4096, %s263_s12, %s7112_s4, %s8660_s5, %s8660_s5, %s6956_s7  }
  0x2c   : > { %p60_p11 = scmp.eq.s32.totalorder %s7118_s2, 0  ;;  %8681 = sst [smem:[#allocation25_spill]] %s7128_s14 }
  0x2d   : > { %p121_p13 = scmp.ne.s32.totalorder %s6921_s26, %s6917_s25  ;;  %p127_p0 = scmp.ne.s32.totalorder %s6917_s25, %s6913_s24 }
  0x2e   : > { %p7132_p12 = por %p60_p11, %p59_p10  ;;  %s142_s16 = sadd.s32 1, %s6909_s23 }
  0x2f   : > { %p7143_p1 = por %p121_p13, %p54_p2  ;;  %p152_p3 = scmp.ne.s32.totalorder %s6909_s23, %s6905_s22 }
  0x30   : > { %p7151_p4 = por %p127_p0, %p60_p11  ;;  %p153_p5 = scmp.eq.s32.totalorder %s7118_s2, 3 }
  0x31   : > { %s7159_s15 = scalar_select %p7097_p8, %s6909_s23, %s142_s16  }
  0x32   : > { %p7161_p7 = por %p153_p5, %p152_p3  ;;  %p158_p2 = scmp.ne.s32.totalorder %s6905_s22, %s6901_s21 }
  0x33   : > { %8685 = sst [smem:[#allocation26_spill]] %s7159_s15  ;;  %p159_p9 = scmp.eq.s32.totalorder %s8659_s11, 3 }
  0x34   : > { %p5644_p10 = scmp.ge.s32.totalorder %s6953_s10, 1  ;;  %p222_p13 = scmp.lt.s32.totalorder %s6953_s10, 5 }
  0x35   : > { %p7171_p0 = por %p159_p9, %p158_p2  ;;  %s8688_s1 = sld [smem:[#allocation33_spill]] }
  0x36   : > { %p7178_p8 = pnand %p5644_p10, %p222_p13  ;;  %p7186_p3 = pnand %p6469_p6, %p7143_p1 }
  0x37   : > { %s6957_s11 = smov [#allocation6]   ;;  %s274_s19 = sand.u32 1, %s6921_s26  }
  0x38   : > { %p6447_p5 = pneg %p7178_p8  ;;  %s236_s5 = sshll.u32 %s6957_s11, 4  ;;  %s237_s5 = int_to_ptr.vmem [resolvable:$true] %s236_s5 }
  0x39   : > { %s6431_s20 = smul.u32 576, %s274_s19  ;;  %s5650_s0 = sshll.u32 %s6945_s8, 2 }
  0x3a   : > { %p6448_p2 = pnand %p6447_p5, %p60_p11  ;;  %s280_s17 = scalar_lea.hbm %s8649_s3, %s5650_s0 }
  0x3b   : > { %s234_s7 = sshll.u32 %s8688_s1, 4  ;;  %s281_s6 = sshll.u32 %s280_s17, 4  ;;  %s235_s7 = int_to_ptr.hbm [resolvable:$true] %s234_s7  ;;  %s282_s6 = int_to_ptr.hbm [resolvable:$true] %s281_s6 }
  0x3c   : > { %6450 = dma.hbm_to_vmem [thread:$0]  (!%p6448_p2), %s235_s7, 16, %s237_s5, [#allocation7]  }
  0x3d   : > { %s276_s29 = scalar_lea.vmem [#allocation8], %s6431_s20  ;;  %s6958_s15 = smov 64  }
  0x3e   : > { %s283_s14 = sshll.u32 %s276_s29, 4  ;;  %s6959_s23 = smov 4   ;;  %s284_s14 = int_to_ptr.vmem [resolvable:$true] %s283_s14 }
  0x3f   : > { %s8691_s11 = smov 128   ;;  %295 = sbr.rel (%p7178_p8) target bundleno = 985 (0x3d9), region = 36 }
  0x40   : > { %6457 = dma.hbm_to_vmem [thread:$0]  (!%p7186_p3), %s282_s6, 9216, %s284_s14, %s7112_s4, %s8691_s11, %s6958_s15, %s6959_s23  }
  0x44   : > { %s8664_s1 = sand.u32 1, %s7118_s2   ;;  %s299_s0 = sand.u32 1, %s6929_s28  }
  0x45   : > { %s5652_s9 = sshll.u32 %s299_s0, 8  ;;  %s298_s5 = scalar_lea.sflag [#allocation4], %s8664_s1 }
  0x46   : > { %s7209_s7 = scalar_lea.vmem [#allocation3], %s5652_s9 }
  0x47   : > { %6880 = dma.done.wait (%p7132_p12), %s298_s5, 4096  }
  0x48   : > { %6882 = vsyncadd (%p7132_p12), %s298_s5, 4294963200 }
  0x49   : > { %6884 = dma.done.wait (%p60_p11), [#allocation7], 16  }
  0x4a   : > { %6886 = vsyncadd (%p60_p11), [#allocation7], 4294967280  ;;  %s314_s6 = sand.u32 1, %s6917_s25  }
  0x4b   : > { %s6432_s23 = smul.u32 576, %s314_s6 }
  0x4d   : > { %s7220_s29 = scalar_lea.vmem [#allocation8], %s6432_s23 }
  0x4e   : > { %6888 = dma.done.wait (%p7151_p4), %s298_s5, 9216  }
  0x4f   : > { %6890 = vsyncadd (%p7151_p4), %s298_s5, 4294958080  ;;  %s7227_s4 = sand.u32 1, %s6905_s22   ;;  %p5655_p6 = scmp.ne.s32.totalorder %s6937_s30, 0 }
  0x50   : > { %s5654_s14 = sshll.u32 %s7227_s4, 7  ;;  %s352_s15 = scalar_lea.vmem [#allocation10], %s7227_s4 }
  0x51   : > { %s7230_s12 = scalar_lea.vmem [#allocation9], %s5654_s14  ;;  %s358_s13 = scalar_lea.vmem [#allocation12], %s7227_s4 }
  0x52   : > { %363 = sbr.rel (%p5655_p6) target bundleno = 208 (0xd0), region = 52  ;;  %s8696_s19 = sld [smem:[#allocation34_spill]] (!%p5655_p6) }
  0x57   : > { %vm367_vm0 = vcmask 1040384   ;;  %vm368_vm1 = vsmask.f32 256  ;;  %v373_v0 = vld [vmem:[#allocation2 + $0xc] sm:$0x1]  ;;  %v6960_v1 = vmov 0  }
  0x58   : > { %364 = vst [vmem:[#allocation2] sm:$0xf] %v6960_v1  ;;  %vm7238_vm2 = vmand %vm367_vm0, %vm368_vm1  ;;  %v376_v3 = vld [vmem:[#allocation2 + $0x18] sm:$0x1]  ;;  %v379_v4 = vld [vmem:[#allocation2 + $0x24] sm:$0x1] }
  0x59   : > { %365 = vst [vmem:[#allocation2 + $0x4] sm:$0xf] %v6960_v1  ;;  %v374_v5 = vsel %vm7238_vm2, 0, %v373_v0  ;;  %v377_v6 = vsel %vm7238_vm2, 0, %v376_v3  ;;  %v382_v7 = vld [vmem:[#allocation2 + $0x30] sm:$0x1] }
  0x5a   : > { %366 = vst [vmem:[#allocation2 + $0x8] sm:$0x1] %v6960_v1  ;;  %v385_v8 = vld [vmem:[#allocation2 + $0x3c] sm:$0x1]  ;;  %v388_v9 = vld [vmem:[#allocation2 + $0x48] sm:$0x1] }
  0x5b   : > { %426 = vst [vmem:[#allocation2 + $0xd0] sm:$0xf] %v6960_v1  ;;  %v380_v10 = vsel %vm7238_vm2, 0, %v379_v4  ;;  %v383_v11 = vsel %vm7238_vm2, 0, %v382_v7  ;;  %v391_v12 = vld [vmem:[#allocation2 + $0x54] sm:$0x1] }
  0x5c   : > { %427 = vst [vmem:[#allocation2 + $0xd4] sm:$0x1] %v6960_v1  ;;  %v394_v13 = vld [vmem:[#allocation2 + $0x60] sm:$0x1]  ;;  %v386_v14 = vsel %vm7238_vm2, 0, %v385_v8  ;;  %v389_v15 = vsel %vm7238_vm2, 0, %v388_v9 }
  0x5d   : > { %375 = vst [vmem:[#allocation2 + $0xc] sm:$0x1] %v374_v5  ;;  %v397_v16 = vld [vmem:[#allocation2 + $0x6c] sm:$0x1]  ;;  %v400_v17 = vld [vmem:[#allocation2 + $0x78] sm:$0x1] }
  0x5e   : > { %378 = vst [vmem:[#allocation2 + $0x18] sm:$0x1] %v377_v6  ;;  %v392_v18 = vsel %vm7238_vm2, 0, %v391_v12  ;;  %v395_v19 = vsel %vm7238_vm2, 0, %v394_v13  ;;  %v403_v20 = vld [vmem:[#allocation2 + $0x84] sm:$0x1] }
  0x5f   : > { %381 = vst [vmem:[#allocation2 + $0x24] sm:$0x1] %v380_v10  ;;  %v406_v21 = vld [vmem:[#allocation2 + $0x90] sm:$0x1]  ;;  %v398_v22 = vsel %vm7238_vm2, 0, %v397_v16  ;;  %v401_v23 = vsel %vm7238_vm2, 0, %v400_v17 }
  0x60   : > { %384 = vst [vmem:[#allocation2 + $0x30] sm:$0x1] %v383_v11  ;;  %v409_v24 = vld [vmem:[#allocation2 + $0x9c] sm:$0x1]  ;;  %v412_v25 = vld [vmem:[#allocation2 + $0xa8] sm:$0x1] }
  0x61   : > { %387 = vst [vmem:[#allocation2 + $0x3c] sm:$0x1] %v386_v14  ;;  %v404_v26 = vsel %vm7238_vm2, 0, %v403_v20  ;;  %v407_v27 = vsel %vm7238_vm2, 0, %v406_v21  ;;  %v415_v28 = vld [vmem:[#allocation2 + $0xb4] sm:$0x1] }
  0x62   : > { %390 = vst [vmem:[#allocation2 + $0x48] sm:$0x1] %v389_v15  ;;  %v418_v29 = vld [vmem:[#allocation2 + $0xc0] sm:$0x1]  ;;  %v410_v30 = vsel %vm7238_vm2, 0, %v409_v24  ;;  %v413_v31 = vsel %vm7238_vm2, 0, %v412_v25 }
  0x63   : > { %393 = vst [vmem:[#allocation2 + $0x54] sm:$0x1] %v392_v18  ;;  %vm428_vm3 = vsmask.f32 7938  ;;  %v433_v33 = vld [vmem:[#allocation2 + $0x14] sm:$0x1] }
  0x64   : > { %396 = vst [vmem:[#allocation2 + $0x60] sm:$0x1] %v395_v19  ;;  %vm7276_vm4 = vmand %vm367_vm0, %vm428_vm3  ;;  %v436_v34 = vld [vmem:[#allocation2 + $0x20] sm:$0x1]  ;;  %v416_v35 = vsel %vm7238_vm2, 0, %v415_v28  ;;  %v419_v36 = vsel %vm7238_vm2, 0, %v418_v29 }
  0x65   : > { %399 = vst [vmem:[#allocation2 + $0x6c] sm:$0x1] %v398_v22  ;;  %v439_v37 = vld [vmem:[#allocation2 + $0x2c] sm:$0x1]  ;;  %v442_v38 = vld [vmem:[#allocation2 + $0x38] sm:$0x1] }
  0x66   : > { %402 = vst [vmem:[#allocation2 + $0x78] sm:$0x1] %v401_v23  ;;  %v434_v39 = vsel %vm7276_vm4, 0, %v433_v33  ;;  %v437_v40 = vsel %vm7276_vm4, 0, %v436_v34  ;;  %v445_v41 = vld [vmem:[#allocation2 + $0x44] sm:$0x1] }
  0x67   : > { %405 = vst [vmem:[#allocation2 + $0x84] sm:$0x1] %v404_v26  ;;  %v448_v42 = vld [vmem:[#allocation2 + $0x50] sm:$0x1]  ;;  %v440_v43 = vsel %vm7276_vm4, 0, %v439_v37  ;;  %v443_v44 = vsel %vm7276_vm4, 0, %v442_v38 }
  0x68   : > { %408 = vst [vmem:[#allocation2 + $0x90] sm:$0x1] %v407_v27  ;;  %v451_v45 = vld [vmem:[#allocation2 + $0x5c] sm:$0x1]  ;;  %v454_v46 = vld [vmem:[#allocation2 + $0x68] sm:$0x1] }
  0x69   : > { %411 = vst [vmem:[#allocation2 + $0x9c] sm:$0x1] %v410_v30  ;;  %v446_v47 = vsel %vm7276_vm4, 0, %v445_v41  ;;  %v449_v48 = vsel %vm7276_vm4, 0, %v448_v42  ;;  %v457_v49 = vld [vmem:[#allocation2 + $0x74] sm:$0x1] }
  0x6a   : > { %414 = vst [vmem:[#allocation2 + $0xa8] sm:$0x1] %v413_v31  ;;  %v460_v50 = vld [vmem:[#allocation2 + $0x80] sm:$0x1]  ;;  %v452_v51 = vsel %vm7276_vm4, 0, %v451_v45  ;;  %v455_v52 = vsel %vm7276_vm4, 0, %v454_v46 }
  0x6b   : > { %417 = vst [vmem:[#allocation2 + $0xb4] sm:$0x1] %v416_v35  ;;  %v463_v53 = vld [vmem:[#allocation2 + $0x8c] sm:$0x1]  ;;  %v466_v54 = vld [vmem:[#allocation2 + $0x98] sm:$0x1] }
  0x6c   : > { %420 = vst [vmem:[#allocation2 + $0xc0] sm:$0x1] %v419_v36  ;;  %v458_v55 = vsel %vm7276_vm4, 0, %v457_v49  ;;  %v461_v56 = vsel %vm7276_vm4, 0, %v460_v50  ;;  %v469_v57 = vld [vmem:[#allocation2 + $0xa4] sm:$0x1] }
  0x6d   : > { %435 = vst [vmem:[#allocation2 + $0x14] sm:$0x1] %v434_v39  ;;  %v472_v58 = vld [vmem:[#allocation2 + $0xb0] sm:$0x1]  ;;  %v464_v59 = vsel %vm7276_vm4, 0, %v463_v53  ;;  %v467_v60 = vsel %vm7276_vm4, 0, %v466_v54 }
  0x6e   : > { %438 = vst [vmem:[#allocation2 + $0x20] sm:$0x1] %v437_v40  ;;  %v475_v61 = vld [vmem:[#allocation2 + $0xbc] sm:$0x1]  ;;  %v478_v62 = vld [vmem:[#allocation2 + $0xc8] sm:$0x1] }
  0x6f   : > { %441 = vst [vmem:[#allocation2 + $0x2c] sm:$0x1] %v440_v43  ;;  %v470_v63 = vsel %vm7276_vm4, 0, %v469_v57  ;;  %v473_v0 = vsel %vm7276_vm4, 0, %v472_v58  ;;  %v421_v3 = vld [vmem:[#allocation2 + $0xcc] sm:$0x1] }
  0x70   : > { %444 = vst [vmem:[#allocation2 + $0x38] sm:$0x1] %v443_v44  ;;  %v370_v4 = vld [vmem:[#allocation2] sm:$0x1]  ;;  %v476_v5 = vsel %vm7276_vm4, 0, %v475_v61  ;;  %v479_v6 = vsel %vm7276_vm4, 0, %v478_v62 }
  0x71   : > { %447 = vst [vmem:[#allocation2 + $0x44] sm:$0x1] %v446_v47  ;;  %v484_v7 = vld [vmem:[%s7209_s7] sm:$0xff]  ;;  %v485_v8 = vld [vmem:[%s7209_s7 + $0x8] sm:$0xff]  ;;  %v486_v9 = vld [vmem:[%s7209_s7 + $0x10] sm:$0xff]  ;;  %v422_v16 = vsel %vm7238_vm2, 0, %v421_v3 }
  0x72   : > { %450 = vst [vmem:[#allocation2 + $0x50] sm:$0x1] %v449_v48  ;;  %v430_v10 = vld [vmem:[#allocation2 + $0x8] sm:$0x1]  ;;  %v481_v11 = vld [vmem:[#allocation2 + $0xd4] sm:$0x1] }
  0x73   : > { %453 = vst [vmem:[#allocation2 + $0x5c] sm:$0x1] %v452_v51  ;;  %v487_v12 = vld [vmem:[%s7209_s7 + $0x18] sm:$0xff]  ;;  %v488_v13 = vld [vmem:[%s7209_s7 + $0x20] sm:$0xff]  ;;  %v489_v14 = vld [vmem:[%s7209_s7 + $0x28] sm:$0xff]  ;;  %v371_v17 = vsel %vm7238_vm2, 0, %v370_v4 }
  0x74   : > { %456 = vst [vmem:[#allocation2 + $0x68] sm:$0x1] %v455_v52  ;;  %v490_v15 = vld [vmem:[%s7209_s7 + $0x30] sm:$0xff]  ;;  %v491_v18 = vld [vmem:[%s7209_s7 + $0x38] sm:$0xff]  ;;  %v7328_v19 = vld [vmem:[#allocation6] ss:$0 sm:$0xff] }
  0x75   : > { %459 = vst [vmem:[#allocation2 + $0x74] sm:$0x1] %v458_v55  ;;  %v431_v20 = vsel %vm7276_vm4, 0, %v430_v10  ;;  %v482_v21 = vsel %vm7276_vm4, 0, %v481_v11  ;;  %v7337_v22 = vld [vmem:[%s8696_s19] ss:$0 sm:$0xff]  ;;  %v520_v23 = vmul.f32 %v7328_v19, %v484_v7  ;;  %v521_v24 = vmul.f32 %v7328_v19, %v485_v8 }
  0x76   : > { %462 = vst [vmem:[#allocation2 + $0x80] sm:$0x1] %v461_v56  ;;  %vm975_vm5 = vcmask 1043456   ;;  %vm652_vm6 = vsmask.f32 4368  ;;  %v522_v25 = vmul.f32 %v7328_v19, %v486_v9  ;;  %v523_v26 = vmul.f32 %v7328_v19, %v487_v12 }
  0x77   : > { %465 = vst [vmem:[#allocation2 + $0x8c] sm:$0x1] %v464_v59  ;;  %v524_v27 = vmul.f32 %v7328_v19, %v488_v13  ;;  %v525_v28 = vmul.f32 %v7328_v19, %v489_v14  ;;  %v526_v29 = vmul.f32 %v7328_v19, %v490_v15  ;;  %v556_v30 = vadd.f32 %v7337_v22, %v520_v23  ;;  %vm7363_vm7 = vmand %vm975_vm5, %vm428_vm3  ;;  %v984_v15 = vld [vmem:[#allocation2 + $0x18] sm:$0xf] }
  0x78   : > { %468 = vst [vmem:[#allocation2 + $0x98] sm:$0x1] %v467_v60  ;;  %v557_v31 = vadd.f32 %v7337_v22, %v521_v24  ;;  %v558_v32 = vadd.f32 %v7337_v22, %v522_v25  ;;  %v527_v33 = vmul.f32 %v7328_v19, %v491_v18  ;;  %vm7369_vm8 = vmor %vm368_vm1, %vm652_vm6 }
  0x79   : > { %471 = vst [vmem:[#allocation2 + $0xa4] sm:$0x1] %v470_v63  ;;  %v560_v34 = vadd.f32 %v7337_v22, %v524_v27  ;;  %v561_v35 = vadd.f32 %v7337_v22, %v525_v28  ;;  %v562_v36 = vadd.f32 %v7337_v22, %v526_v29  ;;  %v588_v37 = vmax.f32 %v556_v30, 0.0  ;;  %v977_v63 = vld [vmem:[#allocation2 + $0xc] sm:$0xf]  ;;  %v492_v28 = vld [vmem:[%s7209_s7 + $0x40] sm:$0xff] }
  0x7a   : > { %474 = vst [vmem:[#allocation2 + $0xb0] sm:$0x1] %v473_v0  ;;  %v589_v38 = vmax.f32 %v557_v31, 0.0  ;;  %v590_v39 = vmax.f32 %v558_v32, 0.0  ;;  %v7356_v40 = vadd.f32 %v7337_v22, %v527_v33  ;;  %v991_v27 = vld [vmem:[#allocation2 + $0x24] sm:$0xf] }
  0x7b   : > { %477 = vst [vmem:[#allocation2 + $0xbc] sm:$0x1] %v476_v5  ;;  %v592_v42 = vmax.f32 %v560_v34, 0.0  ;;  %v593_v43 = vmax.f32 %v561_v35, 0.0  ;;  %v594_v44 = vmax.f32 %v562_v36, 0.0  ;;  %v620_v45 = vpack.c.bf16 %v588_v37, %v588_v37  ;;  %v493_v29 = vld [vmem:[%s7209_s7 + $0x48] sm:$0xff] }
  0x7c   : > { %480 = vst [vmem:[#allocation2 + $0xc8] sm:$0x1] %v479_v6  ;;  %v621_v46 = vpack.c.bf16 %v589_v38, %v589_v38  ;;  %v622_v47 = vpack.c.bf16 %v590_v39, %v590_v39  ;;  %v595_v48 = vmax.f32 %v7356_v40, 0.0  ;;  %v981_v6 = vld [vmem:[#allocation2 + $0x14] sm:$0x1]  ;;  %v494_v34 = vld [vmem:[%s7209_s7 + $0x50] sm:$0xff] }
  0x7d   : > { %423 = vst [vmem:[#allocation2 + $0xcc] sm:$0x1] %v422_v16  ;;  %v624_v50 = vpack.c.bf16 %v592_v42, %v592_v42  ;;  %v625_v51 = vpack.c.bf16 %v593_v43, %v593_v43  ;;  %v7359_v52 = vpack.c.bf16 %v594_v44, %v594_v44  ;;  %v655_v53 = vshrl.u32 %v620_v45, 16  ;;  %v988_v16 = vld [vmem:[#allocation2 + $0x20] sm:$0x1] }
  0x7e   : > { %425 = vst [vmem:[#allocation2 + $0xcc] sm:$0xf] %v6960_v1  ;;  %v559_v1 = vadd.f32 %v7337_v22, %v523_v26  ;;  %v658_v54 = vshll.u32 %v620_v45, 16  ;;  %v663_v55 = vshrl.u32 %v621_v46, 16  ;;  %v666_v56 = vshll.u32 %v621_v46, 16 }
  0x7f   : > { %372 = vst [vmem:[#allocation2] sm:$0x1] %v371_v17  ;;  %v672_v57 = vshrl.u32 %v622_v47, 16  ;;  %v675_v58 = vshll.u32 %v622_v47, 16  ;;  %v657_v61 = vrot.slane %v655_v53, 7  ;;  %v689_v3 = vshrl.u32 %v624_v50, 16 }
  0x80   : > { %432 = vst [vmem:[#allocation2 + $0x8] sm:$0x1] %v431_v20  ;;  %v591_v41 = vmax.f32 %v559_v1, 0.0  ;;  %v665_v0 = vrot.slane %v663_v55, 7  ;;  %v692_v4 = vshll.u32 %v624_v50, 16  ;;  %v697_v9 = vshrl.u32 %v625_v51, 16 }
  0x81   : > { %483 = vst [vmem:[#allocation2 + $0xd4] sm:$0x1] %v482_v21  ;;  %v674_v7 = vrot.slane %v672_v57, 7  ;;  %v700_v10 = vshll.u32 %v625_v51, 16  ;;  %v660_v11 = vor.u32 %v658_v54, %v657_v61  ;;  %v661_v12 = vrot.slane %v657_v61, 4  ;;  %v495_v47 = vld [vmem:[%s7209_s7 + $0x58] sm:$0xff] }
  0x82   : > { %v623_v49 = vpack.c.bf16 %v591_v41, %v591_v41  ;;  %v668_v13 = vor.u32 %v666_v56, %v665_v0  ;;  %v670_v14 = vrot.slane %v665_v0, 4  ;;  %v691_v26 = vrot.slane %v689_v3, 7  ;;  %v995_v1 = vld [vmem:[#allocation2 + $0x2c] sm:$0x1]  ;;  %v497_v50 = vld [vmem:[%s7209_s7 + $0x68] sm:$0xff] }
  0x83   : > { %v677_v17 = vor.u32 %v675_v58, %v674_v7  ;;  %v678_v18 = vrot.slane %v674_v7, 4  ;;  %v978_v23 = vsel %vm7363_vm7, %v660_v11, %v977_v63  ;;  %v699_v33 = vrot.slane %v697_v9, 7  ;;  %v1002_v3 = vld [vmem:[#allocation2 + $0x38] sm:$0x1] }
  0x84   : > { %v680_v59 = vshrl.u32 %v623_v49, 16  ;;  %v683_v60 = vshll.u32 %v623_v49, 16  ;;  %v669_v24 = vsel %vm7369_vm8, %v661_v12, %v668_v13  ;;  %v982_v25 = vsel %vm7238_vm2, %v670_v14, %v981_v6  ;;  %979 = vst [vmem:[#allocation2 + $0xc] sm:$0xf] %v978_v23  ;;  %v496_v49 = vld [vmem:[%s7209_s7 + $0x60] sm:$0xff] }
  0x85   : > { %v985_v30 = vsel %vm7363_vm7, %v677_v17, %v984_v15  ;;  %980 = vst [vmem:[#allocation2 + $0x10] sm:$0xf] %v669_v24  ;;  %v694_v35 = vor.u32 %v692_v4, %v691_v26  ;;  %v695_v36 = vrot.slane %v691_v26, 4  ;;  %v706_v37 = vshrl.u32 %v7359_v52, 16 }
  0x86   : > { %v682_v8 = vrot.slane %v680_v59, 7  ;;  %v709_v38 = vshll.u32 %v7359_v52, 16  ;;  %983 = vst [vmem:[#allocation2 + $0x14] sm:$0x1] %v982_v25  ;;  %v702_v39 = vor.u32 %v700_v10, %v699_v33  ;;  %v704_v40 = vrot.slane %v699_v33, 4 }
  0x87   : > { %v627_v41 = vpack.c.bf16 %v595_v48, %v595_v48  ;;  %v528_v42 = vmul.f32 %v7328_v19, %v492_v28  ;;  %986 = vst [vmem:[#allocation2 + $0x18] sm:$0xf] %v985_v30  ;;  %v992_v43 = vsel %vm7363_vm7, %v694_v35, %v991_v27  ;;  %v708_v44 = vrot.slane %v706_v37, 7  ;;  %v998_v52 = vld [vmem:[#allocation2 + $0x30] sm:$0xf] }
  0x88   : > { %v685_v20 = vor.u32 %v683_v60, %v682_v8  ;;  %v687_v21 = vrot.slane %v682_v8, 4  ;;  %v529_v45 = vmul.f32 %v7328_v19, %v493_v29  ;;  %v530_v46 = vmul.f32 %v7328_v19, %v494_v34  ;;  %993 = vst [vmem:[#allocation2 + $0x24] sm:$0xf] %v992_v43  ;;  %v1009_v35 = vld [vmem:[#allocation2 + $0x44] sm:$0x1] }
  0x89   : > { %v703_v51 = vsel %vm7369_vm8, %v695_v36, %v702_v39  ;;  %v996_v48 = vsel %vm7238_vm2, %v704_v40, %v995_v1  ;;  %v714_v53 = vshrl.u32 %v627_v41, 16  ;;  %v717_v54 = vshll.u32 %v627_v41, 16 }
  0x8a   : > { %v686_v31 = vsel %vm7369_vm8, %v678_v18, %v685_v20  ;;  %v989_v32 = vsel %vm7238_vm2, %v687_v21, %v988_v16  ;;  %v711_v55 = vor.u32 %v709_v38, %v708_v44  ;;  %v712_v56 = vrot.slane %v708_v44, 4  ;;  %994 = vst [vmem:[#allocation2 + $0x28] sm:$0xf] %v703_v51  ;;  %v498_v21 = vld [vmem:[%s7209_s7 + $0x70] sm:$0xff]  ;;  %v500_v51 = vld [vmem:[%s7209_s7 + $0x80] sm:$0xff] }
  0x8b   : > { %987 = vst [vmem:[#allocation2 + $0x1c] sm:$0xf] %v686_v31  ;;  %v564_v57 = vadd.f32 %v7337_v22, %v528_v42  ;;  %v565_v58 = vadd.f32 %v7337_v22, %v529_v45  ;;  %v716_v59 = vrot.slane %v714_v53, 7  ;;  %v566_v60 = vadd.f32 %v7337_v22, %v530_v46  ;;  %v1012_v44 = vld [vmem:[#allocation2 + $0x48] sm:$0xf] }
  0x8c   : > { %990 = vst [vmem:[#allocation2 + $0x20] sm:$0x1] %v989_v32  ;;  %v531_v61 = vmul.f32 %v7328_v19, %v495_v47  ;;  %v532_v63 = vmul.f32 %v7328_v19, %v496_v49  ;;  %v999_v0 = vsel %vm7363_vm7, %v711_v55, %v998_v52  ;;  %v533_v7 = vmul.f32 %v7328_v19, %v497_v50  ;;  %v1005_v32 = vld [vmem:[#allocation2 + $0x3c] sm:$0xf]  ;;  %v499_v50 = vld [vmem:[%s7209_s7 + $0x78] sm:$0xff] }
  0x8d   : > { %v596_v4 = vmax.f32 %v564_v57, 0.0  ;;  %v597_v6 = vmax.f32 %v565_v58, 0.0  ;;  %997 = vst [vmem:[#allocation2 + $0x2c] sm:$0x1] %v996_v48  ;;  %v719_v8 = vor.u32 %v717_v54, %v716_v59  ;;  %v721_v9 = vrot.slane %v716_v59, 4 }
  0x8e   : > { %v598_v10 = vmax.f32 %v566_v60, 0.0  ;;  %v567_v11 = vadd.f32 %v7337_v22, %v531_v61  ;;  %1000 = vst [vmem:[#allocation2 + $0x30] sm:$0xf] %v999_v0  ;;  %v568_v14 = vadd.f32 %v7337_v22, %v532_v63  ;;  %v569_v15 = vadd.f32 %v7337_v22, %v533_v7  ;;  %v1016_v54 = vld [vmem:[#allocation2 + $0x50] sm:$0x1] }
  0x8f   : > { %v628_v12 = vpack.c.bf16 %v596_v4, %v596_v4  ;;  %v629_v13 = vpack.c.bf16 %v597_v6, %v597_v6  ;;  %v720_v16 = vsel %vm7369_vm8, %v712_v56, %v719_v8  ;;  %v1003_v17 = vsel %vm7238_vm2, %v721_v9, %v1002_v3  ;;  %v1019_v60 = vld [vmem:[#allocation2 + $0x54] sm:$0xf]  ;;  %v501_v4 = vld [vmem:[%s7209_s7 + $0x88] sm:$0xff]  ;;  %v502_v6 = vld [vmem:[%s7209_s7 + $0x90] sm:$0xff] }
  0x90   : > { %v630_v18 = vpack.c.bf16 %v598_v10, %v598_v10  ;;  %v599_v20 = vmax.f32 %v567_v11, 0.0  ;;  %1001 = vst [vmem:[#allocation2 + $0x34] sm:$0xf] %v720_v16  ;;  %v600_v30 = vmax.f32 %v568_v14, 0.0  ;;  %v601_v1 = vmax.f32 %v569_v15, 0.0  ;;  %v503_v11 = vld [vmem:[%s7209_s7 + $0x98] sm:$0xff] }
  0x91   : > { %v723_v23 = vshrl.u32 %v628_v12, 16  ;;  %v726_v24 = vshll.u32 %v628_v12, 16  ;;  %v731_v25 = vshrl.u32 %v629_v13, 16  ;;  %v734_v26 = vshll.u32 %v629_v13, 16  ;;  %1004 = vst [vmem:[#allocation2 + $0x38] sm:$0x1] %v1003_v17 }
  0x92   : > { %v740_v27 = vshrl.u32 %v630_v18, 16  ;;  %v743_v28 = vshll.u32 %v630_v18, 16  ;;  %v631_v29 = vpack.c.bf16 %v599_v20, %v599_v20  ;;  %v534_v34 = vmul.f32 %v7328_v19, %v498_v21  ;;  %v504_v16 = vld [vmem:[%s7209_s7 + $0xa0] sm:$0xff] }
  0x93   : > { %v725_v31 = vrot.slane %v723_v23, 7  ;;  %v733_v33 = vrot.slane %v731_v25, 7  ;;  %v632_v39 = vpack.c.bf16 %v600_v30, %v600_v30  ;;  %v633_v61 = vpack.c.bf16 %v601_v1, %v601_v1 }
  0x94   : > { %v742_v36 = vrot.slane %v740_v27, 7  ;;  %v748_v37 = vshrl.u32 %v631_v29, 16  ;;  %v751_v38 = vshll.u32 %v631_v29, 16  ;;  %v570_v63 = vadd.f32 %v7337_v22, %v534_v34  ;;  %v1023_v27 = vld [vmem:[#allocation2 + $0x5c] sm:$0x1] }
  0x95   : > { %v728_v40 = vor.u32 %v726_v24, %v725_v31  ;;  %v729_v41 = vrot.slane %v725_v31, 4  ;;  %v736_v42 = vor.u32 %v734_v26, %v733_v33  ;;  %v738_v43 = vrot.slane %v733_v33, 4 }
  0x96   : > { %v745_v45 = vor.u32 %v743_v28, %v742_v36  ;;  %v746_v46 = vrot.slane %v742_v36, 4  ;;  %v750_v47 = vrot.slane %v748_v37, 7  ;;  %v757_v49 = vshrl.u32 %v632_v39, 16 }
  0x97   : > { %v1006_v48 = vsel %vm7363_vm7, %v728_v40, %v1005_v32  ;;  %v737_v52 = vsel %vm7369_vm8, %v729_v41, %v736_v42  ;;  %v1010_v53 = vsel %vm7238_vm2, %v738_v43, %v1009_v35  ;;  %v760_v55 = vshll.u32 %v632_v39, 16  ;;  %v1026_v42 = vld [vmem:[#allocation2 + $0x60] sm:$0xf] }
  0x98   : > { %1007 = vst [vmem:[#allocation2 + $0x3c] sm:$0xf] %v1006_v48  ;;  %v1013_v56 = vsel %vm7363_vm7, %v745_v45, %v1012_v44  ;;  %v753_v57 = vor.u32 %v751_v38, %v750_v47  ;;  %v755_v58 = vrot.slane %v750_v47, 4  ;;  %v759_v59 = vrot.slane %v757_v49, 7 }
  0x99   : > { %1008 = vst [vmem:[#allocation2 + $0x40] sm:$0xf] %v737_v52  ;;  %v535_v0 = vmul.f32 %v7328_v19, %v499_v50  ;;  %v536_v3 = vmul.f32 %v7328_v19, %v500_v51  ;;  %v765_v12 = vshrl.u32 %v633_v61, 16  ;;  %v768_v13 = vshll.u32 %v633_v61, 16 }
  0x9a   : > { %1011 = vst [vmem:[#allocation2 + $0x44] sm:$0x1] %v1010_v53  ;;  %v754_v7 = vsel %vm7369_vm8, %v746_v46, %v753_v57  ;;  %v1017_v8 = vsel %vm7238_vm2, %v755_v58, %v1016_v54  ;;  %v762_v9 = vor.u32 %v760_v55, %v759_v59  ;;  %v763_v10 = vrot.slane %v759_v59, 4  ;;  %v1030_v53 = vld [vmem:[#allocation2 + $0x68] sm:$0x1] }
  0x9b   : > { %1014 = vst [vmem:[#allocation2 + $0x48] sm:$0xf] %v1013_v56  ;;  %v602_v14 = vmax.f32 %v570_v63, 0.0  ;;  %v571_v15 = vadd.f32 %v7337_v22, %v535_v0  ;;  %v572_v18 = vadd.f32 %v7337_v22, %v536_v3  ;;  %v537_v20 = vmul.f32 %v7328_v19, %v501_v4  ;;  %v1033_v58 = vld [vmem:[#allocation2 + $0x6c] sm:$0xf] }
  0x9c   : > { %1015 = vst [vmem:[#allocation2 + $0x4c] sm:$0xf] %v754_v7  ;;  %v1020_v17 = vsel %vm7363_vm7, %v762_v9, %v1019_v60  ;;  %v538_v21 = vmul.f32 %v7328_v19, %v502_v6  ;;  %v767_v23 = vrot.slane %v765_v12, 7  ;;  %v539_v26 = vmul.f32 %v7328_v19, %v503_v11 }
  0x9d   : > { %1018 = vst [vmem:[#allocation2 + $0x50] sm:$0x1] %v1017_v8  ;;  %v634_v24 = vpack.c.bf16 %v602_v14, %v602_v14  ;;  %v603_v25 = vmax.f32 %v571_v15, 0.0  ;;  %v604_v28 = vmax.f32 %v572_v18, 0.0  ;;  %v573_v29 = vadd.f32 %v7337_v22, %v537_v20  ;;  %v1037_v14 = vld [vmem:[#allocation2 + $0x74] sm:$0x1] }
  0x9e   : > { %1021 = vst [vmem:[#allocation2 + $0x54] sm:$0xf] %v1020_v17  ;;  %v574_v30 = vadd.f32 %v7337_v22, %v538_v21  ;;  %v540_v31 = vmul.f32 %v7328_v19, %v504_v16  ;;  %v770_v32 = vor.u32 %v768_v13, %v767_v23  ;;  %v772_v33 = vrot.slane %v767_v23, 4  ;;  %v1040_v15 = vld [vmem:[#allocation2 + $0x78] sm:$0xf]  ;;  %v506_v17 = vld [vmem:[%s7209_s7 + $0xb0] sm:$0xff] }
  0x9f   : > { %v774_v1 = vshrl.u32 %v634_v24, 16  ;;  %v777_v34 = vshll.u32 %v634_v24, 16  ;;  %v635_v35 = vpack.c.bf16 %v603_v25, %v603_v25  ;;  %v636_v36 = vpack.c.bf16 %v604_v28, %v604_v28  ;;  %v507_v24 = vld [vmem:[%s7209_s7 + $0xb8] sm:$0xff] }
  0xa0   : > { %v605_v37 = vmax.f32 %v573_v29, 0.0  ;;  %v606_v38 = vmax.f32 %v574_v30, 0.0  ;;  %v771_v39 = vsel %vm7369_vm8, %v763_v10, %v770_v32  ;;  %v1024_v40 = vsel %vm7238_vm2, %v772_v33, %v1023_v27  ;;  %v505_v10 = vld [vmem:[%s7209_s7 + $0xa8] sm:$0xff]  ;;  %v508_v29 = vld [vmem:[%s7209_s7 + $0xc0] sm:$0xff] }
  0xa1   : > { %v776_v41 = vrot.slane %v774_v1, 7  ;;  %v575_v43 = vadd.f32 %v7337_v22, %v539_v26  ;;  %1022 = vst [vmem:[#allocation2 + $0x58] sm:$0xf] %v771_v39  ;;  %v782_v44 = vshrl.u32 %v635_v35, 16  ;;  %v785_v45 = vshll.u32 %v635_v35, 16  ;;  %v509_v30 = vld [vmem:[%s7209_s7 + $0xc8] sm:$0xff] }
  0xa2   : > { %v791_v46 = vshrl.u32 %v636_v36, 16  ;;  %v794_v47 = vshll.u32 %v636_v36, 16  ;;  %1025 = vst [vmem:[#allocation2 + $0x5c] sm:$0x1] %v1024_v40  ;;  %v637_v51 = vpack.c.bf16 %v605_v37, %v605_v37  ;;  %v638_v48 = vpack.c.bf16 %v606_v38, %v606_v38  ;;  %v1044_v38 = vld [vmem:[#allocation2 + $0x80] sm:$0x1] }
  0xa3   : > { %v779_v49 = vor.u32 %v777_v34, %v776_v41  ;;  %v780_v50 = vrot.slane %v776_v41, 4  ;;  %v784_v52 = vrot.slane %v782_v44, 7  ;;  %v607_v55 = vmax.f32 %v575_v43, 0.0 }
  0xa4   : > { %v793_v54 = vrot.slane %v791_v46, 7  ;;  %v576_v56 = vadd.f32 %v7337_v22, %v540_v31  ;;  %v799_v59 = vshrl.u32 %v637_v51, 16  ;;  %v802_v60 = vshll.u32 %v637_v51, 16 }
  0xa5   : > { %v1027_v57 = vsel %vm7363_vm7, %v779_v49, %v1026_v42  ;;  %v808_v61 = vshrl.u32 %v638_v48, 16  ;;  %v787_v63 = vor.u32 %v785_v45, %v784_v52  ;;  %v789_v0 = vrot.slane %v784_v52, 4 }
  0xa6   : > { %1028 = vst [vmem:[#allocation2 + $0x60] sm:$0xf] %v1027_v57  ;;  %v796_v3 = vor.u32 %v794_v47, %v793_v54  ;;  %v797_v4 = vrot.slane %v793_v54, 4  ;;  %v801_v6 = vrot.slane %v799_v59, 7  ;;  %v811_v8 = vshll.u32 %v638_v48, 16 }
  0xa7   : > { %v810_v7 = vrot.slane %v808_v61, 7  ;;  %v639_v9 = vpack.c.bf16 %v607_v55, %v607_v55  ;;  %v788_v11 = vsel %vm7369_vm8, %v780_v50, %v787_v63  ;;  %v1031_v12 = vsel %vm7238_vm2, %v789_v0, %v1030_v53  ;;  %v1047_v47 = vld [vmem:[#allocation2 + $0x84] sm:$0xf]  ;;  %v511_v61 = vld [vmem:[%s7209_s7 + $0xd8] sm:$0xff] }
  0xa8   : > { %v1034_v13 = vsel %vm7363_vm7, %v796_v3, %v1033_v58  ;;  %v608_v16 = vmax.f32 %v576_v56, 0.0  ;;  %1029 = vst [vmem:[#allocation2 + $0x64] sm:$0xf] %v788_v11  ;;  %v804_v18 = vor.u32 %v802_v60, %v801_v6  ;;  %v806_v20 = vrot.slane %v801_v6, 4  ;;  %v510_v56 = vld [vmem:[%s7209_s7 + $0xd0] sm:$0xff] }
  0xa9   : > { %v813_v21 = vor.u32 %v811_v8, %v810_v7  ;;  %v814_v23 = vrot.slane %v810_v7, 4  ;;  %1032 = vst [vmem:[#allocation2 + $0x68] sm:$0x1] %v1031_v12  ;;  %v816_v25 = vshrl.u32 %v639_v9, 16  ;;  %v819_v26 = vshll.u32 %v639_v9, 16 }
  0xaa   : > { %v640_v27 = vpack.c.bf16 %v608_v16, %v608_v16  ;;  %v541_v28 = vmul.f32 %v7328_v19, %v505_v10  ;;  %1035 = vst [vmem:[#allocation2 + $0x6c] sm:$0xf] %v1034_v13  ;;  %v805_v31 = vsel %vm7369_vm8, %v797_v4, %v804_v18  ;;  %v1038_v32 = vsel %vm7238_vm2, %v806_v20, %v1037_v14  ;;  %v1051_v14 = vld [vmem:[#allocation2 + $0x8c] sm:$0x1] }
  0xab   : > { %v1041_v33 = vsel %vm7363_vm7, %v813_v21, %v1040_v15  ;;  %v542_v1 = vmul.f32 %v7328_v19, %v506_v17  ;;  %1036 = vst [vmem:[#allocation2 + $0x70] sm:$0xf] %v805_v31  ;;  %v818_v34 = vrot.slane %v816_v25, 7  ;;  %v543_v40 = vmul.f32 %v7328_v19, %v507_v24 }
  0xac   : > { %v825_v35 = vshrl.u32 %v640_v27, 16  ;;  %v828_v36 = vshll.u32 %v640_v27, 16  ;;  %v577_v37 = vadd.f32 %v7337_v22, %v541_v28  ;;  %1039 = vst [vmem:[#allocation2 + $0x74] sm:$0x1] %v1038_v32  ;;  %v544_v41 = vmul.f32 %v7328_v19, %v508_v29 }
  0xad   : > { %v578_v39 = vadd.f32 %v7337_v22, %v542_v1  ;;  %v545_v42 = vmul.f32 %v7328_v19, %v509_v30  ;;  %1042 = vst [vmem:[#allocation2 + $0x78] sm:$0xf] %v1041_v33  ;;  %v821_v43 = vor.u32 %v819_v26, %v818_v34  ;;  %v823_v44 = vrot.slane %v818_v34, 4  ;;  %v512_v30 = vld [vmem:[%s7209_s7 + $0xe0] sm:$0xff] }
  0xae   : > { %v827_v45 = vrot.slane %v825_v35, 7  ;;  %v609_v46 = vmax.f32 %v577_v37, 0.0  ;;  %v579_v50 = vadd.f32 %v7337_v22, %v543_v40  ;;  %v580_v51 = vadd.f32 %v7337_v22, %v544_v41  ;;  %v1058_v33 = vld [vmem:[#allocation2 + $0x98] sm:$0x1]  ;;  %v1061_v1 = vld [vmem:[#allocation2 + $0x9c] sm:$0xf] }
  0xaf   : > { %v610_v49 = vmax.f32 %v578_v39, 0.0  ;;  %v581_v48 = vadd.f32 %v7337_v22, %v545_v42  ;;  %v822_v52 = vsel %vm7369_vm8, %v814_v23, %v821_v43  ;;  %v1045_v53 = vsel %vm7238_vm2, %v823_v44, %v1044_v38  ;;  %v1054_v23 = vld [vmem:[#allocation2 + $0x90] sm:$0xf]  ;;  %v1065_v40 = vld [vmem:[#allocation2 + $0xa4] sm:$0x1] }
  0xb0   : > { %v830_v54 = vor.u32 %v828_v36, %v827_v45  ;;  %v641_v55 = vpack.c.bf16 %v609_v46, %v609_v46  ;;  %1043 = vst [vmem:[#allocation2 + $0x7c] sm:$0xf] %v822_v52  ;;  %v831_v57 = vrot.slane %v827_v45, 4  ;;  %v611_v59 = vmax.f32 %v579_v50, 0.0  ;;  %v513_v41 = vld [vmem:[%s7209_s7 + $0xe8] sm:$0xff]  ;;  %v514_v46 = vld [vmem:[%s7209_s7 + $0xf0] sm:$0xff] }
  0xb1   : > { %v642_v58 = vpack.c.bf16 %v610_v49, %v610_v49  ;;  %v612_v60 = vmax.f32 %v580_v51, 0.0  ;;  %1046 = vst [vmem:[#allocation2 + $0x80] sm:$0x1] %v1045_v53  ;;  %v613_v4 = vmax.f32 %v581_v48, 0.0  ;;  %v546_v12 = vmul.f32 %v7328_v19, %v510_v56 }
  0xb2   : > { %v1048_v63 = vsel %vm7363_vm7, %v830_v54, %v1047_v47  ;;  %v833_v0 = vshrl.u32 %v641_v55, 16  ;;  %v836_v3 = vshll.u32 %v641_v55, 16  ;;  %v643_v8 = vpack.c.bf16 %v611_v59, %v611_v59  ;;  %v515_v47 = vld [vmem:[%s7209_s7 + $0xf8] sm:$0xff] }
  0xb3   : > { %1049 = vst [vmem:[#allocation2 + $0x84] sm:$0xf] %v1048_v63  ;;  %v842_v6 = vshrl.u32 %v642_v58, 16  ;;  %v845_v7 = vshll.u32 %v642_v58, 16  ;;  %v644_v9 = vpack.c.bf16 %v612_v60, %v612_v60  ;;  %v645_v11 = vpack.c.bf16 %v613_v4, %v613_v4 }
  0xb4   : > { %v835_v10 = vrot.slane %v833_v0, 7  ;;  %v547_v13 = vmul.f32 %v7328_v19, %v511_v61  ;;  %v850_v16 = vshrl.u32 %v643_v8, 16  ;;  %v853_v17 = vshll.u32 %v643_v8, 16 }
  0xb5   : > { %v844_v15 = vrot.slane %v842_v6, 7  ;;  %v859_v18 = vshrl.u32 %v644_v9, 16  ;;  %v862_v24 = vshll.u32 %v644_v9, 16  ;;  %v867_v25 = vshrl.u32 %v645_v11, 16 }
  0xb6   : > { %v838_v20 = vor.u32 %v836_v3, %v835_v10  ;;  %v840_v21 = vrot.slane %v835_v10, 4  ;;  %v852_v28 = vrot.slane %v850_v16, 7  ;;  %v870_v35 = vshll.u32 %v645_v11, 16 }
  0xb7   : > { %v847_v26 = vor.u32 %v845_v7, %v844_v15  ;;  %v848_v27 = vrot.slane %v844_v15, 4  ;;  %v861_v29 = vrot.slane %v859_v18, 7  ;;  %v869_v34 = vrot.slane %v867_v25, 7 }
  0xb8   : > { %v839_v31 = vsel %vm7369_vm8, %v831_v57, %v838_v20  ;;  %v1052_v32 = vsel %vm7238_vm2, %v840_v21, %v1051_v14  ;;  %v855_v37 = vor.u32 %v853_v17, %v852_v28  ;;  %v857_v38 = vrot.slane %v852_v28, 4  ;;  %v1068_v14 = vld [vmem:[#allocation2 + $0xa8] sm:$0xf] }
  0xb9   : > { %1050 = vst [vmem:[#allocation2 + $0x88] sm:$0xf] %v839_v31  ;;  %v1055_v36 = vsel %vm7363_vm7, %v847_v26, %v1054_v23  ;;  %v864_v39 = vor.u32 %v862_v24, %v861_v29  ;;  %v865_v42 = vrot.slane %v861_v29, 4  ;;  %v872_v43 = vor.u32 %v870_v35, %v869_v34  ;;  %v1072_v23 = vld [vmem:[#allocation2 + $0xb0] sm:$0x1] }
  0xba   : > { %1053 = vst [vmem:[#allocation2 + $0x8c] sm:$0x1] %v1052_v32  ;;  %v874_v44 = vrot.slane %v869_v34, 4  ;;  %v582_v45 = vadd.f32 %v7337_v22, %v546_v12  ;;  %v856_v49 = vsel %vm7369_vm8, %v848_v27, %v855_v37  ;;  %v1059_v50 = vsel %vm7238_vm2, %v857_v38, %v1058_v33  ;;  %v1075_v31 = vld [vmem:[#allocation2 + $0xb4] sm:$0xf] }
  0xbb   : > { %1056 = vst [vmem:[#allocation2 + $0x90] sm:$0xf] %v1055_v36  ;;  %v1062_v51 = vsel %vm7363_vm7, %v864_v39, %v1061_v1  ;;  %v583_v48 = vadd.f32 %v7337_v22, %v547_v13  ;;  %v873_v52 = vsel %vm7369_vm8, %v865_v42, %v872_v43  ;;  %v548_v55 = vmul.f32 %v7328_v19, %v512_v30  ;;  %v1079_v36 = vld [vmem:[#allocation2 + $0xbc] sm:$0x1] }
  0xbc   : > { %1057 = vst [vmem:[#allocation2 + $0x94] sm:$0xf] %v856_v49  ;;  %v1066_v53 = vsel %vm7238_vm2, %v874_v44, %v1065_v40  ;;  %v614_v54 = vmax.f32 %v582_v45, 0.0  ;;  %v549_v57 = vmul.f32 %v7328_v19, %v513_v41  ;;  %v550_v58 = vmul.f32 %v7328_v19, %v514_v46  ;;  %v1082_v41 = vld [vmem:[#allocation2 + $0xc0] sm:$0xf] }
  0xbd   : > { %1060 = vst [vmem:[#allocation2 + $0x98] sm:$0x1] %v1059_v50  ;;  %v615_v56 = vmax.f32 %v583_v48, 0.0  ;;  %v551_v59 = vmul.f32 %v7328_v19, %v515_v47  ;;  %v584_v61 = vadd.f32 %v7337_v22, %v548_v55 }
  0xbe   : > { %1063 = vst [vmem:[#allocation2 + $0x9c] sm:$0xf] %v1062_v51  ;;  %v646_v60 = vpack.c.bf16 %v614_v54, %v614_v54  ;;  %v585_v0 = vadd.f32 %v7337_v22, %v549_v57  ;;  %v586_v3 = vadd.f32 %v7337_v22, %v550_v58 }
  0xbf   : > { %1064 = vst [vmem:[#allocation2 + $0xa0] sm:$0xf] %v873_v52  ;;  %v647_v63 = vpack.c.bf16 %v615_v56, %v615_v56  ;;  %v587_v4 = vadd.f32 %v7337_v22, %v551_v59  ;;  %v616_v8 = vmax.f32 %v584_v61, 0.0 }
  0xc0   : > { %1067 = vst [vmem:[#allocation2 + $0xa4] sm:$0x1] %v1066_v53  ;;  %v876_v6 = vshrl.u32 %v646_v60, 16  ;;  %v879_v7 = vshll.u32 %v646_v60, 16  ;;  %v617_v11 = vmax.f32 %v585_v0, 0.0  ;;  %v618_v19 = vmax.f32 %v586_v3, 0.0 }
  0xc1   : > { %v884_v9 = vshrl.u32 %v647_v63, 16  ;;  %v887_v10 = vshll.u32 %v647_v63, 16  ;;  %v648_v13 = vpack.c.bf16 %v616_v8, %v616_v8  ;;  %v619_v18 = vmax.f32 %v587_v4, 0.0  ;;  %v1086_v53 = vld [vmem:[#allocation2 + $0xc8] sm:$0x1] }
  0xc2   : > { %v878_v12 = vrot.slane %v876_v6, 7  ;;  %v649_v16 = vpack.c.bf16 %v617_v11, %v617_v11  ;;  %v650_v17 = vpack.c.bf16 %v618_v19, %v618_v19 }
  0xc3   : > { %v886_v15 = vrot.slane %v884_v9, 7  ;;  %v893_v24 = vshrl.u32 %v648_v13, 16  ;;  %v896_v22 = vshll.u32 %v648_v13, 16  ;;  %v651_v37 = vpack.c.bf16 %v619_v18, %v619_v18 }
  0xc4   : > { %v881_v20 = vor.u32 %v879_v7, %v878_v12  ;;  %v882_v21 = vrot.slane %v878_v12, 4  ;;  %v901_v27 = vshrl.u32 %v649_v16, 16  ;;  %v904_v28 = vshll.u32 %v649_v16, 16 }
  0xc5   : > { %v889_v25 = vor.u32 %v887_v10, %v886_v15  ;;  %v891_v26 = vrot.slane %v886_v15, 4  ;;  %v895_v30 = vrot.slane %v893_v24, 7  ;;  %v910_v32 = vshrl.u32 %v650_v17, 16 }
  0xc6   : > { %v1069_v29 = vsel %vm7363_vm7, %v881_v20, %v1068_v14  ;;  %v913_v33 = vshll.u32 %v650_v17, 16  ;;  %v903_v35 = vrot.slane %v901_v27, 7  ;;  %v918_v44 = vshrl.u32 %v651_v37, 16 }
  0xc7   : > { %1070 = vst [vmem:[#allocation2 + $0xa8] sm:$0xf] %v1069_v29  ;;  %v890_v1 = vsel %vm7369_vm8, %v882_v21, %v889_v25  ;;  %v1073_v34 = vsel %vm7238_vm2, %v891_v26, %v1072_v23  ;;  %v898_v38 = vor.u32 %v896_v22, %v895_v30  ;;  %v899_v39 = vrot.slane %v895_v30, 4 }
  0xc8   : > { %1071 = vst [vmem:[#allocation2 + $0xac] sm:$0xf] %v890_v1  ;;  %v912_v40 = vrot.slane %v910_v32, 7  ;;  %v906_v42 = vor.u32 %v904_v28, %v903_v35  ;;  %v908_v43 = vrot.slane %v903_v35, 4  ;;  %v921_v45 = vshll.u32 %v651_v37, 16 }
  0xc9   : > { %1074 = vst [vmem:[#allocation2 + $0xb0] sm:$0x1] %v1073_v34  ;;  %v1076_v46 = vsel %vm7363_vm7, %v898_v38, %v1075_v31  ;;  %v920_v48 = vrot.slane %v918_v44, 7 }
  0xca   : > { %v915_v47 = vor.u32 %v913_v33, %v912_v40  ;;  %1077 = vst [vmem:[#allocation2 + $0xb4] sm:$0xf] %v1076_v46  ;;  %v907_v49 = vsel %vm7369_vm8, %v899_v39, %v906_v42  ;;  %v1080_v50 = vsel %vm7238_vm2, %v908_v43, %v1079_v36  ;;  %v916_v51 = vrot.slane %v912_v40, 4 }
  0xcb   : > { %1078 = vst [vmem:[#allocation2 + $0xb8] sm:$0xf] %v907_v49  ;;  %v923_v54 = vor.u32 %v921_v45, %v920_v48  ;;  %v925_v55 = vrot.slane %v920_v48, 4 }
  0xcc   : > { %v1083_v52 = vsel %vm7363_vm7, %v915_v47, %v1082_v41  ;;  %1081 = vst [vmem:[#allocation2 + $0xbc] sm:$0x1] %v1080_v50 }
  0xcd   : > { %1084 = vst [vmem:[#allocation2 + $0xc0] sm:$0xf] %v1083_v52  ;;  %v924_v56 = vsel %vm7369_vm8, %v916_v51, %v923_v54  ;;  %v1087_v57 = vsel %vm7238_vm2, %v925_v55, %v1086_v53 }
  0xce   : > { %1085 = vst [vmem:[#allocation2 + $0xc4] sm:$0xf] %v924_v56 }
  0xcf   : > { %1088 = vst [vmem:[#allocation2 + $0xc8] sm:$0x1] %v1087_v57 }
  0xd0 PF: > { %v6223_v58 = vld [vmem:[%s7220_s29 + $0x78] sm:$0xff]  ;;  %v6222_v62 = vld [vmem:[%s7220_s29 + $0x70] sm:$0xff]  ;;  %vm1153_vm9 = vsmask.f32 3328  ;;  %vm1154_vm10 = vsmask.f32 7440 }
  0xd1   : > { %6407 = vmatpush.bf16.msra.mxu1 %v6223_v58  ;;  %6408 = vmatpush.bf16.msra.mxu2 %v6223_v58  ;;  %v1097_v59 = vld [vmem:[#allocation2 + $0x30] sm:$0xf]  ;;  %v1098_v5 = vld [vmem:[#allocation2 + $0x34] sm:$0xf]  ;;  %v1141_v60 = vld [vmem:[#allocation2 + $0x38] sm:$0x1] }
  0xd2   : > { %6409 = vmatpush.bf16.msra.mxu3 %v6223_v58  ;;  %1668 = vmatpush.bf16.msra.mxu0 %v6223_v58  ;;  %v1253_v61 = vshrl.u32 %v1097_v59, 16  ;;  %v1256_v2 = vshll.u32 %v1097_v59, 16  ;;  %v6221_v63 = vld [vmem:[%s7220_s29 + $0x68] sm:$0xff]  ;;  %v1262_v0 = vshll.u32 %v1098_v5, 16  ;;  %v1266_v3 = vshrl.u32 %v1098_v5, 16  ;;  %vm7548_vm11 = vmor %vm1153_vm9, %vm1154_vm10  ;;  %v6220_v30 = vld [vmem:[%s7220_s29 + $0x60] sm:$0xff] }
  0xd3   : > { %v1272_v4 = vshll.u32 %v1141_v60, 16  ;;  %v1105_v6 = vld [vmem:[#allocation2 + $0x60] sm:$0xf]  ;;  %v1106_v9 = vld [vmem:[#allocation2 + $0x64] sm:$0xf]  ;;  %v6219_v49 = vld [vmem:[%s7220_s29 + $0x58] sm:$0xff] }
  0xd4   : > { %v1255_v7 = vrot.slane %v1253_v61, 4  ;;  %v1258_v8 = vrot.slane %v1256_v2, 5  ;;  %v1145_v10 = vld [vmem:[#allocation2 + $0x68] sm:$0x1]  ;;  %v1264_v11 = vrot.slane %v1262_v0, 5  ;;  %v1268_v19 = vrot.slane %v1266_v3, 4 }
  0xd5   : > { %6410 = vmatpush.bf16.msra.mxu1 %v6222_v62  ;;  %6411 = vmatpush.bf16.msra.mxu2 %v6222_v62  ;;  %v1274_v12 = vrot.slane %v1272_v4, 5  ;;  %v1349_v13 = vshrl.u32 %v1105_v6, 16  ;;  %v1113_v14 = vld [vmem:[#allocation2 + $0x90] sm:$0xf]  ;;  %v1352_v16 = vshll.u32 %v1105_v6, 16  ;;  %v1358_v17 = vshll.u32 %v1106_v9, 16 }
  0xd6   : > { %6412 = vmatpush.bf16.msra.mxu3 %v6222_v62  ;;  %1669 = vmatpush.bf16.msra.mxu0 %v6222_v62  ;;  %v1259_v15 = vor.u32 %v1258_v8, %v1255_v7  ;;  %v1362_v18 = vshrl.u32 %v1106_v9, 16  ;;  %v1269_v21 = vor.u32 %v1268_v19, %v1264_v11  ;;  %v1368_v24 = vshll.u32 %v1145_v10, 16  ;;  %v1114_v22 = vld [vmem:[#allocation2 + $0x94] sm:$0xf]  ;;  %v1149_v37 = vld [vmem:[#allocation2 + $0x98] sm:$0x1] }
  0xd7   : > { %v1351_v23 = vrot.slane %v1349_v13, 4  ;;  %v1445_v25 = vshrl.u32 %v1113_v14, 16  ;;  %v1354_v27 = vrot.slane %v1352_v16, 5  ;;  %v1360_v28 = vrot.slane %v1358_v17, 5  ;;  %v1089_v39 = vld [vmem:[#allocation2] sm:$0xf] }
  0xd8   : > { %v1260_v26 = vrot.slane %v1259_v15, 4  ;;  %v1364_v29 = vrot.slane %v1362_v18, 4  ;;  %v1270_v31 = vrot.slane %v1269_v21, 4  ;;  %v1370_v32 = vrot.slane %v1368_v24, 5  ;;  %v7562_v52 = vld [vmem:[#allocation2 + $0x4] sm:$0xf] }
  0xd9   : > { %6413 = vmatpush.bf16.msra.mxu1 %v6221_v63  ;;  %6414 = vmatpush.bf16.msra.mxu2 %v6221_v63  ;;  %v1447_v33 = vrot.slane %v1445_v25, 4  ;;  %v1448_v1 = vshll.u32 %v1113_v14, 16  ;;  %v1355_v35 = vor.u32 %v1354_v27, %v1351_v23  ;;  %v1454_v38 = vshll.u32 %v1114_v22, 16  ;;  %v7574_v60 = vld [vmem:[#allocation2 + $0x8] sm:$0x1]  ;;  %v6218_v4 = vld [vmem:[%s7220_s29 + $0x50] sm:$0xff] }
  0xda   : > { %6415 = vmatpush.bf16.msra.mxu3 %v6221_v63  ;;  %1670 = vmatpush.bf16.msra.mxu0 %v6221_v63  ;;  %v1265_v34 = vsel %vm7548_vm11, %v1260_v26, %v1264_v11  ;;  %v1365_v36 = vor.u32 %v1364_v29, %v1360_v28  ;;  %v1275_v40 = vsel %vm7548_vm11, %v1270_v31, %v1274_v12  ;;  %v1458_v43 = vshrl.u32 %v1114_v22, 16  ;;  %v1099_v3 = vld [vmem:[#allocation2 + $0x3c] sm:$0xf]  ;;  %v1100_v10 = vld [vmem:[#allocation2 + $0x40] sm:$0xf]  ;;  %s8713_s20 = sld [smem:[#allocation20_spill]] }
  0xdb   : > { %v7557_v41 = vunpack.c.l.b16 %v1265_v34  ;;  %v1450_v42 = vrot.slane %v1448_v1, 5  ;;  %v7559_v44 = vunpack.c.l.b16 %v1275_v40  ;;  %v1356_v45 = vrot.slane %v1355_v35, 4  ;;  %v1142_v16 = vld [vmem:[#allocation2 + $0x44] sm:$0x1]  ;;  %v1107_v25 = vld [vmem:[#allocation2 + $0x6c] sm:$0xf] }
  0xdc   : > { %v1366_v46 = vrot.slane %v1365_v36, 4  ;;  %v1456_v47 = vrot.slane %v1454_v38, 5  ;;  %v1460_v51 = vrot.slane %v1458_v43, 4  ;;  %v1464_v48 = vshll.u32 %v1149_v37, 16  ;;  %v6217_v26 = vld [vmem:[%s7220_s29 + $0x48] sm:$0xff]  ;;  %s8716_s7 = sld [smem:[#allocation35_spill]] }
  0xdd   : > { %6416 = vmatpush.bf16.msra.mxu1 %v6220_v30  ;;  %6417 = vmatpush.bf16.msra.mxu2 %v6220_v30  ;;  %v1451_v50 = vor.u32 %v1450_v42, %v1447_v33  ;;  %v1157_v53 = vshrl.u32 %v1089_v39, 16  ;;  %v1592_v54 = vpack.c.b16 %v7559_v44, %v7557_v41  ;;  %v1361_v55 = vsel %vm7548_vm11, %v1356_v45, %v1360_v28  ;;  %v1108_v31 = vld [vmem:[#allocation2 + $0x70] sm:$0xf]  ;;  %v1146_v40 = vld [vmem:[#allocation2 + $0x74] sm:$0x1]  ;;  %s5415_s19 = scalar_lea.sflag [#allocation5], %s7227_s4 }
  0xde   : > { %6418 = vmatpush.bf16.msra.mxu3 %v6220_v30  ;;  %1671 = vmatpush.bf16.msra.mxu0 %v6220_v30  ;;  %v1371_v56 = vsel %vm7548_vm11, %v1366_v46, %v1370_v32  ;;  %v1160_v57 = vshll.u32 %v1089_v39, 16  ;;  %v7570_v58 = vunpack.c.l.b16 %v1361_v55  ;;  %v1461_v5 = vor.u32 %v1460_v51, %v1456_v47  ;;  %v6216_v46 = vld [vmem:[%s7220_s29 + $0x40] sm:$0xff] }
  0xdf   : > { %v7572_v62 = vunpack.c.l.b16 %v1371_v56  ;;  %v1452_v59 = vrot.slane %v1451_v50, 4  ;;  %v1466_v61 = vrot.slane %v1464_v48, 5  ;;  %v1159_v2 = vrot.slane %v1157_v53, 4  ;;  %v1115_v48 = vld [vmem:[#allocation2 + $0x9c] sm:$0xf]  ;;  %v6231_v53 = vld [vmem:[%s7220_s29 + $0xb8] sm:$0xff] }
  0xe0   : > { %v1162_v63 = vrot.slane %v1160_v57, 5  ;;  %v1166_v0 = vshll.u32 %v7562_v52, 16  ;;  %v1462_v8 = vrot.slane %v1461_v5, 4  ;;  %v1170_v9 = vshrl.u32 %v7562_v52, 16  ;;  %v6255_v5 = vld [vmem:[%s7220_s29 + $0xf8] sm:$0xff]  ;;  %s6185_s17 = sshll.u32 %s8713_s20, 6 }
  0xe1   : > { %6419 = vmatpush.bf16.msra.mxu1 %v6219_v49  ;;  %6420 = vmatpush.bf16.msra.mxu2 %v6219_v49  ;;  %v1596_v6 = vpack.c.b16 %v7572_v62, %v7570_v58  ;;  %v1457_v7 = vsel %vm7548_vm11, %v1452_v59, %v1456_v47  ;;  %v1176_v13 = vshll.u32 %v7574_v60, 16  ;;  %v1277_v17 = vshrl.u32 %v1099_v3, 16  ;;  %v7634_v62 = vld [vmem:[#allocation2 + $0x14] sm:$0x1]  ;;  %s5433_s11 = sadd.s32 %s6937_s30, %s6185_s17  ;;  %s6187_s14 = sshll.u32 %s8713_s20, 1 }
  0xe2   : > { %6421 = vmatpush.bf16.msra.mxu3 %v6219_v49  ;;  %1672 = vmatpush.bf16.msra.mxu0 %v6219_v49  ;;  %v7583_v11 = vunpack.c.l.b16 %v1457_v7  ;;  %v1163_v19 = vor.u32 %v1162_v63, %v1159_v2  ;;  %v1168_v12 = vrot.slane %v1166_v0, 5  ;;  %v1467_v14 = vsel %vm7548_vm11, %v1462_v8, %v1466_v61  ;;  %s6186_s0 = sshll.u32 %s5433_s11, 2  ;;  %s8717_s6 = smov %s8716_s7 }
  0xe3   : > { %v1172_v15 = vrot.slane %v1170_v9, 4  ;;  %v1280_v18 = vshll.u32 %v1099_v3, 16  ;;  %v7588_v21 = vunpack.c.l.b16 %v1467_v14  ;;  %v1178_v24 = vrot.slane %v1176_v13, 5  ;;  %v1116_v3 = vld [vmem:[#allocation2 + $0xa0] sm:$0xf]  ;;  %s5435_s23 = scalar_lea.hbm %s8716_s7, %s6186_s0  ;;  %s8525_s16 = sadd.s32 %s6937_s30, %s6187_s14 }
  0xe4   : > { %v1164_v23 = vrot.slane %v1163_v19, 4  ;;  %v1286_v22 = vshll.u32 %v1100_v10, 16  ;;  %v1279_v28 = vrot.slane %v1277_v17, 4  ;;  %v1290_v30 = vshrl.u32 %v1100_v10, 16  ;;  %v1150_v9 = vld [vmem:[#allocation2 + $0xa4] sm:$0x1] }
  0xe5   : > { %6422 = vmatpush.bf16.msra.mxu1 %v6218_v4  ;;  %6423 = vmatpush.bf16.msra.mxu2 %v6218_v4  ;;  %v1173_v27 = vor.u32 %v1172_v15, %v1168_v12  ;;  %v1282_v29 = vrot.slane %v1280_v18, 5  ;;  %v1600_v32 = vpack.c.b16 %v7588_v21, %v7583_v11  ;;  %v1296_v34 = vshll.u32 %v1142_v16, 16  ;;  %v1091_v15 = vld [vmem:[#allocation2 + $0xc] sm:$0xf]  ;;  %v6215_v16 = vld [vmem:[%s7220_s29 + $0x38] sm:$0xff]  ;;  %s5438_s27 = sshll.u32 %s5435_s23, 4  ;;  %s5439_s27 = int_to_ptr.hbm [resolvable:$true] %s5438_s27 }
  0xe6   : > { %6424 = vmatpush.bf16.msra.mxu3 %v6218_v4  ;;  %1673 = vmatpush.bf16.msra.mxu0 %v6218_v4  ;;  %v1169_v33 = vsel %vm7548_vm11, %v1164_v23, %v1168_v12  ;;  %v1288_v1 = vrot.slane %v1286_v22, 5  ;;  %v1292_v38 = vrot.slane %v1290_v30, 4  ;;  %v1373_v42 = vshrl.u32 %v1107_v25, 16  ;;  %v6263_v17 = vld [vmem:[%s7220_s29 + $0x138] sm:$0xff]  ;;  %s6753_s17 = sshra.s32 %s5439_s27, 4  ;;  %s6759_s9 = scalar_lea.hbm %s8717_s6, 512  ;;  %s6754_s17 = int_to_ptr.hbm [resolvable:$true] %s6753_s17 }
  0xe7   : > { %v1174_v35 = vrot.slane %v1173_v27, 4  ;;  %v7595_v36 = vunpack.c.l.b16 %v1169_v33  ;;  %v1283_v37 = vor.u32 %v1282_v29, %v1279_v28  ;;  %v1298_v39 = vrot.slane %v1296_v34, 5  ;;  %v7625_v34 = vld [vmem:[#allocation2 + $0x10] sm:$0xf]  ;;  %s6755_s11 = scalar_lea.hbm %s6754_s17, 128  ;;  %p6760_p4 = scmp.lt.s32.totalorder %s6754_s17, %s8717_s6 }
  0xe8   : > { %v1376_v43 = vshll.u32 %v1107_v25, 16  ;;  %v1382_v45 = vshll.u32 %v1108_v31, 16  ;;  %v1293_v50 = vor.u32 %v1292_v38, %v1288_v1  ;;  %v1386_v51 = vshrl.u32 %v1108_v31, 16  ;;  %v6230_v25 = vld [vmem:[%s7220_s29 + $0xb0] sm:$0xff]  ;;  %p6756_p11 = scmp.ne.s32.totalorder %s6754_s17, %s6755_s11  ;;  %p6761_p9 = scmp.lt.s32.totalorder %s6759_s9, %s6755_s11 }
  0xe9   : > { %6425 = vmatpush.bf16.msra.mxu1 %v6217_v26  ;;  %6426 = vmatpush.bf16.msra.mxu2 %v6217_v26  ;;  %v1179_v47 = vsel %vm7548_vm11, %v1174_v35, %v1178_v24  ;;  %v1284_v49 = vrot.slane %v1283_v37, 4  ;;  %v1375_v56 = vrot.slane %v1373_v42, 4  ;;  %v1392_v0 = vshll.u32 %v1146_v40, 16  ;;  %v6262_v38 = vld [vmem:[%s7220_s29 + $0x130] sm:$0xff]  ;;  %v6229_v42 = vld [vmem:[%s7220_s29 + $0xa8] sm:$0xff] }
  0xea   : > { %6427 = vmatpush.bf16.msra.mxu3 %v6217_v26  ;;  %1674 = vmatpush.bf16.msra.mxu0 %v6217_v26  ;;  %v1557_v55 = vunpack.c.l.b16 %v1179_v47  ;;  %v1378_v57 = vrot.slane %v1376_v43, 5  ;;  %v1384_v59 = vrot.slane %v1382_v45, 5  ;;  %v1294_v2 = vrot.slane %v1293_v50, 4  ;;  %v6254_v26 = vld [vmem:[%s7220_s29 + $0xf0] sm:$0xff]  ;;  %p6757_p12 = pnand %p6756_p11, %p7161_p7  ;;  %p6762_p10 = por %p6761_p9, %p6760_p4 }
  0xeb   : > { %v1289_v61 = vsel %vm7548_vm11, %v1284_v49, %v1288_v1  ;;  %v1388_v63 = vrot.slane %v1386_v51, 4  ;;  %v1469_v10 = vshrl.u32 %v1115_v48, 16  ;;  %v1394_v13 = vrot.slane %v1392_v0, 5  ;;  %v1102_v51 = vld [vmem:[#allocation2 + $0x4c] sm:$0xf]  ;;  %v6261_v0 = vld [vmem:[%s7220_s29 + $0x128] sm:$0xff] }
  0xec   : > { %v1588_v4 = vpack.c.b16 %v1557_v55, %v7595_v36  ;;  %v7605_v7 = vunpack.c.l.b16 %v1289_v61  ;;  %v1379_v8 = vor.u32 %v1378_v57, %v1375_v56  ;;  %v1299_v19 = vsel %vm7548_vm11, %v1294_v2, %v1298_v39  ;;  %v6214_v36 = vld [vmem:[%s7220_s29 + $0x30] sm:$0xff]  ;;  %p6758_p1 = pneg %p6757_p12 }
  0xed   : > { %6428 = vmatpush.bf16.msra.mxu1 %v6216_v46  ;;  %6429 = vmatpush.bf16.msra.mxu2 %v6216_v46  ;;  %v1389_v12 = vor.u32 %v1388_v63, %v1384_v59  ;;  %v1472_v14 = vshll.u32 %v1115_v48, 16  ;;  %v7611_v18 = vunpack.c.l.b16 %v1299_v19  ;;  %v1471_v24 = vrot.slane %v1469_v10, 4  ;;  %v6213_v63 = vld [vmem:[%s7220_s29 + $0x28] sm:$0xff]  ;;  %v6228_v10 = vld [vmem:[%s7220_s29 + $0xa0] sm:$0xff] }
  0xee   : > { %6430 = vmatpush.bf16.msra.mxu3 %v6216_v46  ;;  %1675 = vmatpush.bf16.msra.mxu0 %v6216_v46  ;;  %v1380_v23 = vrot.slane %v1379_v8, 4  ;;  %v1478_v22 = vshll.u32 %v1116_v3, 16  ;;  %v1482_v29 = vshrl.u32 %v1116_v3, 16  ;;  %v1488_v30 = vshll.u32 %v1150_v9, 16  ;;  %v6253_v46 = vld [vmem:[%s7220_s29 + $0xe8] sm:$0xff]  ;;  %v6252_v19 = vld [vmem:[%s7220_s29 + $0xe0] sm:$0xff]  ;;  %p6763_p13 = pnand %p6762_p10, %p6758_p1 }
  0xef   : > { %v1390_v27 = vrot.slane %v1389_v12, 4  ;;  %v1474_v28 = vrot.slane %v1472_v14, 5  ;;  %v1593_v31 = vpack.c.b16 %v7611_v18, %v7605_v7  ;;  %v1181_v35 = vshrl.u32 %v1091_v15, 16 }
  0xf0   : > { %1696 = vmatmul.bf16.vlgmr.msra.gmra.mxu1 %v1592_v54  ;;  %1716 = vmatmul.bf16.vlgmr.msra.gmra.mxu2 %v1596_v6  ;;  %v1385_v33 = vsel %vm7548_vm11, %v1380_v23, %v1384_v59  ;;  %v1480_v1 = vrot.slane %v1478_v22, 5  ;;  %v1484_v58 = vrot.slane %v1482_v29, 4  ;;  %v1101_v6 = vld [vmem:[#allocation2 + $0x48] sm:$0xf]  ;;  %v1490_v11 = vrot.slane %v1488_v30, 5  ;;  %v6212_v30 = vld [vmem:[%s7220_s29 + $0x20] sm:$0xff] }
  0xf1   : > { %2281 = vmatpush.bf16.msrb.mxu2 %v6231_v53  ;;  %1736 = vmatmul.bf16.vlgmr.msra.gmra.mxu3 %v1600_v32  ;;  %v1395_v41 = vsel %vm7548_vm11, %v1390_v27, %v1394_v13  ;;  %v7632_v44 = vunpack.c.l.b16 %v1385_v33  ;;  %v1475_v54 = vor.u32 %v1474_v28, %v1471_v24  ;;  %v1183_v21 = vrot.slane %v1181_v35, 4  ;;  %v1143_v59 = vld [vmem:[#allocation2 + $0x50] sm:$0x1]  ;;  %v1110_v23 = vld [vmem:[#allocation2 + $0x7c] sm:$0xf] }
  0xf2   : > { %2595 = vmatpush.bf16.msrb.mxu3 %v6255_v5  ;;  %1676 = vmatmul.bf16.vlgmr.msra.gmra.mxu0 %v1588_v4  ;;  %v7637_v37 = vunpack.c.l.b16 %v1395_v41  ;;  %v1184_v32 = vshll.u32 %v1091_v15, 16  ;;  %v1485_v40 = vor.u32 %v1484_v58, %v1480_v1  ;;  %v1190_v43 = vshll.u32 %v7625_v34, 16  ;;  %v1109_v4 = vld [vmem:[#allocation2 + $0x78] sm:$0xf]  ;;  %v1117_v35 = vld [vmem:[#allocation2 + $0xa8] sm:$0xf] }
  0xf3   : > { %1901 = vmatpush.bf16.msrb.mxu1 %v6215_v16  ;;  %3276 = vmatpush.bf16.msrb.mxu0 %v6263_v17  ;;  %v1476_v39 = vrot.slane %v1475_v54, 4  ;;  %v1194_v45 = vshrl.u32 %v7625_v34, 16  ;;  %v1200_v50 = vshll.u32 %v7634_v62, 16  ;;  %v1301_v48 = vshrl.u32 %v1101_v6, 16  ;;  %v6260_v41 = vld [vmem:[%s7220_s29 + $0x120] sm:$0xff] }
  0xf4   : > { %v1597_v47 = vpack.c.b16 %v7637_v37, %v7632_v44  ;;  %v1186_v49 = vrot.slane %v1184_v32, 5  ;;  %v1486_v55 = vrot.slane %v1485_v40, 4  ;;  %v1192_v56 = vrot.slane %v1190_v43, 5 }
  0xf5   : > { %2282 = vmatpush.bf16.msrb.mxu2 %v6230_v25  ;;  %v1481_v53 = vsel %vm7548_vm11, %v1476_v39, %v1480_v1  ;;  %v1196_v57 = vrot.slane %v1194_v45, 4  ;;  %v1202_v2 = vrot.slane %v1200_v50, 5  ;;  %v1303_v3 = vrot.slane %v1301_v48, 4 }
  0xf6   : > { %2596 = vmatpush.bf16.msrb.mxu3 %v6254_v26  ;;  %v7649_v5 = vunpack.c.l.b16 %v1481_v53  ;;  %v1187_v61 = vor.u32 %v1186_v49, %v1183_v21  ;;  %v1491_v8 = vsel %vm7548_vm11, %v1486_v55, %v1490_v11  ;;  %v1304_v12 = vshll.u32 %v1101_v6, 16  ;;  %v1147_v26 = vld [vmem:[#allocation2 + $0x80] sm:$0x1]  ;;  %v6227_v11 = vld [vmem:[%s7220_s29 + $0x98] sm:$0xff]  ;;  %v1151_v49 = vld [vmem:[#allocation2 + $0xb0] sm:$0x1] }
  0xf7   : > { %1902 = vmatpush.bf16.msrb.mxu1 %v6214_v36  ;;  %3277 = vmatpush.bf16.msrb.mxu0 %v6262_v38  ;;  %v1197_v9 = vor.u32 %v1196_v57, %v1192_v56  ;;  %v1310_v13 = vshll.u32 %v1102_v51, 16  ;;  %v1583_v14 = vunpack.c.l.b16 %v1491_v8  ;;  %v1314_v16 = vshrl.u32 %v1102_v51, 16  ;;  %v6251_v21 = vld [vmem:[%s7220_s29 + $0xd8] sm:$0xff] }
  0xf8   : > { %v1188_v15 = vrot.slane %v1187_v61, 4  ;;  %v1320_v17 = vshll.u32 %v1143_v59, 16  ;;  %v1306_v22 = vrot.slane %v1304_v12, 5  ;;  %v1397_v27 = vshrl.u32 %v1109_v4, 16  ;;  %v7666_v51 = vld [vmem:[#allocation2 + $0x18] sm:$0xf] }
  0xf9   : > { %2283 = vmatpush.bf16.msrb.mxu2 %v6229_v42  ;;  %v1198_v24 = vrot.slane %v1197_v9, 4  ;;  %v1312_v25 = vrot.slane %v1310_v13, 5  ;;  %v1601_v28 = vpack.c.b16 %v1583_v14, %v7649_v5  ;;  %v1316_v33 = vrot.slane %v1314_v16, 4  ;;  %v1118_v42 = vld [vmem:[#allocation2 + $0xac] sm:$0xf]  ;;  %v6211_v57 = vld [vmem:[%s7220_s29 + $0x18] sm:$0xff] }
  0xfa   : > { %2597 = vmatpush.bf16.msrb.mxu3 %v6253_v46  ;;  %v1193_v29 = vsel %vm7548_vm11, %v1188_v15, %v1192_v56  ;;  %v1322_v1 = vrot.slane %v1320_v17, 5  ;;  %v1307_v6 = vor.u32 %v1306_v22, %v1303_v3  ;;  %v1399_v36 = vrot.slane %v1397_v27, 4  ;;  %v6259_v59 = vld [vmem:[%s7220_s29 + $0x118] sm:$0xff]  ;;  %v6250_v3 = vld [vmem:[%s7220_s29 + $0xd0] sm:$0xff]  ;;  %v7695_v27 = vld [vmem:[#allocation2 + $0x20] sm:$0x1] }
  0xfb   : > { %1903 = vmatpush.bf16.msrb.mxu1 %v6213_v63  ;;  %3278 = vmatpush.bf16.msrb.mxu0 %v6261_v0  ;;  %v1203_v54 = vsel %vm7548_vm11, %v1198_v24, %v1202_v2  ;;  %v1558_v58 = vunpack.c.l.b16 %v1193_v29  ;;  %v1317_v38 = vor.u32 %v1316_v33, %v1312_v25  ;;  %v1400_v39 = vshll.u32 %v1109_v4, 16  ;;  %v6226_v0 = vld [vmem:[%s7220_s29 + $0x90] sm:$0xff]  ;;  %v6225_v24 = vld [vmem:[%s7220_s29 + $0x88] sm:$0xff]  ;;  %v1103_v29 = vld [vmem:[#allocation2 + $0x54] sm:$0xf] }
  0xfc   : > { %v1559_v32 = vunpack.c.l.b16 %v1203_v54  ;;  %v1406_v40 = vshll.u32 %v1110_v23, 16  ;;  %v1308_v43 = vrot.slane %v1307_v6, 4  ;;  %v1410_v45 = vshrl.u32 %v1110_v23, 16  ;;  %v7690_v23 = vld [vmem:[#allocation2 + $0x1c] sm:$0xf] }
  0xfd   : > { %2284 = vmatpush.bf16.msrb.mxu2 %v6228_v10  ;;  %v1416_v46 = vshll.u32 %v1147_v26, 16  ;;  %v1493_v50 = vshrl.u32 %v1117_v35, 16  ;;  %v1318_v53 = vrot.slane %v1317_v38, 4  ;;  %v1402_v55 = vrot.slane %v1400_v39, 5 }
  0xfe   : > { %2598 = vmatpush.bf16.msrb.mxu3 %v6252_v19  ;;  %v1589_v48 = vpack.c.b16 %v1559_v32, %v1558_v58  ;;  %v1408_v56 = vrot.slane %v1406_v40, 5  ;;  %v1313_v5 = vsel %vm7548_vm11, %v1308_v43, %v1312_v25  ;;  %v1412_v61 = vrot.slane %v1410_v45, 4  ;;  %v6209_v32 = vld [vmem:[%s7220_s29 + $0x8] sm:$0xff]  ;;  %v6224_v43 = vld [vmem:[%s7220_s29 + $0x80] sm:$0xff] }
  0xff   : > { %1904 = vmatpush.bf16.msrb.mxu1 %v6212_v30  ;;  %3279 = vmatpush.bf16.msrb.mxu0 %v6260_v41  ;;  %v1418_v2 = vrot.slane %v1416_v46, 5  ;;  %v1495_v63 = vrot.slane %v1493_v50, 4  ;;  %v1323_v4 = vsel %vm7548_vm11, %v1318_v53, %v1322_v1  ;;  %v7682_v8 = vunpack.c.l.b16 %v1313_v5  ;;  %v6257_v53 = vld [vmem:[%s7220_s29 + $0x108] sm:$0xff] }
 0x100   : > { %1701 = vmatmul.bf16.gmra.mxu1 %v1593_v31  ;;  %1721 = vmatmul.bf16.gmra.mxu2 %v1597_v47  ;;  %v1403_v9 = vor.u32 %v1402_v55, %v1399_v36  ;;  %v1496_v10 = vshll.u32 %v1117_v35, 16  ;;  %v7684_v19 = vunpack.c.l.b16 %v1323_v4  ;;  %v1413_v12 = vor.u32 %v1412_v61, %v1408_v56  ;;  %v6210_v47 = vld [vmem:[%s7220_s29 + $0x10] sm:$0xff]  ;;  %v7706_v36 = vld [vmem:[#allocation2 + $0x58] sm:$0xf]  ;;  %v1111_v5 = vld [vmem:[#allocation2 + $0x84] sm:$0xf] }
 0x101   : > { %2285 = vmatpush.bf16.msrb.mxu2 %v6227_v11  ;;  %1741 = vmatmul.bf16.gmra.mxu3 %v1601_v28  ;;  %v1502_v13 = vshll.u32 %v1118_v42, 16  ;;  %v1506_v7 = vshrl.u32 %v1118_v42, 16  ;;  %v1512_v44 = vshll.u32 %v1151_v49, 16  ;;  %v1205_v37 = vshrl.u32 %v7666_v51, 16  ;;  %v6249_v11 = vld [vmem:[%s7220_s29 + $0xc8] sm:$0xff] }
 0x102   : > { %2599 = vmatpush.bf16.msrb.mxu3 %v6251_v21  ;;  %1681 = vmatmul.bf16.gmra.mxu0 %v1589_v48  ;;  %v1404_v18 = vrot.slane %v1403_v9, 4  ;;  %v1498_v31 = vrot.slane %v1496_v10, 5  ;;  %v1594_v14 = vpack.c.b16 %v7684_v19, %v7682_v8  ;;  %v1414_v15 = vrot.slane %v1413_v12, 4  ;;  %v6258_v21 = vld [vmem:[%s7220_s29 + $0x110] sm:$0xff]  ;;  %v6248_v48 = vld [vmem:[%s7220_s29 + $0xc0] sm:$0xff] }
 0x103   : > { %1905 = vmatpush.bf16.msrb.mxu1 %v6211_v57  ;;  %3280 = vmatpush.bf16.msrb.mxu0 %v6259_v59  ;;  %v1504_v16 = vrot.slane %v1502_v13, 5  ;;  %v1508_v17 = vrot.slane %v1506_v7, 4  ;;  %v1514_v26 = vrot.slane %v1512_v44, 5  ;;  %v1207_v28 = vrot.slane %v1205_v37, 4  ;;  %v1112_v13 = vld [vmem:[#allocation2 + $0x88] sm:$0xf] }
 0x104   : > { %v1409_v22 = vsel %vm7548_vm11, %v1404_v18, %v1408_v56  ;;  %v1499_v25 = vor.u32 %v1498_v31, %v1495_v63  ;;  %v1419_v30 = vsel %vm7548_vm11, %v1414_v15, %v1418_v2  ;;  %v1208_v35 = vshll.u32 %v7666_v51, 16  ;;  %v7717_v51 = vld [vmem:[#allocation2 + $0x5c] sm:$0x1]  ;;  %v1148_v44 = vld [vmem:[#allocation2 + $0x8c] sm:$0x1] }
 0x105   : > { %2286 = vmatpush.bf16.msrb.mxu2 %v6226_v0  ;;  %v7699_v33 = vunpack.c.l.b16 %v1409_v22  ;;  %v1509_v1 = vor.u32 %v1508_v17, %v1504_v16  ;;  %v7702_v41 = vunpack.c.l.b16 %v1419_v30  ;;  %v1214_v58 = vshll.u32 %v7690_v23, 16  ;;  %v6256_v22 = vld [vmem:[%s7220_s29 + $0x100] sm:$0xff] }
 0x106   : > { %2600 = vmatpush.bf16.msrb.mxu3 %v6250_v3  ;;  %v1500_v54 = vrot.slane %v1499_v25, 4  ;;  %v1218_v6 = vshrl.u32 %v7690_v23, 16  ;;  %v1210_v39 = vrot.slane %v1208_v35, 5  ;;  %v1224_v40 = vshll.u32 %v7695_v27, 16  ;;  %v6208_v3 = vld [vmem:[%s7220_s29] sm:$0xff] }
 0x107   : > { %1906 = vmatpush.bf16.msrb.mxu1 %v6210_v47  ;;  %v1510_v38 = vrot.slane %v1509_v1, 4  ;;  %v1325_v42 = vshrl.u32 %v1103_v29, 16  ;;  %v1598_v45 = vpack.c.b16 %v7702_v41, %v7699_v33  ;;  %v1216_v49 = vrot.slane %v1214_v58, 5  ;;  %3281 = vmatpush.bf16.msrb.mxu0 %v6258_v21 }
 0x108   : > { %v1505_v46 = vsel %vm7548_vm11, %v1500_v54, %v1504_v16  ;;  %v1220_v50 = vrot.slane %v1218_v6, 4  ;;  %v1211_v57 = vor.u32 %v1210_v39, %v1207_v28  ;;  %v1226_v59 = vrot.slane %v1224_v40, 5  ;;  %v1120_v6 = vld [vmem:[#allocation2 + $0xb8] sm:$0xf]  ;;  %v1152_v40 = vld [vmem:[#allocation2 + $0xbc] sm:$0x1] }
 0x109   : > { %2287 = vmatpush.bf16.msrb.mxu2 %v6225_v24  ;;  %v1515_v55 = vsel %vm7548_vm11, %v1510_v38, %v1514_v26  ;;  %v1584_v56 = vunpack.c.l.b16 %v1505_v46  ;;  %v1327_v63 = vrot.slane %v1325_v42, 4  ;;  %v1328_v0 = vshll.u32 %v1103_v29, 16  ;;  %v1119_v24 = vld [vmem:[#allocation2 + $0xb4] sm:$0xf] }
 0x10a   : > { %2601 = vmatpush.bf16.msrb.mxu3 %v6249_v11  ;;  %v1585_v61 = vunpack.c.l.b16 %v1515_v55  ;;  %v1221_v2 = vor.u32 %v1220_v50, %v1216_v49  ;;  %v1212_v4 = vrot.slane %v1211_v57, 4  ;;  %v1334_v9 = vshll.u32 %v7706_v36, 16  ;;  %v6295_v42 = vld [vmem:[%s7220_s29 + $0x1b8] sm:$0xff] }
 0x10b   : > { %1907 = vmatpush.bf16.msrb.mxu1 %v6209_v32  ;;  %v1338_v10 = vshrl.u32 %v7706_v36, 16  ;;  %v1344_v12 = vshll.u32 %v7717_v51, 16  ;;  %v1330_v31 = vrot.slane %v1328_v0, 5  ;;  %v1421_v37 = vshrl.u32 %v1111_v5, 16  ;;  %3282 = vmatpush.bf16.msrb.mxu0 %v6257_v53 }
 0x10c   : > { %v1602_v7 = vpack.c.b16 %v1585_v61, %v1584_v56  ;;  %v1222_v18 = vrot.slane %v1221_v2, 4  ;;  %v1217_v47 = vsel %vm7548_vm11, %v1212_v4, %v1216_v49  ;;  %v1336_v15 = vrot.slane %v1334_v9, 5  ;;  %v7742_v2 = vld [vmem:[#allocation2 + $0x28] sm:$0xf] }
 0x10d   : > { %2288 = vmatpush.bf16.msrb.mxu2 %v6224_v43  ;;  %v1340_v16 = vrot.slane %v1338_v10, 4  ;;  %v1346_v17 = vrot.slane %v1344_v12, 5  ;;  %v1560_v26 = vunpack.c.l.b16 %v1217_v47  ;;  %v1331_v28 = vor.u32 %v1330_v31, %v1327_v63  ;;  %v6303_v10 = vld [vmem:[%s7220_s29 + $0x1f8] sm:$0xff] }
 0x10e   : > { %2602 = vmatpush.bf16.msrb.mxu3 %v6248_v48  ;;  %v1227_v25 = vsel %vm7548_vm11, %v1222_v18, %v1226_v59  ;;  %v1423_v29 = vrot.slane %v1421_v37, 4  ;;  %v1424_v1 = vshll.u32 %v1111_v5, 16  ;;  %v1430_v35 = vshll.u32 %v1112_v13, 16  ;;  %v6271_v12 = vld [vmem:[%s7220_s29 + $0x178] sm:$0xff] }
 0x10f   : > { %1908 = vmatpush.bf16.msrb.mxu1 %v6208_v3  ;;  %v1561_v30 = vunpack.c.l.b16 %v1227_v25  ;;  %v1341_v33 = vor.u32 %v1340_v16, %v1336_v15  ;;  %v1332_v41 = vrot.slane %v1331_v28, 4  ;;  %v1434_v54 = vshrl.u32 %v1112_v13, 16  ;;  %3283 = vmatpush.bf16.msrb.mxu0 %v6256_v22  ;;  %v6311_v13 = vld [vmem:[%s7220_s29 + $0x238] sm:$0xff] }
 0x110   : > { %1706 = vmatmul.bf16.gmra.mxu1 %v1594_v14  ;;  %1726 = vmatmul.bf16.gmra.mxu2 %v1598_v45  ;;  %v1440_v58 = vshll.u32 %v1148_v44, 16  ;;  %v1517_v11 = vshrl.u32 %v1119_v24, 16  ;;  %v1426_v38 = vrot.slane %v1424_v1, 5  ;;  %v1432_v39 = vrot.slane %v1430_v35, 5  ;;  %v1095_v14 = vld [vmem:[#allocation2 + $0x24] sm:$0xf] }
 0x111   : > { %1746 = vmatmul.bf16.gmra.mxu3 %v1602_v7  ;;  %v1590_v21 = vpack.c.b16 %v1561_v30, %v1560_v26  ;;  %v1342_v32 = vrot.slane %v1341_v33, 4  ;;  %v1337_v43 = vsel %vm7548_vm11, %v1332_v41, %v1336_v15  ;;  %v1436_v46 = vrot.slane %v1434_v54, 4  ;;  %4015 = vmatpush.bf16.msra.mxu2 %v6295_v42  ;;  %v7750_v44 = vld [vmem:[#allocation2 + $0x2c] sm:$0x1]  ;;  %v1990_v33 = vld [vmem:[#allocation2] sm:$0xe] }
 0x112   : > { %v1442_v8 = vrot.slane %v1440_v58, 5  ;;  %v1519_v19 = vrot.slane %v1517_v11, 4  ;;  %v7740_v49 = vunpack.c.l.b16 %v1337_v43  ;;  %v1427_v50 = vor.u32 %v1426_v38, %v1423_v29  ;;  %4696 = vmatpush.bf16.msra.mxu3 %v6303_v10  ;;  %v2716_v58 = vld [vmem:[#allocation2 + $0xc] sm:$0xf]  ;;  %v2717_v38 = vld [vmem:[#allocation2 + $0x10] sm:$0xf] }
 0x113   : > { %1686 = vmatmul.bf16.gmra.mxu0 %v1590_v21  ;;  %v1347_v45 = vsel %vm7548_vm11, %v1342_v32, %v1346_v17  ;;  %v1520_v48 = vshll.u32 %v1119_v24, 16  ;;  %v1437_v55 = vor.u32 %v1436_v46, %v1432_v39  ;;  %v1526_v56 = vshll.u32 %v1120_v6, 16  ;;  %3701 = vmatpush.bf16.msra.mxu1 %v6271_v12 }
 0x114   : > { %v1571_v53 = vunpack.c.l.b16 %v1347_v45  ;;  %v1530_v57 = vshrl.u32 %v1120_v6, 16  ;;  %v1428_v59 = vrot.slane %v1427_v50, 4  ;;  %v1536_v61 = vshll.u32 %v1152_v40, 16  ;;  %5121 = vmatpush.bf16.msra.mxu0 %v6311_v13 }
 0x115   : > { %v1522_v5 = vrot.slane %v1520_v48, 5  ;;  %v1229_v63 = vshrl.u32 %v1095_v14, 16  ;;  %v1438_v3 = vrot.slane %v1437_v55, 4  ;;  %v1528_v4 = vrot.slane %v1526_v56, 5 }
 0x116   : > { %v1595_v0 = vpack.c.b16 %v1571_v53, %v7740_v49  ;;  %v1532_v9 = vrot.slane %v1530_v57, 4  ;;  %v1433_v7 = vsel %vm7548_vm11, %v1428_v59, %v1432_v39  ;;  %v1538_v31 = vrot.slane %v1536_v61, 5  ;;  %v2718_v57 = vld [vmem:[#allocation2 + $0x14] sm:$0x1] }
 0x117   : > { %v1523_v18 = vor.u32 %v1522_v5, %v1519_v19  ;;  %v1231_v37 = vrot.slane %v1229_v63, 4  ;;  %v1443_v47 = vsel %vm7548_vm11, %v1438_v3, %v1442_v8  ;;  %v1578_v15 = vunpack.c.l.b16 %v1433_v7  ;;  %v1991_v63 = vld [vmem:[#allocation2 + $0xc] sm:$0xe] }
 0x118   : > { %v1533_v16 = vor.u32 %v1532_v9, %v1528_v4  ;;  %v1232_v17 = vshll.u32 %v1095_v14, 16  ;;  %v1579_v24 = vunpack.c.l.b16 %v1443_v47  ;;  %v1238_v25 = vshll.u32 %v7742_v2, 16 }
 0x119   : > { %v1524_v22 = vrot.slane %v1523_v18, 4  ;;  %v1242_v26 = vshrl.u32 %v7742_v2, 16  ;;  %v1248_v30 = vshll.u32 %v7750_v44, 16  ;;  %vm2038_vm12 = vcmask 1042432  }
 0x11a   : > { %v1534_v28 = vrot.slane %v1533_v16, 4  ;;  %v1234_v29 = vrot.slane %v1232_v17, 5  ;;  %v1599_v1 = vpack.c.b16 %v1579_v24, %v1578_v15  ;;  %v1240_v41 = vrot.slane %v1238_v25, 5 }
 0x11b   : > { %v1529_v35 = vsel %vm7548_vm11, %v1524_v22, %v1528_v4  ;;  %v1244_v54 = vrot.slane %v1242_v26, 4  ;;  %v1250_v32 = vrot.slane %v1248_v30, 5  ;;  %vm2039_vm13 = vcmask 1046532   ;;  %v2719_v22 = vld [vmem:[#allocation2 + $0x18] sm:$0xf] }
 0x11c   : > { %v1539_v6 = vsel %vm7548_vm11, %v1534_v28, %v1538_v31  ;;  %v1586_v11 = vunpack.c.l.b16 %v1529_v35  ;;  %v1235_v21 = vor.u32 %v1234_v29, %v1231_v37  ;;  %v5784_v42 = vrot.slane %v1990_v33, 9  ;;  %vm7762_vm14 = vmor %vm2038_vm12, %vm2039_vm13  ;;  %v2720_v29 = vld [vmem:[#allocation2 + $0x1c] sm:$0xf] }
 0x11d   : > { %v1587_v39 = vunpack.c.l.b16 %v1539_v6  ;;  %v1245_v40 = vor.u32 %v1244_v54, %v1240_v41  ;;  %v2043_v8 = vrot.slane %v7562_v52, 5  ;;  %v2046_v19 = vrot.slane %v7574_v60, 5  ;;  %v6192_v6 = vld [vmem:[#allocation2] sm:$0xff] }
 0x11e   : > { %v1236_v43 = vrot.slane %v1235_v21, 4  ;;  %v2765_v14 = vshrl.u32 %v2716_v58, 16  ;;  %v2768_v50 = vshll.u32 %v2716_v58, 16  ;;  %v2774_v48 = vshll.u32 %v2717_v38, 16 }
 0x11f   : > { %v1603_v45 = vpack.c.b16 %v1587_v39, %v1586_v11  ;;  %v1246_v49 = vrot.slane %v1245_v40, 4  ;;  %v2044_v55 = vsel %vm7762_vm14, %v5784_v42, %v2043_v8  ;;  %v2045_v56 = vrot.slane %v2043_v8, 4  ;;  %v6232_v11 = vld [vmem:[#allocation2 + $0xc] sm:$0xff]  ;;  %v2721_v8 = vld [vmem:[#allocation2 + $0x20] sm:$0x1] }
 0x120   : > { %1711 = vmatmul.bf16.gmra.mxu1 %v1595_v0  ;;  %1731 = vmatmul.bf16.gmra.mxu2 %v1599_v1  ;;  %v1241_v53 = vsel %vm7548_vm11, %v1236_v43, %v1240_v41  ;;  %v2767_v59 = vrot.slane %v2765_v14, 4  ;;  %v2169_v5 = vunpack.c.l.b16 %v2044_v55  ;;  %v2770_v61 = vrot.slane %v2768_v50, 5  ;;  %v6270_v55 = vld [vmem:[%s7220_s29 + $0x170] sm:$0xff] }
 0x121   : > { %1751 = vmatmul.bf16.gmra.mxu3 %v1603_v45  ;;  %v1251_v52 = vsel %vm7548_vm11, %v1246_v49, %v1250_v32  ;;  %v1562_v60 = vunpack.c.l.b16 %v1241_v53  ;;  %v2047_v0 = vsel %vm7762_vm14, %v2045_v56, %v2046_v19  ;;  %v2776_v4 = vrot.slane %v2774_v48, 5  ;;  %v6294_v19 = vld [vmem:[%s7220_s29 + $0x1b0] sm:$0xff]  ;;  %v2722_v48 = vld [vmem:[#allocation2 + $0x24] sm:$0xf]  ;;  %3702 = vmatpush.bf16.msra.mxu1 %v6270_v55 }
 0x122   : > { %v1563_v3 = vunpack.c.l.b16 %v1251_v52  ;;  %v2778_v9 = vshrl.u32 %v2717_v38, 16  ;;  %v2170_v10 = vunpack.c.l.b16 %v2047_v0  ;;  %v2771_v12 = vor.u32 %v2770_v61, %v2767_v59  ;;  %4016 = vmatpush.bf16.msra.mxu2 %v6294_v19  ;;  %v6302_v53 = vld [vmem:[%s7220_s29 + $0x1f0] sm:$0xff]  ;;  %v1993_v19 = vld [vmem:[#allocation2 + $0x24] sm:$0xe] }
 0x123   : > { %v2784_v13 = vshll.u32 %v2718_v57, 16  ;;  %v5785_v31 = vrot.slane %v1991_v63, 9  ;;  %v2050_v16 = vrot.slane %v7625_v34, 5  ;;  %v2053_v17 = vrot.slane %v7634_v62, 5  ;;  %v6310_v56 = vld [vmem:[%s7220_s29 + $0x230] sm:$0xff]  ;;  %4697 = vmatpush.bf16.msra.mxu3 %v6302_v53 }
 0x124   : > { %v1591_v7 = vpack.c.b16 %v1563_v3, %v1562_v60  ;;  %v2780_v18 = vrot.slane %v2778_v9, 4  ;;  %v2201_v37 = vpack.c.b16 %v2170_v10, %v2169_v5  ;;  %v2772_v47 = vrot.slane %v2771_v12, 4  ;;  %v2723_v60 = vld [vmem:[#allocation2 + $0x28] sm:$0xf]  ;;  %5122 = vmatpush.bf16.msra.mxu0 %v6310_v56  ;;  %v6193_v9 = vld [vmem:[#allocation2 + $0xc] sm:$0xff]  ;;  %v6233_v10 = vld [vmem:[#allocation2 + $0x18] sm:$0xff] }
 0x125   : > { %v2786_v24 = vrot.slane %v2784_v13, 5  ;;  %v2051_v26 = vsel %vm7762_vm14, %v5785_v31, %v2050_v16  ;;  %v2052_v28 = vrot.slane %v2050_v16, 4  ;;  %v2789_v35 = vshrl.u32 %v2719_v22, 16  ;;  %v2724_v16 = vld [vmem:[#allocation2 + $0x2c] sm:$0x1] }
 0x126   : > { %1691 = vmatmul.bf16.gmra.mxu0 %v1591_v7  ;;  %v2781_v15 = vor.u32 %v2780_v18, %v2776_v4  ;;  %v2171_v30 = vunpack.c.l.b16 %v2051_v26  ;;  %v2777_v33 = vsel %vm7548_vm11, %v2772_v47, %v2776_v4  ;;  %v2792_v41 = vshll.u32 %v2719_v22, 16 }
 0x127   : > { %v2054_v1 = vsel %vm7762_vm14, %v2052_v28, %v2053_v17  ;;  %v2798_v54 = vshll.u32 %v2720_v29, 16  ;;  %v2802_v58 = vshrl.u32 %v2720_v29, 16  ;;  %v3164_v32 = vunpack.c.l.b16 %v2777_v33 }
 0x128   : > { %v2782_v25 = vrot.slane %v2781_v15, 4  ;;  %v2172_v62 = vunpack.c.l.b16 %v2054_v1  ;;  %v2791_v39 = vrot.slane %v2789_v35, 4  ;;  %v2794_v40 = vrot.slane %v2792_v41, 5  ;;  %v2725_v41 = vld [vmem:[#allocation2 + $0x30] sm:$0xf] }
 0x129   : > { %v2800_v42 = vrot.slane %v2798_v54, 5  ;;  %v2804_v43 = vrot.slane %v2802_v58, 4  ;;  %v2808_v50 = vshll.u32 %v2721_v8, 16  ;;  %v2813_v5 = vshrl.u32 %v2722_v48, 16 }
 0x12a   : > { %v2787_v34 = vsel %vm7548_vm11, %v2782_v25, %v2786_v24  ;;  %v2202_v21 = vpack.c.b16 %v2172_v62, %v2171_v30  ;;  %v2795_v45 = vor.u32 %v2794_v40, %v2791_v39  ;;  %v2816_v61 = vshll.u32 %v2722_v48, 16  ;;  %v6234_v40 = vld [vmem:[#allocation2 + $0x24] sm:$0xff]  ;;  %v2727_v48 = vld [vmem:[#allocation2 + $0x38] sm:$0x1] }
 0x12b   : > { %v3165_v38 = vunpack.c.l.b16 %v2787_v34  ;;  %v2805_v49 = vor.u32 %v2804_v43, %v2800_v42  ;;  %v2810_v52 = vrot.slane %v2808_v50, 5  ;;  %v2822_v63 = vshll.u32 %v2723_v60, 16  ;;  %v2726_v34 = vld [vmem:[#allocation2 + $0x34] sm:$0xf] }
 0x12c   : > { %v2796_v57 = vrot.slane %v2795_v45, 4  ;;  %v2826_v3 = vshrl.u32 %v2723_v60, 16  ;;  %v2057_v12 = vrot.slane %v7690_v23, 5  ;;  %v2815_v13 = vrot.slane %v2813_v5, 4 }
 0x12d   : > { %v3196_v14 = vpack.c.b16 %v3165_v38, %v3164_v32  ;;  %v2806_v59 = vrot.slane %v2805_v49, 4  ;;  %v2818_v7 = vrot.slane %v2816_v61, 5  ;;  %v2824_v47 = vrot.slane %v2822_v63, 5  ;;  %v6194_v38 = vld [vmem:[#allocation2 + $0x18] sm:$0xff] }
 0x12e   : > { %v2801_v0 = vsel %vm7548_vm11, %v2796_v57, %v2800_v42  ;;  %v2828_v15 = vrot.slane %v2826_v3, 4  ;;  %v2059_v24 = vrot.slane %v2057_v12, 4  ;;  %v2060_v22 = vrot.slane %v7695_v27, 5  ;;  %v6293_v57 = vld [vmem:[%s7220_s29 + $0x1a8] sm:$0xff] }
 0x12f   : > { %v2811_v4 = vsel %vm7548_vm11, %v2806_v59, %v2810_v52  ;;  %v3166_v18 = vunpack.c.l.b16 %v2801_v0  ;;  %v2819_v25 = vor.u32 %v2818_v7, %v2815_v13  ;;  %v2832_v29 = vshll.u32 %v2724_v16, 16  ;;  %4017 = vmatpush.bf16.msra.mxu2 %v6293_v57  ;;  %v2728_v13 = vld [vmem:[#allocation2 + $0x3c] sm:$0xf]  ;;  %v2729_v7 = vld [vmem:[#allocation2 + $0x40] sm:$0xf] }
 0x130   : > { %1909 = vmatmul.bf16.vlgmr.msrb.gmra.mxu1 %v6192_v6  ;;  %2289 = vmatmul.bf16.vlgmr.msrb.gmra.mxu2 %v2201_v37  ;;  %v3167_v31 = vunpack.c.l.b16 %v2811_v4  ;;  %v1992_v37 = vld [vmem:[#allocation2 + $0x18] sm:$0xe]  ;;  %v2829_v28 = vor.u32 %v2828_v15, %v2824_v47  ;;  %v2061_v30 = vsel %vm7762_vm14, %v2059_v24, %v2060_v22  ;;  %v2837_v58 = vshrl.u32 %v2725_v41, 16  ;;  %v6301_v4 = vld [vmem:[%s7220_s29 + $0x1e8] sm:$0xff]  ;;  %v6235_v22 = vld [vmem:[#allocation2 + $0x30] sm:$0xff] }
 0x131   : > { %2603 = vmatmul.bf16.vlgmr.msrb.gmra.mxu3 %v6232_v11  ;;  %v5786_v17 = vrot.slane %v1992_v37, 9  ;;  %v2820_v33 = vrot.slane %v2819_v25, 4  ;;  %v2834_v35 = vrot.slane %v2832_v29, 5  ;;  %v2174_v54 = vunpack.c.l.b16 %v2061_v30  ;;  %v6595_v25 = vld [vmem:[#allocation2 + $0x34] sm:$0xf] }
 0x132   : > { %v3197_v26 = vpack.c.b16 %v3167_v31, %v3166_v18  ;;  %v2830_v1 = vrot.slane %v2829_v28, 4  ;;  %v2840_v11 = vshll.u32 %v2725_v41, 16  ;;  %v2850_v32 = vshrl.u32 %v2726_v34, 16  ;;  %4698 = vmatpush.bf16.msra.mxu3 %v6301_v4  ;;  %v2730_v41 = vld [vmem:[#allocation2 + $0x44] sm:$0x1] }
 0x133   : > { %v2058_v23 = vsel %vm7762_vm14, %v5786_v17, %v2057_v12  ;;  %v2825_v27 = vsel %vm7548_vm11, %v2820_v33, %v2824_v47  ;;  %v2064_v8 = vrot.slane %v7742_v2, 5  ;;  %v5787_v53 = vrot.slane %v1993_v19, 9  ;;  %v6195_v17 = vld [vmem:[#allocation2 + $0x24] sm:$0xff] }
 0x134   : > { %v2173_v62 = vunpack.c.l.b16 %v2058_v23  ;;  %v2835_v6 = vsel %vm7548_vm11, %v2830_v1, %v2834_v35  ;;  %v3168_v42 = vunpack.c.l.b16 %v2825_v27  ;;  %v2842_v45 = vrot.slane %v2840_v11, 5  ;;  %v1994_v23 = vld [vmem:[#allocation2 + $0x30] sm:$0xe] }
 0x135   : > { %v3169_v43 = vunpack.c.l.b16 %v2835_v6  ;;  %v2852_v50 = vrot.slane %v2850_v32, 4  ;;  %v2066_v55 = vrot.slane %v2064_v8, 4  ;;  %v2067_v56 = vrot.slane %v7750_v44, 5 }
 0x136   : > { %3284 = vmatmul.bf16.vlgmr.msrb.gmra.mxu0 %v3196_v14  ;;  %v2203_v39 = vpack.c.b16 %v2174_v54, %v2173_v62  ;;  %v2839_v14 = vrot.slane %v2837_v58, 4  ;;  %v2856_v60 = vshll.u32 %v2727_v48, 16  ;;  %v2065_v5 = vsel %vm7762_vm14, %v5787_v53, %v2064_v8  ;;  %v6596_v54 = vld [vmem:[#allocation2 + $0x38] sm:$0x1] }
 0x137   : > { %v3198_v59 = vpack.c.b16 %v3169_v43, %v3168_v42  ;;  %v2068_v61 = vsel %vm7762_vm14, %v2066_v55, %v2067_v56  ;;  %v2175_v44 = vunpack.c.l.b16 %v2065_v5  ;;  %v2861_v37 = vshrl.u32 %v2728_v13, 16  ;;  %v6196_v56 = vld [vmem:[#allocation2 + $0x30] sm:$0xff]  ;;  %v1995_v5 = vld [vmem:[#allocation2 + $0x3c] sm:$0xe] }
 0x138   : > { %v2843_v52 = vor.u32 %v2842_v45, %v2839_v14  ;;  %v2858_v0 = vrot.slane %v2856_v60, 5  ;;  %v2176_v12 = vunpack.c.l.b16 %v2068_v61  ;;  %v2864_v47 = vshll.u32 %v2728_v13, 16 }
 0x139   : > { %v2870_v15 = vshll.u32 %v2729_v7, 16  ;;  %v2874_v16 = vshrl.u32 %v2729_v7, 16  ;;  %v2863_v30 = vrot.slane %v2861_v37, 4  ;;  %v2074_v27 = vrot.slane %v6596_v54, 5  ;;  %v6598_v7 = vld [vmem:[#allocation2 + $0x44] sm:$0x1] }
 0x13a   : > { %v2844_v63 = vrot.slane %v2843_v52, 4  ;;  %v2204_v24 = vpack.c.b16 %v2176_v12, %v2175_v44  ;;  %v2866_v33 = vrot.slane %v2864_v47, 5  ;;  %v6597_v52 = vld [vmem:[#allocation2 + $0x40] sm:$0xf]  ;;  %v2733_v44 = vld [vmem:[#allocation2 + $0x50] sm:$0x1] }
 0x13b   : > { %v2872_v1 = vrot.slane %v2870_v15, 5  ;;  %v2876_v35 = vrot.slane %v2874_v16, 4  ;;  %v5789_v12 = vrot.slane %v1995_v5, 9  ;;  %v2904_v47 = vshll.u32 %v2733_v44, 16  ;;  %v6292_v15 = vld [vmem:[%s7220_s29 + $0x1a0] sm:$0xff] }
 0x13c   : > { %v2867_v6 = vor.u32 %v2866_v33, %v2863_v30  ;;  %4018 = vmatpush.bf16.msra.mxu2 %v6292_v15  ;;  %v6300_v33 = vld [vmem:[%s7220_s29 + $0x1e0] sm:$0xff]  ;;  %v6600_v5 = vld [vmem:[#allocation2 + $0x50] sm:$0x1] }
 0x13d   : > { %v2877_v11 = vor.u32 %v2876_v35, %v2872_v1  ;;  %v2734_v35 = vld [vmem:[#allocation2 + $0x54] sm:$0xf]  ;;  %4699 = vmatpush.bf16.msra.mxu3 %v6300_v33  ;;  %v6308_v54 = vld [vmem:[%s7220_s29 + $0x220] sm:$0xff] }
 0x13e   : > { %v2868_v42 = vrot.slane %v2867_v6, 4  ;;  %v2909_v6 = vshrl.u32 %v2734_v35, 16 }
 0x13f   : > { %v2878_v43 = vrot.slane %v2877_v11, 4  ;;  %v2912_v11 = vshll.u32 %v2734_v35, 16 }
 0x140   : > { %1914 = vmatmul.bf16.gmra.mxu1 %v6193_v9  ;;  %2294 = vmatmul.bf16.gmra.mxu2 %v2202_v21  ;;  %v2846_v21 = vshll.u32 %v2726_v34, 16  ;;  %v6269_v9 = vld [vmem:[%s7220_s29 + $0x168] sm:$0xff]  ;;  %v5788_v34 = vrot.slane %v1994_v23, 9  ;;  %v2873_v53 = vsel %vm7548_vm11, %v2868_v42, %v2872_v1  ;;  %v2906_v23 = vrot.slane %v2904_v47, 5  ;;  %v6268_v1 = vld [vmem:[%s7220_s29 + $0x160] sm:$0xff] }
 0x141   : > { %2608 = vmatmul.bf16.gmra.mxu3 %v6233_v10  ;;  %v6309_v10 = vld [vmem:[%s7220_s29 + $0x228] sm:$0xff]  ;;  %3703 = vmatpush.bf16.msra.mxu1 %v6269_v9  ;;  %v3172_v9 = vunpack.c.l.b16 %v2873_v53  ;;  %v2911_v53 = vrot.slane %v2909_v6, 4  ;;  %v2092_v6 = vrot.slane %v7706_v36, 5  ;;  %v2095_v36 = vrot.slane %v7717_v51, 5  ;;  %v6299_v51 = vld [vmem:[%s7220_s29 + $0x1d8] sm:$0xff] }
 0x142   : > { %v2848_v49 = vrot.slane %v2846_v21, 5  ;;  %5123 = vmatpush.bf16.msra.mxu0 %v6309_v10  ;;  %v2880_v21 = vshll.u32 %v2730_v41, 16  ;;  %v2735_v41 = vld [vmem:[#allocation2 + $0x58] sm:$0xf]  ;;  %4700 = vmatpush.bf16.msra.mxu3 %v6299_v51 }
 0x144   : > { %v2853_v2 = vor.u32 %v2852_v50, %v2848_v49  ;;  %v2849_v18 = vsel %vm7548_vm11, %v2844_v63, %v2848_v49  ;;  %v2882_v8 = vrot.slane %v2880_v21, 5  ;;  %v2918_v21 = vshll.u32 %v2735_v41, 16 }
 0x145   : > { %v3170_v28 = vunpack.c.l.b16 %v2849_v18  ;;  %v2081_v18 = vrot.slane %v6598_v7, 5  ;;  %3704 = vmatpush.bf16.msra.mxu1 %v6268_v1 }
 0x146   : > { %3289 = vmatmul.bf16.gmra.mxu0 %v3197_v26  ;;  %v2854_v3 = vrot.slane %v2853_v2, 4  ;;  %v2071_v26 = vrot.slane %v6595_v25, 5  ;;  %v2883_v55 = vsel %vm7548_vm11, %v2878_v43, %v2882_v8  ;;  %v2078_v2 = vrot.slane %v6597_v52, 5  ;;  %v6237_v8 = vld [vmem:[#allocation2 + $0x48] sm:$0xff] }
 0x147   : > { %v3173_v10 = vunpack.c.l.b16 %v2883_v55  ;;  %5124 = vmatpush.bf16.msra.mxu0 %v6308_v54  ;;  %v2914_v55 = vrot.slane %v2912_v11, 5 }
 0x148   : > { %v2859_v31 = vsel %vm7548_vm11, %v2854_v3, %v2858_v0  ;;  %v2073_v62 = vrot.slane %v2071_v26, 4  ;;  %v2072_v32 = vsel %vm7762_vm14, %v5788_v34, %v2071_v26  ;;  %v2080_v13 = vrot.slane %v2078_v2, 4 }
 0x149   : > { %v3171_v29 = vunpack.c.l.b16 %v2859_v31  ;;  %v2177_v19 = vunpack.c.l.b16 %v2072_v32  ;;  %v3200_v16 = vpack.c.b16 %v3173_v10, %v3172_v9  ;;  %v2922_v32 = vshrl.u32 %v2735_v41, 16 }
 0x14a   : > { %v2082_v26 = vsel %vm7762_vm14, %v2080_v13, %v2081_v18 }
 0x14b   : > { %v3199_v58 = vpack.c.b16 %v3171_v29, %v3170_v28 }
 0x150   : > { %1919 = vmatmul.bf16.gmra.mxu1 %v6194_v38  ;;  %2299 = vmatmul.bf16.gmra.mxu2 %v2203_v39  ;;  %v2075_v38 = vsel %vm7762_vm14, %v2073_v62, %v2074_v27  ;;  %v2731_v39 = vld [vmem:[#allocation2 + $0x48] sm:$0xf]  ;;  %v2180_v62 = vunpack.c.l.b16 %v2082_v26  ;;  %v2738_v26 = vld [vmem:[#allocation2 + $0x64] sm:$0xf] }
 0x151   : > { %2613 = vmatmul.bf16.gmra.mxu3 %v6234_v40  ;;  %v2732_v40 = vld [vmem:[#allocation2 + $0x4c] sm:$0xf]  ;;  %v2178_v14 = vunpack.c.l.b16 %v2075_v38  ;;  %v2885_v45 = vshrl.u32 %v2731_v39, 16  ;;  %v2888_v49 = vshll.u32 %v2731_v39, 16  ;;  %v2942_v35 = vshll.u32 %v2738_v26, 16 }
 0x152   : > { %v2894_v50 = vshll.u32 %v2732_v40, 16  ;;  %v2898_v48 = vshrl.u32 %v2732_v40, 16  ;;  %v6197_v40 = vld [vmem:[#allocation2 + $0x3c] sm:$0xff]  ;;  %v2946_v41 = vshrl.u32 %v2738_v26, 16 }
 0x153   : > { %v2205_v57 = vpack.c.b16 %v2178_v14, %v2177_v19  ;;  %v2887_v61 = vrot.slane %v2885_v45, 4  ;;  %v2890_v63 = vrot.slane %v2888_v49, 5  ;;  %v6599_v45 = vld [vmem:[#allocation2 + $0x4c] sm:$0xf] }
 0x154   : > { %v2896_v3 = vrot.slane %v2894_v50, 5  ;;  %v2900_v0 = vrot.slane %v2898_v48, 4  ;;  %v2085_v49 = vrot.slane %v6599_v45, 5  ;;  %v1996_v48 = vld [vmem:[#allocation2 + $0x48] sm:$0xe] }
 0x155   : > { %v2891_v31 = vor.u32 %v2890_v63, %v2887_v61  ;;  %v5790_v52 = vrot.slane %v1996_v48, 9  ;;  %v2088_v61 = vrot.slane %v6600_v5, 5  ;;  %v2739_v45 = vld [vmem:[#allocation2 + $0x68] sm:$0x1]  ;;  %v2094_v48 = vrot.slane %v2092_v6, 4 }
 0x156   : > { %3294 = vmatmul.bf16.gmra.mxu0 %v3198_v59  ;;  %v6236_v59 = vld [vmem:[#allocation2 + $0x3c] sm:$0xff]  ;;  %v2901_v37 = vor.u32 %v2900_v0, %v2896_v3 }
 0x157   : > { %v2892_v28 = vrot.slane %v2891_v31, 4  ;;  %v2086_v13 = vsel %vm7762_vm14, %v5790_v52, %v2085_v49  ;;  %v6291_v52 = vld [vmem:[%s7220_s29 + $0x198] sm:$0xff] }
 0x158   : > { %v2902_v29 = vrot.slane %v2901_v37, 4  ;;  %v2181_v15 = vunpack.c.l.b16 %v2086_v13  ;;  %4019 = vmatpush.bf16.msra.mxu2 %v6291_v52 }
 0x159   : > { %v2897_v27 = vsel %vm7548_vm11, %v2892_v28, %v2896_v3  ;;  %v2915_v3 = vor.u32 %v2914_v55, %v2911_v53 }
 0x15a   : > { %v3174_v19 = vunpack.c.l.b16 %v2897_v27 }
 0x15b   : > { %v2916_v31 = vrot.slane %v2915_v3, 4  ;;  %v6267_v3 = vld [vmem:[%s7220_s29 + $0x158] sm:$0xff] }
 0x15c   : > { %3705 = vmatpush.bf16.msra.mxu1 %v6267_v3 }
 0x160   : > { %1924 = vmatmul.bf16.gmra.mxu1 %v6195_v17  ;;  %2304 = vmatmul.bf16.gmra.mxu2 %v2204_v24 }
 0x161   : > { %2618 = vmatmul.bf16.gmra.mxu3 %v6235_v22  ;;  %v2079_v22 = vsel %vm7762_vm14, %v5789_v12, %v2078_v2  ;;  %v2087_v2 = vrot.slane %v2085_v49, 4 }
 0x162   : > { %v2179_v34 = vunpack.c.l.b16 %v2079_v22  ;;  %v2737_v22 = vld [vmem:[#allocation2 + $0x60] sm:$0xf] }
 0x163   : > { %v2089_v7 = vsel %vm7762_vm14, %v2087_v2, %v2088_v61  ;;  %v2933_v33 = vshrl.u32 %v2737_v22, 16  ;;  %v2936_v1 = vshll.u32 %v2737_v22, 16 }
 0x164   : > { %v2206_v42 = vpack.c.b16 %v2180_v62, %v2179_v34  ;;  %v6198_v62 = vld [vmem:[#allocation2 + $0x48] sm:$0xff] }
 0x166   : > { %3299 = vmatmul.bf16.gmra.mxu0 %v3199_v58  ;;  %v2907_v58 = vsel %vm7548_vm11, %v2902_v29, %v2906_v23 }
 0x167   : > { %v3175_v14 = vunpack.c.l.b16 %v2907_v58  ;;  %v6238_v58 = vld [vmem:[#allocation2 + $0x54] sm:$0xff] }
 0x169   : > { %v3201_v63 = vpack.c.b16 %v3175_v14, %v3174_v19  ;;  %v2948_v19 = vrot.slane %v2946_v41, 4 }
 0x16d   : > { %v7826_v60 = vpop.f32.mrf.mxu1 }
 0x16f   : > { %v7828_v4 = vpop.f32.mrf.mxu0 }
 0x170   : > { %1929 = vmatmul.bf16.gmra.mxu1 %v6196_v56  ;;  %2309 = vmatmul.bf16.gmra.mxu2 %v2205_v57  ;;  %v2920_v56 = vrot.slane %v2918_v21, 5  ;;  %v2924_v57 = vrot.slane %v2922_v32, 4  ;;  %v1997_v32 = vld [vmem:[#allocation2 + $0x54] sm:$0xe] }
 0x171   : > { %2623 = vmatmul.bf16.gmra.mxu3 %v6236_v59  ;;  %v2736_v59 = vld [vmem:[#allocation2 + $0x5c] sm:$0x1]  ;;  %v5791_v49 = vrot.slane %v1997_v32, 9 }
 0x172   : > { %v2925_v0 = vor.u32 %v2924_v57, %v2920_v56  ;;  %v2928_v9 = vshll.u32 %v2736_v59, 16  ;;  %v2921_v28 = vsel %vm7548_vm11, %v2916_v31, %v2920_v56  ;;  %v2952_v59 = vshll.u32 %v2739_v45, 16 }
 0x173   : > { %v7831_v17 = vpop.f32.mrf.mxu2  ;;  %v3176_v11 = vunpack.c.l.b16 %v2921_v28  ;;  %v2093_v61 = vsel %vm7762_vm14, %v5791_v49, %v2092_v6  ;;  %v6239_v6 = vld [vmem:[#allocation2 + $0x60] sm:$0xff] }
 0x174   : > { %v7833_v24 = vpop.f32.mrf.mxu3  ;;  %v2926_v37 = vrot.slane %v2925_v0, 4  ;;  %v2930_v47 = vrot.slane %v2928_v9, 5  ;;  %v2954_v13 = vrot.slane %v2952_v59, 5  ;;  %v2183_v31 = vunpack.c.l.b16 %v2093_v61 }
 0x175   : > { %v7837_v25 = vpop.f32.mrf.mxu1 }
 0x176   : > { %3304 = vmatmul.bf16.gmra.mxu0 %v3200_v16  ;;  %v2182_v16 = vunpack.c.l.b16 %v2089_v7  ;;  %v2931_v29 = vsel %vm7548_vm11, %v2926_v37, %v2930_v47  ;;  %v2740_v7 = vld [vmem:[#allocation2 + $0x6c] sm:$0xf]  ;;  %v2741_v47 = vld [vmem:[#allocation2 + $0x70] sm:$0xf] }
 0x177   : > { %v7841_v30 = vpop.f32.mrf.mxu0  ;;  %v3177_v21 = vunpack.c.l.b16 %v2931_v29  ;;  %v2960_v22 = vshll.u32 %v2740_v7, 16 }
 0x178   : > { %v2207_v54 = vpack.c.b16 %v2182_v16, %v2181_v15  ;;  %v2957_v16 = vshrl.u32 %v2740_v7, 16 }
 0x179   : > { %v3202_v53 = vpack.c.b16 %v3177_v21, %v3176_v11  ;;  %v6601_v11 = vld [vmem:[#allocation2 + $0x64] sm:$0xf] }
 0x17a   : > { %v2099_v21 = vrot.slane %v6601_v11, 5 }
 0x17b   : > { %v7850_v38 = vpop.f32.mrf.mxu2 }
 0x17c   : > { %v7852_v39 = vpop.f32.mrf.mxu3 }
 0x17d   : > { %v7854_v43 = vpop.f32.mrf.mxu1 }
 0x17f   : > { %v7856_v50 = vpop.f32.mrf.mxu0 }
 0x180   : > { %1934 = vmatmul.bf16.gmra.mxu1 %v6197_v40  ;;  %2314 = vmatmul.bf16.gmra.mxu2 %v2206_v42  ;;  %v2935_v40 = vrot.slane %v2933_v33, 4  ;;  %v2938_v42 = vrot.slane %v2936_v1, 5  ;;  %v2966_v33 = vshll.u32 %v2741_v47, 16  ;;  %v2970_v1 = vshrl.u32 %v2741_v47, 16 }
 0x181   : > { %2628 = vmatmul.bf16.gmra.mxu3 %v6237_v8  ;;  %v2944_v8 = vrot.slane %v2942_v35, 5  ;;  %v6307_v35 = vld [vmem:[%s7220_s29 + $0x218] sm:$0xff] }
 0x182   : > { %v2939_v56 = vor.u32 %v2938_v42, %v2935_v40  ;;  %5125 = vmatpush.bf16.msra.mxu0 %v6307_v35  ;;  %v1998_v42 = vld [vmem:[#allocation2 + $0x60] sm:$0xe]  ;;  %v2968_v45 = vrot.slane %v2966_v33, 5  ;;  %v2972_v49 = vrot.slane %v2970_v1, 4 }
 0x183   : > { %v7858_v10 = vpop.f32.mrf.mxu2  ;;  %v2949_v57 = vor.u32 %v2948_v19, %v2944_v8  ;;  %v2962_v19 = vrot.slane %v2960_v22, 5  ;;  %v2744_v22 = vld [vmem:[#allocation2 + $0x7c] sm:$0xf] }
 0x184   : > { %v7860_v44 = vpop.f32.mrf.mxu3  ;;  %v2940_v0 = vrot.slane %v2939_v56, 4  ;;  %v6602_v56 = vld [vmem:[#allocation2 + $0x68] sm:$0x1]  ;;  %v2973_v51 = vor.u32 %v2972_v49, %v2968_v45 }
 0x185   : > { %v7862_v12 = vpop.f32.mrf.mxu1  ;;  %v2950_v9 = vrot.slane %v2949_v57, 4  ;;  %v2102_v57 = vrot.slane %v6602_v56, 5 }
 0x186   : > { %3309 = vmatmul.bf16.gmra.mxu0 %v3201_v63  ;;  %v2096_v63 = vsel %vm7762_vm14, %v2094_v48, %v2095_v36  ;;  %v2945_v28 = vsel %vm7548_vm11, %v2940_v0, %v2944_v8  ;;  %v2959_v8 = vrot.slane %v2957_v16, 4  ;;  %v2742_v48 = vld [vmem:[#allocation2 + $0x74] sm:$0x1]  ;;  %v5792_v36 = vrot.slane %v1998_v42, 9 }
 0x187   : > { %v7868_v18 = vpop.f32.mrf.mxu0  ;;  %v2184_v37 = vunpack.c.l.b16 %v2096_v63  ;;  %v2955_v29 = vsel %vm7548_vm11, %v2950_v9, %v2954_v13  ;;  %v3178_v32 = vunpack.c.l.b16 %v2945_v28  ;;  %v2976_v3 = vshll.u32 %v2742_v48, 16  ;;  %v6603_v48 = vld [vmem:[#allocation2 + $0x70] sm:$0xf] }
 0x188   : > { %v3179_v40 = vunpack.c.l.b16 %v2955_v29  ;;  %v2963_v52 = vor.u32 %v2962_v19, %v2959_v8  ;;  %v2100_v13 = vsel %vm7762_vm14, %v5792_v36, %v2099_v21  ;;  %v2974_v47 = vrot.slane %v2973_v51, 4  ;;  %v6240_v19 = vld [vmem:[#allocation2 + $0x6c] sm:$0xff] }
 0x189   : > { %v2978_v16 = vrot.slane %v2976_v3, 5  ;;  %v2185_v28 = vunpack.c.l.b16 %v2100_v13  ;;  %v2106_v36 = vrot.slane %v6603_v48, 5  ;;  %v2745_v3 = vld [vmem:[#allocation2 + $0x80] sm:$0x1]  ;;  %v2746_v48 = vld [vmem:[#allocation2 + $0x84] sm:$0xf] }
 0x18a   : > { %v3203_v59 = vpack.c.b16 %v3179_v40, %v3178_v32  ;;  %v6200_v40 = vld [vmem:[#allocation2 + $0x60] sm:$0xff] }
 0x18b   : > { %v7874_v23 = vpop.f32.mrf.mxu2 }
 0x18c   : > { %v7876_v34 = vpop.f32.mrf.mxu3 }
 0x18d   : > { %v7878_v27 = vpop.f32.mrf.mxu1 }
 0x190   : > { %v7881_v14 = vpop.f32.mrf.mxu0  ;;  %1939 = vmatmul.bf16.gmra.mxu1 %v6198_v62  ;;  %2319 = vmatmul.bf16.gmra.mxu2 %v2207_v54  ;;  %v6199_v62 = vld [vmem:[#allocation2 + $0x54] sm:$0xff]  ;;  %v2208_v54 = vpack.c.b16 %v2184_v37, %v2183_v31  ;;  %v2964_v31 = vrot.slane %v2963_v52, 4 }
 0x191   : > { %2633 = vmatmul.bf16.gmra.mxu3 %v6238_v58  ;;  %v2743_v37 = vld [vmem:[#allocation2 + $0x78] sm:$0xf] }
 0x192   : > { %v2981_v33 = vshrl.u32 %v2743_v37, 16  ;;  %v2984_v1 = vshll.u32 %v2743_v37, 16  ;;  %v2969_v35 = vsel %vm7548_vm11, %v2964_v31, %v2968_v45  ;;  %v6604_v31 = vld [vmem:[#allocation2 + $0x74] sm:$0x1] }
 0x193   : > { %v7884_v55 = vpop.f32.mrf.mxu2  ;;  %v3180_v49 = vunpack.c.l.b16 %v2969_v35  ;;  %v2109_v37 = vrot.slane %v6604_v31, 5 }
 0x194   : > { %v7887_v2 = vpop.f32.mrf.mxu3  ;;  %v2986_v45 = vrot.slane %v2984_v1, 5 }
 0x195   : > { %v7889_v5 = vpop.f32.mrf.mxu1 }
 0x196   : > { %3314 = vmatmul.bf16.gmra.mxu0 %v3202_v53  ;;  %v2101_v53 = vrot.slane %v2099_v21, 4  ;;  %v2979_v21 = vsel %vm7548_vm11, %v2974_v47, %v2978_v16 }
 0x198   : > { %v7897_v15 = vpop.f32.mrf.mxu0  ;;  %v2103_v7 = vsel %vm7762_vm14, %v2101_v53, %v2102_v57  ;;  %v2983_v53 = vrot.slane %v2981_v33, 4  ;;  %v3181_v57 = vunpack.c.l.b16 %v2979_v21  ;;  %v6290_v33 = vld [vmem:[%s7220_s29 + $0x190] sm:$0xff] }
 0x199   : > { %v2186_v29 = vunpack.c.l.b16 %v2103_v7  ;;  %v2108_v7 = vrot.slane %v2106_v36, 4  ;;  %4020 = vmatpush.bf16.msra.mxu2 %v6290_v33 }
 0x19a   : > { %v2987_v47 = vor.u32 %v2986_v45, %v2983_v53  ;;  %v3204_v16 = vpack.c.b16 %v3181_v57, %v3180_v49  ;;  %v6298_v53 = vld [vmem:[%s7220_s29 + $0x1d0] sm:$0xff] }
 0x19b   : > { %v7899_v26 = vpop.f32.mrf.mxu2  ;;  %v2209_v42 = vpack.c.b16 %v2186_v29, %v2185_v28  ;;  %v3000_v28 = vshll.u32 %v2745_v3, 16  ;;  %v2110_v21 = vsel %vm7762_vm14, %v2108_v7, %v2109_v37  ;;  %v6266_v45 = vld [vmem:[%s7220_s29 + $0x150] sm:$0xff]  ;;  %4701 = vmatpush.bf16.msra.mxu3 %v6298_v53  ;;  %v3005_v3 = vshrl.u32 %v2746_v48, 16 }
 0x19c   : > { %v7906_v41 = vpop.f32.mrf.mxu3  ;;  %3706 = vmatpush.bf16.msra.mxu1 %v6266_v45  ;;  %v2748_v45 = vld [vmem:[#allocation2 + $0x8c] sm:$0x1] }
 0x19d   : > { %v7908_v58 = vpop.f32.mrf.mxu1  ;;  %v3002_v49 = vrot.slane %v3000_v28, 5 }
 0x1a0   : > { %1944 = vmatmul.bf16.gmra.mxu1 %v6199_v62  ;;  %2324 = vmatmul.bf16.gmra.mxu2 %v2208_v54  ;;  %v2990_v62 = vshll.u32 %v2744_v22, 16  ;;  %v2994_v54 = vshrl.u32 %v2744_v22, 16 }
 0x1a1   : > { %2638 = vmatmul.bf16.gmra.mxu3 %v6239_v6 }
 0x1a2   : > { %v2992_v52 = vrot.slane %v2990_v62, 5  ;;  %v2996_v51 = vrot.slane %v2994_v54, 4 }
 0x1a3   : > { %v7910_v61 = vpop.f32.mrf.mxu0  ;;  %v7912_v63 = vpop.f32.mrf.mxu2 }
 0x1a4   : > { %v7914_v0 = vpop.f32.mrf.mxu3  ;;  %v2997_v22 = vor.u32 %v2996_v51, %v2992_v52 }
 0x1a5   : > { %v7916_v9 = vpop.f32.mrf.mxu1 }
 0x1a6   : > { %3319 = vmatmul.bf16.gmra.mxu0 %v3203_v59  ;;  %v1999_v59 = vld [vmem:[#allocation2 + $0x6c] sm:$0xe] }
 0x1a7   : > { %v5793_v13 = vrot.slane %v1999_v59, 9  ;;  %v2188_v59 = vunpack.c.l.b16 %v2110_v21 }
 0x1a9   : > { %v2107_v54 = vsel %vm7762_vm14, %v5793_v13, %v2106_v36  ;;  %v3008_v13 = vshll.u32 %v2746_v48, 16 }
 0x1aa   : > { %v2187_v57 = vunpack.c.l.b16 %v2107_v54  ;;  %v2000_v54 = vld [vmem:[#allocation2 + $0x78] sm:$0xe] }
 0x1ab   : > { %v7924_v6 = vpop.f32.mrf.mxu0  ;;  %v7926_v11 = vpop.f32.mrf.mxu2 }
 0x1ac   : > { %v7930_v32 = vpop.f32.mrf.mxu3  ;;  %v2210_v33 = vpack.c.b16 %v2188_v59, %v2187_v57  ;;  %v6606_v57 = vld [vmem:[#allocation2 + $0x80] sm:$0x1] }
 0x1ad   : > { %v1910_v8 = vpop.f32.mrf.mxu1  ;;  %v2116_v59 = vrot.slane %v6606_v57, 5 }
 0x1ae   : > { %v1911_v56 = vadd.f32 %v1910_v8, %v7828_v4 }
 0x1b0   : > { %1949 = vmatmul.bf16.gmra.mxu1 %v6200_v40  ;;  %2329 = vmatmul.bf16.gmra.mxu2 %v2209_v42  ;;  %v2988_v40 = vrot.slane %v2987_v47, 4 }
 0x1b1   : > { %2643 = vmatmul.bf16.gmra.mxu3 %v6240_v19  ;;  %v2998_v19 = vrot.slane %v2997_v22, 4 }
 0x1b2   : > { %v2993_v51 = vsel %vm7548_vm11, %v2988_v40, %v2992_v52  ;;  %v6605_v52 = vld [vmem:[#allocation2 + $0x7c] sm:$0xf]  ;;  %v3007_v40 = vrot.slane %v3005_v3, 4 }
 0x1b3   : > { %v3285_v29 = vpop.f32.mrf.mxu0  ;;  %v2290_v4 = vpop.f32.mrf.mxu2  ;;  %v2113_v21 = vrot.slane %v6605_v52, 5 }
 0x1b4   : > { %v2370_v1 = vadd.f32 %v2290_v4, %v1911_v56  ;;  %v2604_v35 = vpop.f32.mrf.mxu3  ;;  %v2747_v56 = vld [vmem:[#allocation2 + $0x88] sm:$0xf]  ;;  %v6201_v4 = vld [vmem:[#allocation2 + $0x6c] sm:$0xff] }
 0x1b5   : > { %v1912_v62 = vpop.f32.mrf.mxu1  ;;  %v3014_v7 = vshll.u32 %v2747_v56, 16  ;;  %v3018_v31 = vshrl.u32 %v2747_v56, 16  ;;  %v2115_v56 = vrot.slane %v2113_v21, 4 }
 0x1b6   : > { %3324 = vmatmul.bf16.gmra.mxu0 %v3204_v16  ;;  %v2684_v42 = vadd.f32 %v2604_v35, %v2370_v1  ;;  %v1913_v8 = vadd.f32 %v1912_v62, %v7841_v30  ;;  %v3003_v30 = vsel %vm7548_vm11, %v2998_v19, %v3002_v49  ;;  %v6306_v16 = vld [vmem:[%s7220_s29 + $0x210] sm:$0xff]  ;;  %v3182_v1 = vunpack.c.l.b16 %v2993_v51  ;;  %v6241_v35 = vld [vmem:[#allocation2 + $0x78] sm:$0xff] }
 0x1b7   : > { %v3183_v62 = vunpack.c.l.b16 %v3003_v30  ;;  %5126 = vmatpush.bf16.msra.mxu0 %v6306_v16  ;;  %v3016_v48 = vrot.slane %v3014_v7, 5  ;;  %v3020_v53 = vrot.slane %v3018_v31, 4 }
 0x1b8   : > { %v7941_v36 = vadd.f32 %v3285_v29, %v2684_v42  ;;  %v3010_v42 = vrot.slane %v3008_v13, 5  ;;  %v3024_v13 = vshll.u32 %v2748_v45, 16 }
 0x1b9   : > { %v3021_v3 = vor.u32 %v3020_v53, %v3016_v48 }
 0x1ba   : > { %v3011_v51 = vor.u32 %v3010_v42, %v3007_v40 }
 0x1bb   : > { %v3287_v37 = vpop.f32.mrf.mxu0  ;;  %v2292_v47 = vpop.f32.mrf.mxu2 }
 0x1bc   : > { %v2371_v22 = vadd.f32 %v2292_v47, %v1913_v8  ;;  %v2606_v28 = vpop.f32.mrf.mxu3  ;;  %v5794_v8 = vrot.slane %v2000_v54, 9  ;;  %v3205_v47 = vpack.c.b16 %v3183_v62, %v3182_v1  ;;  %v3026_v1 = vrot.slane %v3024_v13, 5  ;;  %v2749_v62 = vld [vmem:[#allocation2 + $0x90] sm:$0xf]  ;;  %v2750_v54 = vld [vmem:[#allocation2 + $0x94] sm:$0xf] }
 0x1bd   : > { %v1915_v29 = vpop.f32.mrf.mxu1  ;;  %v3038_v45 = vshll.u32 %v2750_v54, 16 }
 0x1be   : > { %v2685_v19 = vadd.f32 %v2606_v28, %v2371_v22  ;;  %v1916_v49 = vadd.f32 %v1915_v29, %v7856_v50  ;;  %v2114_v31 = vsel %vm7762_vm14, %v5794_v8, %v2113_v21  ;;  %v3029_v21 = vshrl.u32 %v2749_v62, 16 }
 0x1bf   : > { %v2189_v52 = vunpack.c.l.b16 %v2114_v31  ;;  %v3042_v8 = vshrl.u32 %v2750_v54, 16  ;;  %v6608_v54 = vld [vmem:[#allocation2 + $0x8c] sm:$0x1] }
 0x1c0   : > { %1954 = vmatmul.bf16.gmra.mxu1 %v6201_v4  ;;  %2334 = vmatmul.bf16.gmra.mxu2 %v2210_v33  ;;  %v7949_v30 = vadd.f32 %v3287_v37, %v2685_v19  ;;  %v2117_v4 = vsel %vm7762_vm14, %v2115_v56, %v2116_v59  ;;  %v3012_v33 = vrot.slane %v3011_v51, 4  ;;  %v6202_v51 = vld [vmem:[#allocation2 + $0x78] sm:$0xff] }
 0x1c1   : > { %2648 = vmatmul.bf16.gmra.mxu3 %v6241_v35  ;;  %v3022_v35 = vrot.slane %v3021_v3, 4  ;;  %v2190_v40 = vunpack.c.l.b16 %v2117_v4 }
 0x1c2   : > { %v3017_v19 = vsel %vm7548_vm11, %v3012_v33, %v3016_v48 }
 0x1c3   : > { %v3290_v16 = vpop.f32.mrf.mxu0  ;;  %v2295_v22 = vpop.f32.mrf.mxu2  ;;  %v3027_v53 = vsel %vm7548_vm11, %v3022_v35, %v3026_v1  ;;  %v3184_v3 = vunpack.c.l.b16 %v3017_v19  ;;  %v3044_v35 = vrot.slane %v3042_v8, 4  ;;  %v2751_v1 = vld [vmem:[#allocation2 + $0x98] sm:$0x1] }
 0x1c4   : > { %v2372_v28 = vadd.f32 %v2295_v22, %v1916_v49  ;;  %v2609_v50 = vpop.f32.mrf.mxu3  ;;  %v3032_v49 = vshll.u32 %v2749_v62, 16  ;;  %v3185_v22 = vunpack.c.l.b16 %v3027_v53 }
 0x1c5   : > { %v1917_v7 = vpop.f32.mrf.mxu1 }
 0x1c6   : > { %3329 = vmatmul.bf16.gmra.mxu0 %v3205_v47  ;;  %v2686_v29 = vadd.f32 %v2609_v50, %v2372_v28  ;;  %v1918_v37 = vadd.f32 %v1917_v7, %v7868_v18  ;;  %v2211_v47 = vpack.c.b16 %v2190_v40, %v2189_v52  ;;  %v2001_v28 = vld [vmem:[#allocation2 + $0x84] sm:$0xe]  ;;  %v6607_v50 = vld [vmem:[#allocation2 + $0x88] sm:$0xf]  ;;  %v3031_v7 = vrot.slane %v3029_v21, 4 }
 0x1c7   : > { %v2120_v48 = vrot.slane %v6607_v50, 5  ;;  %v3034_v31 = vrot.slane %v3032_v49, 5  ;;  %v2123_v52 = vrot.slane %v6608_v54, 5  ;;  %v3206_v53 = vpack.c.b16 %v3185_v22, %v3184_v3  ;;  %v6297_v50 = vld [vmem:[%s7220_s29 + $0x1c8] sm:$0xff] }
 0x1c8   : > { %v7956_v42 = vadd.f32 %v3290_v16, %v2686_v29  ;;  %v6242_v16 = vld [vmem:[#allocation2 + $0x84] sm:$0xff]  ;;  %v3040_v29 = vrot.slane %v3038_v45, 5  ;;  %v3048_v49 = vshll.u32 %v2751_v1, 16  ;;  %4702 = vmatpush.bf16.msra.mxu3 %v6297_v50 }
 0x1c9   : > { %v2122_v62 = vrot.slane %v2120_v48, 4  ;;  %v3035_v40 = vor.u32 %v3034_v31, %v3031_v7  ;;  %v6289_v45 = vld [vmem:[%s7220_s29 + $0x188] sm:$0xff] }
 0x1ca   : > { %v3045_v21 = vor.u32 %v3044_v35, %v3040_v29  ;;  %4021 = vmatpush.bf16.msra.mxu2 %v6289_v45  ;;  %v3050_v22 = vrot.slane %v3048_v49, 5  ;;  %v6265_v7 = vld [vmem:[%s7220_s29 + $0x148] sm:$0xff] }
 0x1cb   : > { %v3292_v56 = vpop.f32.mrf.mxu0  ;;  %v2297_v18 = vpop.f32.mrf.mxu2  ;;  %v2753_v31 = vld [vmem:[#allocation2 + $0xa0] sm:$0xf]  ;;  %3707 = vmatpush.bf16.msra.mxu1 %v6265_v7  ;;  %v2754_v7 = vld [vmem:[#allocation2 + $0xa4] sm:$0x1] }
 0x1cc   : > { %v2373_v57 = vadd.f32 %v2297_v18, %v1918_v37  ;;  %v2611_v59 = vpop.f32.mrf.mxu3  ;;  %v5795_v37 = vrot.slane %v2001_v28, 9  ;;  %v2752_v28 = vld [vmem:[#allocation2 + $0x9c] sm:$0xf]  ;;  %v3066_v54 = vshrl.u32 %v2753_v31, 16 }
 0x1cd   : > { %v1920_v13 = vpop.f32.mrf.mxu1  ;;  %v3053_v1 = vshrl.u32 %v2752_v28, 16 }
 0x1ce   : > { %v2687_v4 = vadd.f32 %v2611_v59, %v2373_v57  ;;  %v1921_v33 = vadd.f32 %v1920_v13, %v7881_v14  ;;  %v3036_v13 = vrot.slane %v3035_v40, 4  ;;  %v3068_v50 = vrot.slane %v3066_v54, 4 }
 0x1d0   : > { %1959 = vmatmul.bf16.gmra.mxu1 %v6202_v51  ;;  %2339 = vmatmul.bf16.gmra.mxu2 %v2211_v47  ;;  %v7963_v19 = vadd.f32 %v3292_v56, %v2687_v4  ;;  %v2121_v51 = vsel %vm7762_vm14, %v5795_v37, %v2120_v48  ;;  %v2124_v47 = vsel %vm7762_vm14, %v2122_v62, %v2123_v52  ;;  %v3056_v37 = vshll.u32 %v2752_v28, 16 }
 0x1d1   : > { %2653 = vmatmul.bf16.gmra.mxu3 %v6242_v16  ;;  %v3046_v16 = vrot.slane %v3045_v21, 4  ;;  %v2191_v4 = vunpack.c.l.b16 %v2121_v51  ;;  %v3041_v35 = vsel %vm7548_vm11, %v3036_v13, %v3040_v29  ;;  %v3062_v62 = vshll.u32 %v2753_v31, 16  ;;  %v2002_v51 = vld [vmem:[#allocation2 + $0x90] sm:$0xe]  ;;  %v6609_v29 = vld [vmem:[#allocation2 + $0x94] sm:$0xf] }
 0x1d2   : > { %v3055_v13 = vrot.slane %v3053_v1, 4 }
 0x1d3   : > { %v3295_v18 = vpop.f32.mrf.mxu0  ;;  %v2300_v14 = vpop.f32.mrf.mxu2  ;;  %v3064_v28 = vrot.slane %v3062_v62, 5 }
 0x1d4   : > { %v2374_v8 = vadd.f32 %v2300_v14, %v1921_v33  ;;  %v2614_v57 = vpop.f32.mrf.mxu3  ;;  %v2192_v33 = vunpack.c.l.b16 %v2124_v47  ;;  %v6203_v14 = vld [vmem:[#allocation2 + $0x84] sm:$0xff]  ;;  %v2127_v47 = vrot.slane %v6609_v29, 5 }
 0x1d5   : > { %v1922_v59 = vpop.f32.mrf.mxu1  ;;  %v3069_v1 = vor.u32 %v3068_v50, %v3064_v28  ;;  %v2755_v29 = vld [vmem:[#allocation2 + $0xa8] sm:$0xf] }
 0x1d6   : > { %3334 = vmatmul.bf16.gmra.mxu0 %v3206_v53  ;;  %v2688_v56 = vadd.f32 %v2614_v57, %v2374_v8  ;;  %v1923_v3 = vadd.f32 %v1922_v59, %v7897_v15  ;;  %v3051_v15 = vsel %vm7548_vm11, %v3046_v16, %v3050_v22  ;;  %v6305_v53 = vld [vmem:[%s7220_s29 + $0x208] sm:$0xff]  ;;  %v2212_v45 = vpack.c.b16 %v2192_v33, %v2191_v4  ;;  %v6243_v57 = vld [vmem:[#allocation2 + $0x90] sm:$0xff]  ;;  %v6610_v4 = vld [vmem:[#allocation2 + $0x98] sm:$0x1] }
 0x1d7   : > { %v3186_v8 = vunpack.c.l.b16 %v3041_v35  ;;  %v3187_v59 = vunpack.c.l.b16 %v3051_v15  ;;  %5127 = vmatpush.bf16.msra.mxu0 %v6305_v53  ;;  %v2129_v31 = vrot.slane %v2127_v47, 4  ;;  %v2130_v33 = vrot.slane %v6610_v4, 5 }
 0x1d8   : > { %v7973_v48 = vadd.f32 %v3295_v18, %v2688_v56  ;;  %v3058_v56 = vrot.slane %v3056_v37, 5  ;;  %v3072_v37 = vshll.u32 %v2754_v7, 16  ;;  %v3077_v7 = vshrl.u32 %v2755_v29, 16 }
 0x1da   : > { %v3059_v35 = vor.u32 %v3058_v56, %v3055_v13  ;;  %v2756_v13 = vld [vmem:[#allocation2 + $0xac] sm:$0xf] }
 0x1db   : > { %v3297_v52 = vpop.f32.mrf.mxu0  ;;  %v2302_v40 = vpop.f32.mrf.mxu2 }
 0x1dc   : > { %v2375_v21 = vadd.f32 %v2302_v40, %v1923_v3  ;;  %v2616_v49 = vpop.f32.mrf.mxu3  ;;  %v5796_v3 = vrot.slane %v2002_v51, 9  ;;  %v3207_v40 = vpack.c.b16 %v3187_v59, %v3186_v8  ;;  %v3074_v8 = vrot.slane %v3072_v37, 5  ;;  %v6244_v37 = vld [vmem:[#allocation2 + $0x9c] sm:$0xff] }
 0x1dd   : > { %v1925_v18 = vpop.f32.mrf.mxu1 }
 0x1de   : > { %v2689_v16 = vadd.f32 %v2616_v49, %v2375_v21  ;;  %v1926_v22 = vadd.f32 %v1925_v18, %v7910_v61  ;;  %v2128_v54 = vsel %vm7762_vm14, %v5796_v3, %v2127_v47  ;;  %v3080_v3 = vshll.u32 %v2755_v29, 16 }
 0x1df   : > { %v2193_v59 = vunpack.c.l.b16 %v2128_v54  ;;  %v3079_v54 = vrot.slane %v3077_v7, 4 }
 0x1e0   : > { %1964 = vmatmul.bf16.gmra.mxu1 %v6203_v14  ;;  %2344 = vmatmul.bf16.gmra.mxu2 %v2212_v45  ;;  %v7981_v15 = vadd.f32 %v3297_v52, %v2689_v16  ;;  %v2131_v14 = vsel %vm7762_vm14, %v2129_v31, %v2130_v33  ;;  %v3060_v45 = vrot.slane %v3059_v35, 4  ;;  %v3086_v31 = vshll.u32 %v2756_v13, 16  ;;  %v6204_v35 = vld [vmem:[#allocation2 + $0x90] sm:$0xff] }
 0x1e1   : > { %2658 = vmatmul.bf16.gmra.mxu3 %v6243_v57  ;;  %v3070_v57 = vrot.slane %v3069_v1, 4  ;;  %v2194_v51 = vunpack.c.l.b16 %v2131_v14  ;;  %v3082_v14 = vrot.slane %v3080_v3, 5 }
 0x1e2   : > { %v3065_v16 = vsel %vm7548_vm11, %v3060_v45, %v3064_v28  ;;  %v7994_v45 = vrot.slane %v3086_v31, 5 }
 0x1e3   : > { %v3300_v53 = vpop.f32.mrf.mxu0  ;;  %v2305_v21 = vpop.f32.mrf.mxu2  ;;  %v3075_v47 = vsel %vm7548_vm11, %v3070_v57, %v3074_v8  ;;  %v3083_v7 = vor.u32 %v3082_v14, %v3079_v54 }
 0x1e4   : > { %v2376_v49 = vadd.f32 %v2305_v21, %v1926_v22  ;;  %v2619_v61 = vpop.f32.mrf.mxu3  ;;  %v3189_v28 = vunpack.c.l.b16 %v3075_v47 }
 0x1e5   : > { %v1927_v62 = vpop.f32.mrf.mxu1 }
 0x1e6   : > { %3339 = vmatmul.bf16.gmra.mxu0 %v3207_v40  ;;  %v2690_v18 = vadd.f32 %v2619_v61, %v2376_v49  ;;  %v1928_v52 = vadd.f32 %v1927_v62, %v7924_v6  ;;  %v3090_v6 = vshrl.u32 %v2756_v13, 16  ;;  %v2213_v40 = vpack.c.b16 %v2194_v51, %v2193_v59  ;;  %v2003_v62 = vld [vmem:[#allocation2 + $0x9c] sm:$0xe]  ;;  %v6612_v59 = vld [vmem:[#allocation2 + $0xa4] sm:$0x1] }
 0x1e7   : > { %v3188_v61 = vunpack.c.l.b16 %v3065_v16  ;;  %v5797_v57 = vrot.slane %v2003_v62, 9  ;;  %v2137_v51 = vrot.slane %v6612_v59, 5 }
 0x1e8   : > { %v7988_v56 = vadd.f32 %v3300_v53, %v2690_v18  ;;  %v6611_v53 = vld [vmem:[#allocation2 + $0xa0] sm:$0xf]  ;;  %v3092_v18 = vrot.slane %v3090_v6, 4 }
 0x1e9   : > { %v2134_v21 = vrot.slane %v6611_v53, 5  ;;  %v3208_v16 = vpack.c.b16 %v3189_v28, %v3188_v61  ;;  %v6288_v6 = vld [vmem:[%s7220_s29 + $0x180] sm:$0xff]  ;;  %v3084_v61 = vrot.slane %v3083_v7, 4 }
 0x1ea   : > { %v3093_v3 = vor.u32 %v3092_v18, %v7994_v45  ;;  %4022 = vmatpush.bf16.msra.mxu2 %v6288_v6  ;;  %v6296_v53 = vld [vmem:[%s7220_s29 + $0x1c0] sm:$0xff] }
 0x1eb   : > { %v3302_v22 = vpop.f32.mrf.mxu0  ;;  %v2307_v50 = vpop.f32.mrf.mxu2  ;;  %v2136_v8 = vrot.slane %v2134_v21, 4  ;;  %4703 = vmatpush.bf16.msra.mxu3 %v6296_v53  ;;  %v6304_v7 = vld [vmem:[%s7220_s29 + $0x200] sm:$0xff] }
 0x1ec   : > { %v2377_v4 = vadd.f32 %v2307_v50, %v1928_v52  ;;  %v2621_v33 = vpop.f32.mrf.mxu3  ;;  %v2757_v52 = vld [vmem:[#allocation2 + $0xb0] sm:$0x1]  ;;  %v3094_v28 = vrot.slane %v3093_v3, 4  ;;  %5128 = vmatpush.bf16.msra.mxu0 %v6304_v7 }
 0x1ed   : > { %v1930_v1 = vpop.f32.mrf.mxu1  ;;  %v3096_v31 = vshll.u32 %v2757_v52, 16 }
 0x1ee   : > { %v2691_v49 = vadd.f32 %v2621_v33, %v2377_v4  ;;  %v1931_v13 = vadd.f32 %v1930_v1, %v7826_v60  ;;  %v2758_v60 = vld [vmem:[#allocation2 + $0xb4] sm:$0xf] }
 0x1ef   : > { %v3098_v62 = vrot.slane %v3096_v31, 5  ;;  %v3104_v52 = vshll.u32 %v2758_v60, 16 }
 0x1f0   : > { %1969 = vmatmul.bf16.gmra.mxu1 %v6204_v35  ;;  %2349 = vmatmul.bf16.gmra.mxu2 %v2213_v40  ;;  %v7996_v29 = vadd.f32 %v3302_v22, %v2691_v49  ;;  %v2135_v40 = vsel %vm7762_vm14, %v5797_v57, %v2134_v21  ;;  %v2138_v22 = vsel %vm7762_vm14, %v2136_v8, %v2137_v51  ;;  %v6264_v49 = vld [vmem:[%s7220_s29 + $0x140] sm:$0xff]  ;;  %v3101_v21 = vshrl.u32 %v2758_v60, 16  ;;  %v2004_v60 = vld [vmem:[#allocation2 + $0xa8] sm:$0xe]  ;;  %s5436_s29 = sshll.u32 %s7230_s12, 4  ;;  %s8521_s29 = int_to_ptr.vmem [resolvable:$true] %s5436_s29 }
 0x1f1   : > { %2663 = vmatmul.bf16.gmra.mxu3 %v6244_v37  ;;  %v2759_v37 = vld [vmem:[#allocation2 + $0xb8] sm:$0xf]  ;;  %v2195_v54 = vunpack.c.l.b16 %v2135_v40  ;;  %v2196_v14 = vunpack.c.l.b16 %v2138_v22  ;;  %3708 = vmatpush.bf16.msra.mxu1 %v6264_v49 }
 0x1f2   : > { %v3110_v57 = vshll.u32 %v2759_v37, 16  ;;  %v3114_v8 = vshrl.u32 %v2759_v37, 16 }
 0x1f3   : > { %v3305_v47 = vpop.f32.mrf.mxu0  ;;  %v2310_v50 = vpop.f32.mrf.mxu2  ;;  %v2214_v6 = vpack.c.b16 %v2196_v14, %v2195_v54 }
 0x1f4   : > { %v2378_v4 = vadd.f32 %v2310_v50, %v1931_v13  ;;  %v2624_v33 = vpop.f32.mrf.mxu3  ;;  %v3099_v50 = vsel %vm7548_vm11, %v3094_v28, %v3098_v62  ;;  %v3116_v37 = vrot.slane %v3114_v8, 4  ;;  %v5798_v28 = vrot.slane %v2004_v60, 9  ;;  %v6615_v60 = vld [vmem:[#allocation2 + $0x10] sm:$0xf] }
 0x1f5   : > { %v1932_v35 = vpop.f32.mrf.mxu1  ;;  %v3191_v49 = vunpack.c.l.b16 %v3099_v50 }
 0x1f6   : > { %3344 = vmatmul.bf16.gmra.mxu0 %v3208_v16  ;;  %v2692_v1 = vadd.f32 %v2624_v33, %v2378_v4  ;;  %v1933_v59 = vadd.f32 %v1932_v35, %v7837_v25  ;;  %v3089_v16 = vsel %vm7548_vm11, %v3084_v61, %v7994_v45  ;;  %v6245_v4 = vld [vmem:[#allocation2 + $0xa8] sm:$0xff]  ;;  %v3103_v25 = vrot.slane %v3101_v21, 4  ;;  %v2760_v61 = vld [vmem:[#allocation2 + $0xbc] sm:$0x1] }
 0x1f7   : > { %v6613_v33 = vld [vmem:[#allocation2 + $0xac] sm:$0xf]  ;;  %v3106_v35 = vrot.slane %v3104_v52, 5  ;;  %v3190_v45 = vunpack.c.l.b16 %v3089_v16 }
 0x1f8   : > { %v8007_v18 = vadd.f32 %v3305_v47, %v2692_v1  ;;  %v6205_v47 = vld [vmem:[#allocation2 + $0x9c] sm:$0xff]  ;;  %v2141_v40 = vrot.slane %v6613_v33, 5  ;;  %v3112_v1 = vrot.slane %v3110_v57, 5  ;;  %v3120_v33 = vshll.u32 %v2760_v61, 16 }
 0x1f9   : > { %v3107_v14 = vor.u32 %v3106_v35, %v3103_v25  ;;  %v3209_v52 = vpack.c.b16 %v3191_v49, %v3190_v45  ;;  %v3463_v25 = vrot.slane %v6615_v60, 5 }
 0x1fa   : > { %8705 = vst [vmem:[#allocation27_spill] sm:$0xff] %v8007_v18  ;;  %v2143_v62 = vrot.slane %v2141_v40, 4  ;;  %v2142_v7 = vsel %vm7762_vm14, %v5798_v28, %v2141_v40 }
 0x1fb   : > { %v3307_v51 = vpop.f32.mrf.mxu0  ;;  %v2312_v13 = vpop.f32.mrf.mxu2  ;;  %v2197_v35 = vunpack.c.l.b16 %v2142_v7 }
 0x1fc   : > { %v2379_v3 = vadd.f32 %v2312_v13, %v1933_v59  ;;  %v2626_v31 = vpop.f32.mrf.mxu3  ;;  %v6614_v59 = vld [vmem:[#allocation2 + $0xb0] sm:$0x1]  ;;  %v3117_v13 = vor.u32 %v3116_v37, %v3112_v1 }
 0x1fd   : > { %v1935_v22 = vpop.f32.mrf.mxu1  ;;  %v2144_v54 = vrot.slane %v6614_v59, 5  ;;  %v3465_v59 = vrot.slane %v3463_v25, 4 }
 0x1fe   : > { %v2693_v53 = vadd.f32 %v2626_v31, %v2379_v3  ;;  %v1936_v21 = vadd.f32 %v1935_v22, %v7854_v43  ;;  %v2761_v43 = vld [vmem:[#allocation2 + $0xc0] sm:$0xf]  ;;  %v2762_v22 = vld [vmem:[#allocation2 + $0xc4] sm:$0xf] }
 0x1ff   : > { %v2145_v31 = vsel %vm7762_vm14, %v2143_v62, %v2144_v54  ;;  %v3125_v61 = vshrl.u32 %v2761_v43, 16  ;;  %v3128_v28 = vshll.u32 %v2761_v43, 16  ;;  %v3134_v62 = vshll.u32 %v2762_v22, 16  ;;  %v6616_v54 = vld [vmem:[#allocation2 + $0x14] sm:$0x1] }
 0x200   : > { %1974 = vmatmul.bf16.gmra.mxu1 %v6205_v47  ;;  %2354 = vmatmul.bf16.gmra.mxu2 %v2214_v6  ;;  %v8016_v18 = vadd.f32 %v3307_v51, %v2693_v53  ;;  %v3108_v47 = vrot.slane %v3107_v14, 4  ;;  %v3118_v6 = vrot.slane %v3117_v13, 4  ;;  %v2198_v37 = vunpack.c.l.b16 %v2145_v31  ;;  %v3397_v31 = vld [vmem:[#allocation2 + $0xc] sm:$0xe] }
 0x201   : > { %2668 = vmatmul.bf16.gmra.mxu3 %v6245_v4  ;;  %v3122_v4 = vrot.slane %v3120_v33, 5  ;;  %v3466_v14 = vrot.slane %v6616_v54, 5  ;;  %v3127_v60 = vrot.slane %v3125_v61, 4  ;;  %v3130_v43 = vrot.slane %v3128_v28, 5 }
 0x202   : > { %8706 = vst [vmem:[#allocation28_spill] sm:$0xff] %v8016_v18  ;;  %v3113_v40 = vsel %vm7548_vm11, %v3108_v47, %v3112_v1  ;;  %v6617_v1 = vld [vmem:[#allocation2 + $0xb8] sm:$0xf]  ;;  %v3136_v54 = vrot.slane %v3134_v62, 5 }
 0x203   : > { %v3310_v57 = vpop.f32.mrf.mxu0  ;;  %v2315_v8 = vpop.f32.mrf.mxu2  ;;  %v3123_v45 = vsel %vm7548_vm11, %v3118_v6, %v3122_v4  ;;  %v2148_v7 = vrot.slane %v6617_v1, 5  ;;  %v6246_v6 = vld [vmem:[#allocation2 + $0xb4] sm:$0xff]  ;;  %v5960_v4 = vrot.slane %v3397_v31, 9 }
 0x204   : > { %v2380_v16 = vadd.f32 %v2315_v8, %v1936_v21  ;;  %v2629_v50 = vpop.f32.mrf.mxu3  ;;  %v3138_v21 = vshrl.u32 %v2762_v22, 16  ;;  %v6206_v8 = vld [vmem:[#allocation2 + $0xa8] sm:$0xff] }
 0x205   : > { %v1937_v3 = vpop.f32.mrf.mxu1  ;;  %v3464_v22 = vsel %vm7762_vm14, %v5960_v4, %v3463_v25  ;;  %v4136_v25 = vld [vmem:[#allocation2 + $0x18] sm:$0xf] }
 0x206   : > { %3349 = vmatmul.bf16.gmra.mxu0 %v3209_v52  ;;  %v2694_v51 = vadd.f32 %v2629_v50, %v2380_v16  ;;  %v1938_v49 = vadd.f32 %v1937_v3, %v7862_v12  ;;  %v2215_v16 = vpack.c.b16 %v2198_v37, %v2197_v35  ;;  %v2005_v50 = vld [vmem:[#allocation2 + $0xb4] sm:$0xe]  ;;  %v3192_v12 = vunpack.c.l.b16 %v3113_v40  ;;  %v2763_v40 = vld [vmem:[#allocation2 + $0xc8] sm:$0x1] }
 0x207   : > { %v3193_v3 = vunpack.c.l.b16 %v3123_v45  ;;  %v3140_v18 = vrot.slane %v3138_v21, 4  ;;  %v3467_v35 = vsel %vm7762_vm14, %v3465_v59, %v3466_v14  ;;  %v2150_v37 = vrot.slane %v2148_v7, 4 }
 0x208   : > { %v8023_v53 = vadd.f32 %v3310_v57, %v2694_v51  ;;  %v3589_v45 = vunpack.c.l.b16 %v3464_v22  ;;  %v3590_v1 = vunpack.c.l.b16 %v3467_v35 }
 0x209   : > { %v3210_v62 = vpack.c.b16 %v3193_v3, %v3192_v12  ;;  %v4188_v12 = vshll.u32 %v4136_v25, 16 }
 0x20a   : > { %8707 = vst [vmem:[#allocation29_spill] sm:$0xff] %v8023_v53  ;;  %v5799_v53 = vrot.slane %v2005_v50, 9  ;;  %v8037_v21 = vpack.c.b16 %v3590_v1, %v3589_v45  ;;  %v4138_v45 = vld [vmem:[#allocation2 + $0x20] sm:$0x1] }
 0x20b   : > { %v3312_v13 = vpop.f32.mrf.mxu0  ;;  %v2317_v33 = vpop.f32.mrf.mxu2 }
 0x20c   : > { %v2381_v52 = vadd.f32 %v2317_v33, %v1938_v49  ;;  %v2631_v57 = vpop.f32.mrf.mxu3  ;;  %v6618_v49 = vld [vmem:[#allocation2 + $0xbc] sm:$0x1] }
 0x20d   : > { %v1940_v47 = vpop.f32.mrf.mxu1  ;;  %v2151_v33 = vrot.slane %v6618_v49, 5 }
 0x20e   : > { %v2695_v51 = vadd.f32 %v2631_v57, %v2381_v52  ;;  %v1941_v28 = vadd.f32 %v1940_v47, %v7878_v27  ;;  %v8039_v52 = vld [vmem:[#allocation2 + $0x1c] sm:$0xf]  ;;  %v3131_v57 = vor.u32 %v3130_v43, %v3127_v60  ;;  %v4185_v47 = vshrl.u32 %v4136_v25, 16 }
 0x20f   : > { %v4194_v3 = vshll.u32 %v8039_v52, 16  ;;  %v4198_v4 = vshrl.u32 %v8039_v52, 16 }
 0x210   : > { %1979 = vmatmul.bf16.gmra.mxu1 %v6206_v8  ;;  %2359 = vmatmul.bf16.gmra.mxu2 %v2215_v16  ;;  %v8034_v61 = vadd.f32 %v3312_v13, %v2695_v51  ;;  %v3141_v8 = vor.u32 %v3140_v18, %v3136_v54  ;;  %v3144_v16 = vshll.u32 %v2763_v40, 16  ;;  %v2152_v13 = vsel %vm7762_vm14, %v2150_v37, %v2151_v33 }
 0x211   : > { %2673 = vmatmul.bf16.gmra.mxu3 %v6246_v6  ;;  %v2149_v6 = vsel %vm7762_vm14, %v5799_v53, %v2148_v7  ;;  %v3132_v60 = vrot.slane %v3131_v57, 4  ;;  %v2200_v35 = vunpack.c.l.b16 %v2152_v13  ;;  %v4187_v53 = vrot.slane %v4185_v47, 4 }
 0x212   : > { %v3142_v18 = vrot.slane %v3141_v8, 4  ;;  %v3146_v43 = vrot.slane %v3144_v16, 5  ;;  %v2199_v22 = vunpack.c.l.b16 %v2149_v6  ;;  %v4190_v7 = vrot.slane %v4188_v12, 5  ;;  %v6207_v8 = vld [vmem:[#allocation2 + $0xb4] sm:$0xff] }
 0x213   : > { %v3315_v59 = vpop.f32.mrf.mxu0  ;;  %v2320_v14 = vpop.f32.mrf.mxu2  ;;  %v4196_v40 = vrot.slane %v4194_v3, 5  ;;  %v4200_v37 = vrot.slane %v4198_v4, 4  ;;  %v4204_v13 = vshll.u32 %v4138_v45, 16 }
 0x214   : > { %v2382_v50 = vadd.f32 %v2320_v14, %v1941_v28  ;;  %v2634_v31 = vpop.f32.mrf.mxu3  ;;  %v3147_v25 = vsel %vm7548_vm11, %v3142_v18, %v3146_v43  ;;  %v4139_v18 = vld [vmem:[#allocation2 + $0x24] sm:$0xf] }
 0x215   : > { %v1942_v27 = vpop.f32.mrf.mxu1  ;;  %v4201_v6 = vor.u32 %v4200_v37, %v4196_v40  ;;  %v4206_v3 = vrot.slane %v4204_v13, 5 }
 0x216   : > { %3354 = vmatmul.bf16.gmra.mxu0 %v3210_v62  ;;  %v2696_v51 = vadd.f32 %v2634_v31, %v2382_v50  ;;  %v1943_v33 = vadd.f32 %v1942_v27, %v7889_v5  ;;  %v3137_v62 = vsel %vm7548_vm11, %v3132_v60, %v3136_v54  ;;  %v6247_v50 = vld [vmem:[#allocation2 + $0xc0] sm:$0xff]  ;;  %v4191_v31 = vor.u32 %v4190_v7, %v4187_v53  ;;  %v8058_v7 = vld [vmem:[#allocation2 + $0x28] sm:$0xf] }
 0x217   : > { %v3194_v5 = vunpack.c.l.b16 %v3137_v62  ;;  %v3195_v27 = vunpack.c.l.b16 %v3147_v25  ;;  %v4202_v54 = vrot.slane %v4201_v6, 4  ;;  %v4883_v53 = vrot.slane %v8039_v52, 5 }
 0x218   : > { %v8047_v49 = vadd.f32 %v3315_v59, %v2696_v51  ;;  %v2216_v59 = vpack.c.b16 %v2200_v35, %v2199_v22  ;;  %v4192_v12 = vrot.slane %v4191_v31, 4  ;;  %v4817_v35 = vld [vmem:[#allocation2 + $0x18] sm:$0xe]  ;;  %v4209_v25 = vshrl.u32 %v4139_v18, 16 }
 0x219   : > { %v3211_v60 = vpack.c.b16 %v3195_v27, %v3194_v5  ;;  %v4222_v52 = vshrl.u32 %v8058_v7, 16 }
 0x21a   : > { %v4197_v62 = vsel %vm7548_vm11, %v4192_v12, %v4196_v40  ;;  %v4211_v13 = vrot.slane %v4209_v25, 4 }
 0x21b   : > { %v3317_v1 = vpop.f32.mrf.mxu0  ;;  %v2322_v28 = vpop.f32.mrf.mxu2  ;;  %v4584_v31 = vunpack.c.l.b16 %v4197_v62  ;;  %v4224_v12 = vrot.slane %v4222_v52, 4 }
 0x21c   : > { %v2383_v14 = vadd.f32 %v2322_v28, %v1943_v33  ;;  %v2636_v57 = vpop.f32.mrf.mxu3 }
 0x21d   : > { %v1945_v16 = vpop.f32.mrf.mxu1 }
 0x21e   : > { %v2697_v47 = vadd.f32 %v2636_v57, %v2383_v14  ;;  %v1946_v51 = vadd.f32 %v1945_v16, %v7908_v58  ;;  %v4212_v58 = vshll.u32 %v4139_v18, 16  ;;  %v6136_v57 = vrot.slane %v4817_v35, 9 }
 0x21f   : > { %v4886_v16 = vrot.slane %v4138_v45, 5 }
 0x220   : > { %1984 = vmatmul.bf16.gmra.mxu1 %v6207_v8  ;;  %2364 = vmatmul.bf16.gmra.mxu2 %v2216_v59  ;;  %v8054_v4 = vadd.f32 %v3317_v1, %v2697_v47  ;;  %v4207_v1 = vsel %vm7548_vm11, %v4202_v54, %v4206_v3  ;;  %v4218_v8 = vshll.u32 %v8058_v7, 16  ;;  %v4885_v59 = vrot.slane %v4883_v53, 4 }
 0x221   : > { %2678 = vmatmul.bf16.gmra.mxu3 %v6247_v50  ;;  %v4585_v6 = vunpack.c.l.b16 %v4207_v1  ;;  %v4214_v40 = vrot.slane %v4212_v58, 5  ;;  %v4884_v5 = vsel %vm7762_vm14, %v6136_v57, %v4883_v53 }
 0x222   : > { %v4220_v27 = vrot.slane %v4218_v8, 5  ;;  %v6620_v8 = vld [vmem:[#allocation2 + $0x20] sm:$0x1] }
 0x223   : > { %v3320_v43 = vpop.f32.mrf.mxu0  ;;  %v2325_v22 = vpop.f32.mrf.mxu2  ;;  %v4215_v62 = vor.u32 %v4214_v40, %v4211_v13  ;;  %v3473_v52 = vrot.slane %v6620_v8, 5 }
 0x224   : > { %v2384_v37 = vadd.f32 %v2325_v22, %v1946_v51  ;;  %v2639_v33 = vpop.f32.mrf.mxu3  ;;  %v4887_v51 = vsel %vm7762_vm14, %v4885_v59, %v4886_v16  ;;  %v6619_v22 = vld [vmem:[#allocation2 + $0x1c] sm:$0xf]  ;;  %v4225_v25 = vor.u32 %v4224_v12, %v4220_v27 }
 0x225   : > { %v1947_v28 = vpop.f32.mrf.mxu1  ;;  %v3470_v35 = vrot.slane %v6619_v22, 5  ;;  %v5010_v1 = vunpack.c.l.b16 %v4887_v51  ;;  %v4216_v59 = vrot.slane %v4215_v62, 4  ;;  %v8081_v51 = vld [vmem:[#allocation2 + $0x34] sm:$0xf] }
 0x226   : > { %3359 = vmatmul.bf16.gmra.mxu0 %v3211_v60  ;;  %v2698_v14 = vadd.f32 %v2639_v33, %v2384_v37  ;;  %v1948_v47 = vadd.f32 %v1947_v28, %v7916_v9  ;;  %v8073_v60 = vld [vmem:[#allocation2 + $0x2c] sm:$0x1]  ;;  %v4616_v33 = vpack.c.b16 %v4585_v6, %v4584_v31  ;;  %v5009_v9 = vunpack.c.l.b16 %v4884_v5  ;;  %v3398_v28 = vld [vmem:[#allocation2 + $0x18] sm:$0xe]  ;;  %v4142_v5 = vld [vmem:[#allocation2 + $0x30] sm:$0xf] }
 0x227   : > { %v4228_v58 = vshll.u32 %v8073_v60, 16  ;;  %v3472_v57 = vrot.slane %v3470_v35, 4  ;;  %v4226_v13 = vrot.slane %v4225_v25, 4  ;;  %v4221_v22 = vsel %vm7548_vm11, %v4216_v59, %v4220_v27 }
 0x228   : > { %v8066_v50 = vadd.f32 %v3320_v43, %v2698_v14  ;;  %v6272_v43 = vld [vmem:[#allocation2 + $0x18] sm:$0xff]  ;;  %v5961_v14 = vrot.slane %v3398_v28, 9  ;;  %v5041_v6 = vpack.c.b16 %v5010_v1, %v5009_v9  ;;  %v4236_v9 = vshll.u32 %v4142_v5, 16 }
 0x229   : > { %v4230_v40 = vrot.slane %v4228_v58, 5  ;;  %v4242_v62 = vshll.u32 %v8081_v51, 16  ;;  %v4893_v1 = vrot.slane %v8073_v60, 5  ;;  %v4586_v27 = vunpack.c.l.b16 %v4221_v22 }
 0x22b   : > { %v3322_v54 = vpop.f32.mrf.mxu0  ;;  %v2327_v3 = vpop.f32.mrf.mxu2 }
 0x22c   : > { %v2385_v45 = vadd.f32 %v2327_v3, %v1948_v47  ;;  %v2641_v18 = vpop.f32.mrf.mxu3  ;;  %v4818_v47 = vld [vmem:[#allocation2 + $0x24] sm:$0xe] }
 0x22d   : > { %v1950_v37 = vpop.f32.mrf.mxu1 }
 0x22e   : > { %v2699_v53 = vadd.f32 %v2641_v18, %v2385_v45  ;;  %v1951_v31 = vadd.f32 %v1950_v37, %v7831_v17  ;;  %v6137_v37 = vrot.slane %v4818_v47, 9 }
 0x230   : > { %3709 = vmatmul.bf16.vlgmr.msra.gmra.mxu1 %v8037_v21  ;;  %4023 = vmatmul.bf16.vlgmr.msra.gmra.mxu2 %v6272_v43  ;;  %v8077_v16 = vadd.f32 %v3322_v54, %v2699_v53  ;;  %v4890_v21 = vrot.slane %v8058_v7, 5  ;;  %v3471_v43 = vsel %vm7762_vm14, %v5961_v14, %v3470_v35  ;;  %v3474_v54 = vsel %vm7762_vm14, %v3472_v57, %v3473_v52 }
 0x231   : > { %4704 = vmatmul.bf16.vlgmr.msra.gmra.mxu3 %v4616_v33  ;;  %v4233_v33 = vshrl.u32 %v4142_v5, 16  ;;  %v4231_v7 = vsel %vm7548_vm11, %v4226_v13, %v4230_v40  ;;  %v4246_v53 = vshrl.u32 %v8081_v51, 16  ;;  %v3591_v25 = vunpack.c.l.b16 %v3471_v43  ;;  %v8101_v5 = vld [vmem:[#allocation2 + $0x38] sm:$0x1]  ;;  %v6621_v43 = vld [vmem:[#allocation2 + $0x28] sm:$0xf] }
 0x232   : > { %v4892_v35 = vrot.slane %v4890_v21, 4  ;;  %v3592_v58 = vunpack.c.l.b16 %v3474_v54  ;;  %v4587_v57 = vunpack.c.l.b16 %v4231_v7  ;;  %v4238_v52 = vrot.slane %v4236_v9, 5 }
 0x233   : > { %v3325_v12 = vpop.f32.mrf.mxu0  ;;  %v2330_v3 = vpop.f32.mrf.mxu2  ;;  %v4235_v8 = vrot.slane %v4233_v33, 4  ;;  %v4248_v13 = vrot.slane %v4246_v53, 4  ;;  %v3477_v54 = vrot.slane %v6621_v43, 5  ;;  %v3399_v33 = vld [vmem:[#allocation2 + $0x24] sm:$0xe]  ;;  %v4252_v7 = vshll.u32 %v8101_v5, 16 }
 0x234   : > { %v2386_v45 = vadd.f32 %v2330_v3, %v1951_v31  ;;  %v2644_v18 = vpop.f32.mrf.mxu3  ;;  %v4891_v31 = vsel %vm7762_vm14, %v6137_v37, %v4890_v21  ;;  %v4894_v60 = vsel %vm7762_vm14, %v4892_v35, %v4893_v1  ;;  %v6622_v35 = vld [vmem:[#allocation2 + $0x2c] sm:$0x1] }
 0x235   : > { %v1952_v17 = vpop.f32.mrf.mxu1  ;;  %v4239_v21 = vor.u32 %v4238_v52, %v4235_v8  ;;  %v5012_v9 = vunpack.c.l.b16 %v4894_v60  ;;  %v3479_v53 = vrot.slane %v3477_v54, 4  ;;  %v3480_v1 = vrot.slane %v6622_v35, 5  ;;  %v4819_v52 = vld [vmem:[#allocation2 + $0x30] sm:$0xe] }
 0x236   : > { %5129 = vmatmul.bf16.vlgmr.msra.gmra.mxu0 %v5041_v6  ;;  %v2700_v28 = vadd.f32 %v2644_v18, %v2386_v45  ;;  %v1953_v59 = vadd.f32 %v1952_v17, %v7850_v38  ;;  %v4244_v6 = vrot.slane %v4242_v62, 5  ;;  %v3622_v45 = vpack.c.b16 %v3592_v58, %v3591_v25  ;;  %v6273_v18 = vld [vmem:[#allocation2 + $0x24] sm:$0xff] }
 0x237   : > { %v4617_v38 = vpack.c.b16 %v4587_v57, %v4586_v27  ;;  %v5011_v17 = vunpack.c.l.b16 %v4891_v31  ;;  %v5962_v62 = vrot.slane %v3399_v33, 9  ;;  %v4240_v25 = vrot.slane %v4239_v21, 4  ;;  %v4145_v31 = vld [vmem:[#allocation2 + $0x3c] sm:$0xf] }
 0x238   : > { %v8094_v14 = vadd.f32 %v3325_v12, %v2700_v28  ;;  %v4249_v28 = vor.u32 %v4248_v13, %v4244_v6  ;;  %v4254_v8 = vrot.slane %v4252_v7, 5  ;;  %v4897_v60 = vrot.slane %v8081_v51, 5 }
 0x239   : > { %v5042_v57 = vpack.c.b16 %v5012_v9, %v5011_v17  ;;  %v4245_v43 = vsel %vm7548_vm11, %v4240_v25, %v4244_v6  ;;  %v4260_v17 = vshll.u32 %v4145_v31, 16  ;;  %v4900_v9 = vrot.slane %v8101_v5, 5 }
 0x23a   : > { %v4588_v6 = vunpack.c.l.b16 %v4245_v43 }
 0x23b   : > { %v3327_v40 = vpop.f32.mrf.mxu0  ;;  %v2332_v47 = vpop.f32.mrf.mxu2 }
 0x23c   : > { %v2387_v12 = vadd.f32 %v2332_v47, %v1953_v59  ;;  %v2646_v3 = vpop.f32.mrf.mxu3  ;;  %v4250_v59 = vrot.slane %v4249_v28, 4 }
 0x23d   : > { %v1955_v22 = vpop.f32.mrf.mxu1 }
 0x23e   : > { %v2701_v37 = vadd.f32 %v2646_v3, %v2387_v12  ;;  %v1956_v27 = vadd.f32 %v1955_v22, %v7858_v10  ;;  %v8108_v12 = vld [vmem:[#allocation2 + $0x40] sm:$0xf]  ;;  %v6138_v22 = vrot.slane %v4819_v52, 9  ;;  %v4255_v51 = vsel %vm7548_vm11, %v4250_v59, %v4254_v8 }
 0x23f   : > { %v4266_v21 = vshll.u32 %v8108_v12, 16 }
 0x240   : > { %3714 = vmatmul.bf16.gmra.mxu1 %v3622_v45  ;;  %4028 = vmatmul.bf16.gmra.mxu2 %v6273_v18  ;;  %v8104_v58 = vadd.f32 %v3327_v40, %v2701_v37  ;;  %v3478_v18 = vsel %vm7762_vm14, %v5962_v62, %v3477_v54  ;;  %v3481_v40 = vsel %vm7762_vm14, %v3479_v53, %v3480_v1  ;;  %v4270_v37 = vshrl.u32 %v8108_v12, 16 }
 0x241   : > { %4709 = vmatmul.bf16.gmra.mxu3 %v4617_v38  ;;  %v4257_v38 = vshrl.u32 %v4145_v31, 16  ;;  %v4899_v54 = vrot.slane %v4897_v60, 4  ;;  %v3593_v28 = vunpack.c.l.b16 %v3478_v18  ;;  %v3594_v7 = vunpack.c.l.b16 %v3481_v40  ;;  %v8128_v31 = vld [vmem:[#allocation2 + $0x44] sm:$0x1]  ;;  %v6623_v18 = vld [vmem:[#allocation2 + $0x34] sm:$0xf] }
 0x242   : > { %v4589_v53 = vunpack.c.l.b16 %v4255_v51  ;;  %v4262_v1 = vrot.slane %v4260_v17, 5  ;;  %v4272_v59 = vrot.slane %v4270_v37, 4  ;;  %v3484_v40 = vrot.slane %v6623_v18, 5 }
 0x243   : > { %v3330_v13 = vpop.f32.mrf.mxu0  ;;  %v2335_v47 = vpop.f32.mrf.mxu2  ;;  %v4259_v35 = vrot.slane %v4257_v38, 4  ;;  %v4901_v5 = vsel %vm7762_vm14, %v4899_v54, %v4900_v9  ;;  %v3400_v38 = vld [vmem:[#allocation2 + $0x30] sm:$0xe]  ;;  %v4276_v51 = vshll.u32 %v8128_v31, 16  ;;  %v6624_v54 = vld [vmem:[#allocation2 + $0x38] sm:$0x1] }
 0x244   : > { %v2388_v3 = vadd.f32 %v2335_v47, %v1956_v27  ;;  %v2649_v45 = vpop.f32.mrf.mxu3  ;;  %v4898_v27 = vsel %vm7762_vm14, %v6138_v22, %v4897_v60  ;;  %v5014_v17 = vunpack.c.l.b16 %v4901_v5  ;;  %v3486_v37 = vrot.slane %v3484_v40, 4 }
 0x245   : > { %v1957_v10 = vpop.f32.mrf.mxu1  ;;  %v4263_v60 = vor.u32 %v4262_v1, %v4259_v35  ;;  %v3487_v9 = vrot.slane %v6624_v54, 5  ;;  %v4278_v35 = vrot.slane %v4276_v51, 5  ;;  %v4820_v1 = vld [vmem:[#allocation2 + $0x3c] sm:$0xe]  ;;  %v4904_v5 = vrot.slane %v8108_v12, 5 }
 0x246   : > { %5134 = vmatmul.bf16.gmra.mxu0 %v5042_v57  ;;  %v2702_v33 = vadd.f32 %v2649_v45, %v2388_v3  ;;  %v1958_v25 = vadd.f32 %v1957_v10, %v7874_v23  ;;  %v4268_v57 = vrot.slane %v4266_v21, 5  ;;  %v3623_v3 = vpack.c.b16 %v3594_v7, %v3593_v28  ;;  %v6274_v45 = vld [vmem:[#allocation2 + $0x30] sm:$0xff] }
 0x247   : > { %v4618_v23 = vpack.c.b16 %v4589_v53, %v4588_v6  ;;  %v5013_v10 = vunpack.c.l.b16 %v4898_v27  ;;  %v5963_v21 = vrot.slane %v3400_v38, 9  ;;  %v4264_v28 = vrot.slane %v4263_v60, 4  ;;  %v4148_v27 = vld [vmem:[#allocation2 + $0x48] sm:$0xf] }
 0x248   : > { %v8121_v62 = vadd.f32 %v3330_v13, %v2702_v33  ;;  %v4273_v33 = vor.u32 %v4272_v59, %v4268_v57 }
 0x249   : > { %v5043_v53 = vpack.c.b16 %v5014_v17, %v5013_v10  ;;  %v4269_v18 = vsel %vm7548_vm11, %v4264_v28, %v4268_v57  ;;  %v4284_v10 = vshll.u32 %v4148_v27, 16  ;;  %v4907_v17 = vrot.slane %v8128_v31, 5 }
 0x24a   : > { %v4590_v57 = vunpack.c.l.b16 %v4269_v18 }
 0x24b   : > { %v3332_v8 = vpop.f32.mrf.mxu0  ;;  %v2337_v52 = vpop.f32.mrf.mxu2 }
 0x24c   : > { %v2389_v13 = vadd.f32 %v2337_v52, %v1958_v25  ;;  %v2651_v47 = vpop.f32.mrf.mxu3  ;;  %v4274_v25 = vrot.slane %v4273_v33, 4 }
 0x24d   : > { %v1960_v43 = vpop.f32.mrf.mxu1 }
 0x24e   : > { %v2703_v22 = vadd.f32 %v2651_v47, %v2389_v13  ;;  %v1961_v6 = vadd.f32 %v1960_v43, %v7884_v55  ;;  %v8135_v13 = vld [vmem:[#allocation2 + $0x4c] sm:$0xf]  ;;  %v6139_v43 = vrot.slane %v4820_v1, 9  ;;  %v4279_v12 = vsel %vm7548_vm11, %v4274_v25, %v4278_v35 }
 0x24f   : > { %v4290_v60 = vshll.u32 %v8135_v13, 16 }
 0x250   : > { %3719 = vmatmul.bf16.gmra.mxu1 %v3623_v3  ;;  %4033 = vmatmul.bf16.gmra.mxu2 %v6274_v45  ;;  %v8131_v7 = vadd.f32 %v3332_v8, %v2703_v22  ;;  %v3485_v45 = vsel %vm7762_vm14, %v5963_v21, %v3484_v40  ;;  %v3488_v8 = vsel %vm7762_vm14, %v3486_v37, %v3487_v9  ;;  %v4294_v22 = vshrl.u32 %v8135_v13, 16 }
 0x251   : > { %4714 = vmatmul.bf16.gmra.mxu3 %v4618_v23  ;;  %v4281_v23 = vshrl.u32 %v4148_v27, 16  ;;  %v4906_v40 = vrot.slane %v4904_v5, 4  ;;  %v3595_v33 = vunpack.c.l.b16 %v3485_v45  ;;  %v3596_v51 = vunpack.c.l.b16 %v3488_v8  ;;  %v8155_v27 = vld [vmem:[#allocation2 + $0x50] sm:$0x1]  ;;  %v6625_v45 = vld [vmem:[#allocation2 + $0x40] sm:$0xf] }
 0x252   : > { %v4591_v37 = vunpack.c.l.b16 %v4279_v12  ;;  %v4286_v9 = vrot.slane %v4284_v10, 5  ;;  %v4296_v25 = vrot.slane %v4294_v22, 4  ;;  %v3491_v8 = vrot.slane %v6625_v45, 5 }
 0x253   : > { %v3335_v59 = vpop.f32.mrf.mxu0  ;;  %v2340_v52 = vpop.f32.mrf.mxu2  ;;  %v4283_v54 = vrot.slane %v4281_v23, 4  ;;  %v4908_v31 = vsel %vm7762_vm14, %v4906_v40, %v4907_v17  ;;  %v3401_v23 = vld [vmem:[#allocation2 + $0x3c] sm:$0xe]  ;;  %v4300_v12 = vshll.u32 %v8155_v27, 16  ;;  %v6626_v40 = vld [vmem:[#allocation2 + $0x44] sm:$0x1] }
 0x254   : > { %v2390_v47 = vadd.f32 %v2340_v52, %v1961_v6  ;;  %v2654_v3 = vpop.f32.mrf.mxu3  ;;  %v4905_v6 = vsel %vm7762_vm14, %v6139_v43, %v4904_v5  ;;  %v5016_v10 = vunpack.c.l.b16 %v4908_v31  ;;  %v3493_v22 = vrot.slane %v3491_v8, 4 }
 0x255   : > { %v1962_v55 = vpop.f32.mrf.mxu1  ;;  %v4287_v5 = vor.u32 %v4286_v9, %v4283_v54  ;;  %v3494_v17 = vrot.slane %v6626_v40, 5  ;;  %v4302_v54 = vrot.slane %v4300_v12, 5  ;;  %v4821_v9 = vld [vmem:[#allocation2 + $0x48] sm:$0xe]  ;;  %v4911_v31 = vrot.slane %v8135_v13, 5 }
 0x256   : > { %5139 = vmatmul.bf16.gmra.mxu0 %v5043_v53  ;;  %v2704_v38 = vadd.f32 %v2654_v3, %v2390_v47  ;;  %v1963_v28 = vadd.f32 %v1962_v55, %v7899_v26  ;;  %v4292_v53 = vrot.slane %v4290_v60, 5  ;;  %v3624_v47 = vpack.c.b16 %v3596_v51, %v3595_v33  ;;  %v6275_v3 = vld [vmem:[#allocation2 + $0x3c] sm:$0xff] }
 0x257   : > { %v4619_v26 = vpack.c.b16 %v4591_v37, %v4590_v57  ;;  %v5015_v55 = vunpack.c.l.b16 %v4905_v6  ;;  %v5964_v60 = vrot.slane %v3401_v23, 9  ;;  %v4288_v33 = vrot.slane %v4287_v5, 4  ;;  %v4151_v6 = vld [vmem:[#allocation2 + $0x54] sm:$0xf] }
 0x258   : > { %v8148_v21 = vadd.f32 %v3335_v59, %v2704_v38  ;;  %v4297_v38 = vor.u32 %v4296_v25, %v4292_v53 }
 0x259   : > { %v5044_v37 = vpack.c.b16 %v5016_v10, %v5015_v55  ;;  %v4293_v45 = vsel %vm7548_vm11, %v4288_v33, %v4292_v53  ;;  %v4308_v55 = vshll.u32 %v4151_v6, 16  ;;  %v4914_v10 = vrot.slane %v8155_v27, 5 }
 0x25a   : > { %v4592_v53 = vunpack.c.l.b16 %v4293_v45 }
 0x25b   : > { %v3337_v35 = vpop.f32.mrf.mxu0  ;;  %v2342_v1 = vpop.f32.mrf.mxu2 }
 0x25c   : > { %v2391_v59 = vadd.f32 %v2342_v1, %v1963_v28  ;;  %v2656_v52 = vpop.f32.mrf.mxu3  ;;  %v4298_v28 = vrot.slane %v4297_v38, 4 }
 0x25d   : > { %v1965_v18 = vpop.f32.mrf.mxu1 }
 0x25e   : > { %v2705_v43 = vadd.f32 %v2656_v52, %v2391_v59  ;;  %v1966_v57 = vadd.f32 %v1965_v18, %v7912_v63  ;;  %v8162_v59 = vld [vmem:[#allocation2 + $0x58] sm:$0xf]  ;;  %v6140_v18 = vrot.slane %v4821_v9, 9  ;;  %v4303_v13 = vsel %vm7548_vm11, %v4298_v28, %v4302_v54 }
 0x25f   : > { %v4314_v5 = vshll.u32 %v8162_v59, 16 }
 0x260   : > { %3724 = vmatmul.bf16.gmra.mxu1 %v3624_v47  ;;  %4038 = vmatmul.bf16.gmra.mxu2 %v6275_v3  ;;  %v8158_v51 = vadd.f32 %v3337_v35, %v2705_v43  ;;  %v3492_v3 = vsel %vm7762_vm14, %v5964_v60, %v3491_v8  ;;  %v3495_v35 = vsel %vm7762_vm14, %v3493_v22, %v3494_v17  ;;  %v4318_v43 = vshrl.u32 %v8162_v59, 16 }
 0x261   : > { %4719 = vmatmul.bf16.gmra.mxu3 %v4619_v26  ;;  %v4305_v26 = vshrl.u32 %v4151_v6, 16  ;;  %v4913_v8 = vrot.slane %v4911_v31, 4  ;;  %v3597_v38 = vunpack.c.l.b16 %v3492_v3  ;;  %v3598_v12 = vunpack.c.l.b16 %v3495_v35  ;;  %v8182_v6 = vld [vmem:[#allocation2 + $0x5c] sm:$0x1]  ;;  %v6627_v3 = vld [vmem:[#allocation2 + $0x4c] sm:$0xf] }
 0x262   : > { %v4593_v22 = vunpack.c.l.b16 %v4303_v13  ;;  %v4310_v17 = vrot.slane %v4308_v55, 5  ;;  %v4320_v28 = vrot.slane %v4318_v43, 4  ;;  %v3498_v35 = vrot.slane %v6627_v3, 5 }
 0x263   : > { %v3340_v25 = vpop.f32.mrf.mxu0  ;;  %v2345_v1 = vpop.f32.mrf.mxu2  ;;  %v4307_v40 = vrot.slane %v4305_v26, 4  ;;  %v4915_v27 = vsel %vm7762_vm14, %v4913_v8, %v4914_v10  ;;  %v3402_v26 = vld [vmem:[#allocation2 + $0x48] sm:$0xe]  ;;  %v4324_v13 = vshll.u32 %v8182_v6, 16  ;;  %v6628_v8 = vld [vmem:[#allocation2 + $0x50] sm:$0x1] }
 0x264   : > { %v2392_v52 = vadd.f32 %v2345_v1, %v1966_v57  ;;  %v2659_v47 = vpop.f32.mrf.mxu3  ;;  %v4912_v57 = vsel %vm7762_vm14, %v6140_v18, %v4911_v31  ;;  %v5018_v55 = vunpack.c.l.b16 %v4915_v27  ;;  %v3500_v43 = vrot.slane %v3498_v35, 4 }
 0x265   : > { %v1967_v63 = vpop.f32.mrf.mxu1  ;;  %v4311_v31 = vor.u32 %v4310_v17, %v4307_v40  ;;  %v3501_v10 = vrot.slane %v6628_v8, 5  ;;  %v4326_v40 = vrot.slane %v4324_v13, 5  ;;  %v4822_v17 = vld [vmem:[#allocation2 + $0x54] sm:$0xe]  ;;  %v4918_v27 = vrot.slane %v8162_v59, 5 }
 0x266   : > { %5144 = vmatmul.bf16.gmra.mxu0 %v5044_v37  ;;  %v2706_v23 = vadd.f32 %v2659_v47, %v2392_v52  ;;  %v1968_v33 = vadd.f32 %v1967_v63, %v7926_v11  ;;  %v4316_v37 = vrot.slane %v4314_v5, 5  ;;  %v3625_v52 = vpack.c.b16 %v3598_v12, %v3597_v38  ;;  %v6276_v47 = vld [vmem:[#allocation2 + $0x48] sm:$0xff] }
 0x267   : > { %v4620_v11 = vpack.c.b16 %v4593_v22, %v4592_v53  ;;  %v5017_v63 = vunpack.c.l.b16 %v4912_v57  ;;  %v5965_v5 = vrot.slane %v3402_v26, 9  ;;  %v4312_v38 = vrot.slane %v4311_v31, 4  ;;  %v4154_v57 = vld [vmem:[#allocation2 + $0x60] sm:$0xf] }
 0x268   : > { %v8175_v60 = vadd.f32 %v3340_v25, %v2706_v23  ;;  %v4321_v23 = vor.u32 %v4320_v28, %v4316_v37 }
 0x269   : > { %v5045_v22 = vpack.c.b16 %v5018_v55, %v5017_v63  ;;  %v4317_v3 = vsel %vm7548_vm11, %v4312_v38, %v4316_v37  ;;  %v4332_v63 = vshll.u32 %v4154_v57, 16  ;;  %v4921_v55 = vrot.slane %v8182_v6, 5 }
 0x26a   : > { %v4594_v37 = vunpack.c.l.b16 %v4317_v3 }
 0x26b   : > { %v3342_v54 = vpop.f32.mrf.mxu0  ;;  %v2347_v9 = vpop.f32.mrf.mxu2 }
 0x26c   : > { %v2393_v25 = vadd.f32 %v2347_v9, %v1968_v33  ;;  %v2661_v1 = vpop.f32.mrf.mxu3  ;;  %v4322_v33 = vrot.slane %v4321_v23, 4 }
 0x26d   : > { %v1970_v45 = vpop.f32.mrf.mxu1 }
 0x26e   : > { %v2707_v18 = vadd.f32 %v2661_v1, %v2393_v25  ;;  %v1971_v53 = vadd.f32 %v1970_v45, %v7833_v24  ;;  %v8189_v25 = vld [vmem:[#allocation2 + $0x64] sm:$0xf]  ;;  %v6141_v45 = vrot.slane %v4822_v17, 9  ;;  %v4327_v59 = vsel %vm7548_vm11, %v4322_v33, %v4326_v40 }
 0x26f   : > { %v4338_v31 = vshll.u32 %v8189_v25, 16 }
 0x270   : > { %3729 = vmatmul.bf16.gmra.mxu1 %v3625_v52  ;;  %4043 = vmatmul.bf16.gmra.mxu2 %v6276_v47  ;;  %v8185_v12 = vadd.f32 %v3342_v54, %v2707_v18  ;;  %v3499_v47 = vsel %vm7762_vm14, %v5965_v5, %v3498_v35  ;;  %v3502_v54 = vsel %vm7762_vm14, %v3500_v43, %v3501_v10  ;;  %v4342_v18 = vshrl.u32 %v8189_v25, 16 }
 0x271   : > { %4724 = vmatmul.bf16.gmra.mxu3 %v4620_v11  ;;  %v4329_v11 = vshrl.u32 %v4154_v57, 16  ;;  %v4920_v35 = vrot.slane %v4918_v27, 4  ;;  %v3599_v23 = vunpack.c.l.b16 %v3499_v47  ;;  %v3600_v13 = vunpack.c.l.b16 %v3502_v54  ;;  %v8209_v57 = vld [vmem:[#allocation2 + $0x68] sm:$0x1]  ;;  %v6629_v47 = vld [vmem:[#allocation2 + $0x58] sm:$0xf] }
 0x272   : > { %v4595_v43 = vunpack.c.l.b16 %v4327_v59  ;;  %v4334_v10 = vrot.slane %v4332_v63, 5  ;;  %v4344_v33 = vrot.slane %v4342_v18, 4  ;;  %v3505_v54 = vrot.slane %v6629_v47, 5 }
 0x273   : > { %v3345_v28 = vpop.f32.mrf.mxu0  ;;  %v2350_v9 = vpop.f32.mrf.mxu2  ;;  %v4331_v8 = vrot.slane %v4329_v11, 4  ;;  %v4922_v6 = vsel %vm7762_vm14, %v4920_v35, %v4921_v55  ;;  %v3403_v11 = vld [vmem:[#allocation2 + $0x54] sm:$0xe]  ;;  %v4348_v59 = vshll.u32 %v8209_v57, 16  ;;  %v6630_v35 = vld [vmem:[#allocation2 + $0x5c] sm:$0x1] }
 0x274   : > { %v2394_v1 = vadd.f32 %v2350_v9, %v1971_v53  ;;  %v2664_v52 = vpop.f32.mrf.mxu3  ;;  %v4919_v53 = vsel %vm7762_vm14, %v6141_v45, %v4918_v27  ;;  %v5020_v63 = vunpack.c.l.b16 %v4922_v6  ;;  %v3507_v18 = vrot.slane %v3505_v54, 4 }
 0x275   : > { %v1972_v24 = vpop.f32.mrf.mxu1  ;;  %v4335_v27 = vor.u32 %v4334_v10, %v4331_v8  ;;  %v3508_v55 = vrot.slane %v6630_v35, 5  ;;  %v4350_v8 = vrot.slane %v4348_v59, 5  ;;  %v4823_v10 = vld [vmem:[#allocation2 + $0x60] sm:$0xe]  ;;  %v4925_v6 = vrot.slane %v8189_v25, 5 }
 0x276   : > { %5149 = vmatmul.bf16.gmra.mxu0 %v5045_v22  ;;  %v2708_v26 = vadd.f32 %v2664_v52, %v2394_v1  ;;  %v1973_v38 = vadd.f32 %v1972_v24, %v7852_v39  ;;  %v4340_v22 = vrot.slane %v4338_v31, 5  ;;  %v3626_v1 = vpack.c.b16 %v3600_v13, %v3599_v23  ;;  %v6277_v52 = vld [vmem:[#allocation2 + $0x54] sm:$0xff] }
 0x277   : > { %v4621_v39 = vpack.c.b16 %v4595_v43, %v4594_v37  ;;  %v5019_v24 = vunpack.c.l.b16 %v4919_v53  ;;  %v5966_v31 = vrot.slane %v3403_v11, 9  ;;  %v4336_v23 = vrot.slane %v4335_v27, 4  ;;  %v4157_v53 = vld [vmem:[#allocation2 + $0x6c] sm:$0xf] }
 0x278   : > { %v8202_v5 = vadd.f32 %v3345_v28, %v2708_v26  ;;  %v4345_v26 = vor.u32 %v4344_v33, %v4340_v22 }
 0x279   : > { %v5046_v43 = vpack.c.b16 %v5020_v63, %v5019_v24  ;;  %v4341_v47 = vsel %vm7548_vm11, %v4336_v23, %v4340_v22  ;;  %v4356_v24 = vshll.u32 %v4157_v53, 16  ;;  %v4928_v63 = vrot.slane %v8209_v57, 5 }
 0x27a   : > { %v4596_v22 = vunpack.c.l.b16 %v4341_v47 }
 0x27b   : > { %v3347_v40 = vpop.f32.mrf.mxu0  ;;  %v2352_v17 = vpop.f32.mrf.mxu2 }
 0x27c   : > { %v2395_v28 = vadd.f32 %v2352_v17, %v1973_v38  ;;  %v2666_v9 = vpop.f32.mrf.mxu3  ;;  %v4346_v38 = vrot.slane %v4345_v26, 4 }
 0x27d   : > { %v1975_v3 = vpop.f32.mrf.mxu1 }
 0x27e   : > { %v2709_v45 = vadd.f32 %v2666_v9, %v2395_v28  ;;  %v1976_v37 = vadd.f32 %v1975_v3, %v7860_v44  ;;  %v8216_v28 = vld [vmem:[#allocation2 + $0x70] sm:$0xf]  ;;  %v6142_v3 = vrot.slane %v4823_v10, 9  ;;  %v4351_v25 = vsel %vm7548_vm11, %v4346_v38, %v4350_v8 }
 0x27f   : > { %v4362_v27 = vshll.u32 %v8216_v28, 16 }
 0x280   : > { %3734 = vmatmul.bf16.gmra.mxu1 %v3626_v1  ;;  %4048 = vmatmul.bf16.gmra.mxu2 %v6277_v52  ;;  %v8212_v13 = vadd.f32 %v3347_v40, %v2709_v45  ;;  %v3506_v52 = vsel %vm7762_vm14, %v5966_v31, %v3505_v54  ;;  %v3509_v40 = vsel %vm7762_vm14, %v3507_v18, %v3508_v55  ;;  %v4366_v45 = vshrl.u32 %v8216_v28, 16 }
 0x281   : > { %4729 = vmatmul.bf16.gmra.mxu3 %v4621_v39  ;;  %v4353_v39 = vshrl.u32 %v4157_v53, 16  ;;  %v4927_v54 = vrot.slane %v4925_v6, 4  ;;  %v3601_v26 = vunpack.c.l.b16 %v3506_v52  ;;  %v3602_v59 = vunpack.c.l.b16 %v3509_v40  ;;  %v6631_v53 = vld [vmem:[#allocation2 + $0x64] sm:$0xf] }
 0x282   : > { %v4597_v18 = vunpack.c.l.b16 %v4351_v25  ;;  %v4358_v55 = vrot.slane %v4356_v24, 5  ;;  %v4368_v38 = vrot.slane %v4366_v45, 4  ;;  %v6278_v40 = vld [vmem:[#allocation2 + $0x60] sm:$0xff] }
 0x283   : > { %v3350_v33 = vpop.f32.mrf.mxu0  ;;  %v2355_v17 = vpop.f32.mrf.mxu2  ;;  %v4355_v35 = vrot.slane %v4353_v39, 4  ;;  %v4929_v57 = vsel %vm7762_vm14, %v4927_v54, %v4928_v63  ;;  %v3627_v52 = vpack.c.b16 %v3602_v59, %v3601_v26  ;;  %v6632_v54 = vld [vmem:[#allocation2 + $0x68] sm:$0x1]  ;;  %v8242_v59 = vld [vmem:[#allocation2 + $0x7c] sm:$0xf] }
 0x284   : > { %v2396_v9 = vadd.f32 %v2355_v17, %v1976_v37  ;;  %v2669_v1 = vpop.f32.mrf.mxu3  ;;  %v4926_v37 = vsel %vm7762_vm14, %v6142_v3, %v4925_v6  ;;  %v8238_v17 = vld [vmem:[#allocation2 + $0x74] sm:$0x1]  ;;  %v4622_v47 = vpack.c.b16 %v4597_v18, %v4596_v22  ;;  %v5022_v24 = vunpack.c.l.b16 %v4929_v57 }
 0x285   : > { %v1977_v44 = vpop.f32.mrf.mxu1  ;;  %v5021_v6 = vunpack.c.l.b16 %v4926_v37  ;;  %v4359_v3 = vor.u32 %v4358_v55, %v4355_v35  ;;  %v4372_v25 = vshll.u32 %v8238_v17, 16  ;;  %v3515_v63 = vrot.slane %v6632_v54, 5 }
 0x286   : > { %5154 = vmatmul.bf16.gmra.mxu0 %v5046_v43  ;;  %v2710_v11 = vadd.f32 %v2669_v1, %v2396_v9  ;;  %v1978_v23 = vadd.f32 %v1977_v44, %v7876_v34  ;;  %v8234_v43 = vrot.slane %v4362_v27, 5  ;;  %v3404_v34 = vld [vmem:[#allocation2 + $0x60] sm:$0xe] }
 0x287   : > { %v5967_v27 = vrot.slane %v3404_v34, 9  ;;  %v4360_v26 = vrot.slane %v4359_v3, 4  ;;  %v5047_v35 = vpack.c.b16 %v5022_v24, %v5021_v6  ;;  %v4374_v37 = vrot.slane %v4372_v25, 5 }
 0x288   : > { %v8229_v31 = vadd.f32 %v3350_v33, %v2710_v11  ;;  %v3512_v33 = vrot.slane %v6631_v53, 5  ;;  %v4369_v11 = vor.u32 %v4368_v38, %v8234_v43  ;;  %v4935_v25 = vrot.slane %v8238_v17, 5 }
 0x289   : > { %v4365_v6 = vsel %vm7548_vm11, %v4360_v26, %v8234_v43  ;;  %v8264_v26 = vld [vmem:[#allocation2 + $0x80] sm:$0x1] }
 0x28a   : > { %v3514_v45 = vrot.slane %v3512_v33, 4  ;;  %v4370_v55 = vrot.slane %v4369_v11, 4  ;;  %v3513_v57 = vsel %vm7762_vm14, %v5967_v27, %v3512_v33 }
 0x28b   : > { %v3352_v8 = vpop.f32.mrf.mxu0  ;;  %v2357_v10 = vpop.f32.mrf.mxu2  ;;  %v3603_v3 = vunpack.c.l.b16 %v3513_v57 }
 0x28c   : > { %v2397_v9 = vadd.f32 %v2357_v10, %v1978_v23  ;;  %v2671_v1 = vpop.f32.mrf.mxu3  ;;  %v4160_v23 = vld [vmem:[#allocation2 + $0x78] sm:$0xf]  ;;  %v3516_v53 = vsel %vm7762_vm14, %v3514_v45, %v3515_v63 }
 0x28d   : > { %v1980_v44 = vpop.f32.mrf.mxu1  ;;  %v4380_v34 = vshll.u32 %v4160_v23, 16  ;;  %v3604_v24 = vunpack.c.l.b16 %v3516_v53  ;;  %v6633_v53 = vld [vmem:[#allocation2 + $0x70] sm:$0xf] }
 0x28e   : > { %v2711_v39 = vadd.f32 %v2671_v1, %v2397_v9  ;;  %v1981_v18 = vadd.f32 %v1980_v44, %v7887_v2  ;;  %v4824_v9 = vld [vmem:[#allocation2 + $0x6c] sm:$0xe]  ;;  %v4932_v1 = vrot.slane %v8216_v28, 5  ;;  %v4386_v2 = vshll.u32 %v8242_v59, 16 }
 0x28f   : > { %v4390_v44 = vshrl.u32 %v8242_v59, 16  ;;  %v6143_v28 = vrot.slane %v4824_v9, 9  ;;  %v4382_v45 = vrot.slane %v4380_v34, 5  ;;  %v3519_v9 = vrot.slane %v6633_v53, 5 }
 0x290   : > { %3739 = vmatmul.bf16.gmra.mxu1 %v3627_v52  ;;  %4053 = vmatmul.bf16.gmra.mxu2 %v6278_v40  ;;  %v8244_v22 = vadd.f32 %v3352_v8, %v2711_v39  ;;  %v4377_v52 = vshrl.u32 %v4160_v23, 16  ;;  %v4375_v39 = vsel %vm7548_vm11, %v4370_v55, %v4374_v37  ;;  %v4934_v11 = vrot.slane %v4932_v1, 4 }
 0x291   : > { %4734 = vmatmul.bf16.gmra.mxu3 %v4622_v47  ;;  %v8260_v54 = vrot.slane %v4386_v2, 5  ;;  %v4392_v63 = vrot.slane %v4390_v44, 4  ;;  %v4599_v43 = vunpack.c.l.b16 %v4375_v39  ;;  %v3628_v37 = vpack.c.b16 %v3604_v24, %v3603_v3 }
 0x292   : > { %v4379_v27 = vrot.slane %v4377_v52, 4  ;;  %v4933_v57 = vsel %vm7762_vm14, %v6143_v28, %v4932_v1  ;;  %v4936_v17 = vsel %vm7762_vm14, %v4934_v11, %v4935_v25  ;;  %v3521_v39 = vrot.slane %v3519_v9, 4  ;;  %v6634_v28 = vld [vmem:[#allocation2 + $0x74] sm:$0x1] }
 0x293   : > { %v3355_v38 = vpop.f32.mrf.mxu0  ;;  %v2360_v10 = vpop.f32.mrf.mxu2  ;;  %v4393_v2 = vor.u32 %v4392_v63, %v8260_v54  ;;  %v5024_v3 = vunpack.c.l.b16 %v4936_v17  ;;  %v3522_v24 = vrot.slane %v6634_v28, 5  ;;  %v4939_v17 = vrot.slane %v8242_v59, 5 }
 0x294   : > { %v2398_v40 = vadd.f32 %v2360_v10, %v1981_v18  ;;  %v2674_v8 = vpop.f32.mrf.mxu3  ;;  %v4598_v18 = vunpack.c.l.b16 %v4365_v6  ;;  %v4383_v34 = vor.u32 %v4382_v45, %v4379_v27 }
 0x295   : > { %v1982_v47 = vpop.f32.mrf.mxu1  ;;  %v4394_v25 = vrot.slane %v4393_v2, 4 }
 0x296   : > { %5159 = vmatmul.bf16.gmra.mxu0 %v5047_v35  ;;  %v2712_v33 = vadd.f32 %v2674_v8, %v2398_v40  ;;  %v1983_v35 = vadd.f32 %v1982_v47, %v7906_v41  ;;  %v6279_v40 = vld [vmem:[#allocation2 + $0x6c] sm:$0xff]  ;;  %v4396_v41 = vshll.u32 %v8264_v26, 16  ;;  %v4623_v47 = vpack.c.b16 %v4599_v43, %v4598_v18  ;;  %v8276_v18 = vld [vmem:[#allocation2 + $0x88] sm:$0xf] }
 0x297   : > { %v3405_v8 = vld [vmem:[#allocation2 + $0x6c] sm:$0xe]  ;;  %v4384_v11 = vrot.slane %v4383_v34, 4  ;;  %v4414_v59 = vshrl.u32 %v8276_v18, 16 }
 0x298   : > { %v8262_v23 = vadd.f32 %v3355_v38, %v2712_v33  ;;  %v5023_v33 = vunpack.c.l.b16 %v4933_v57  ;;  %v5968_v1 = vrot.slane %v3405_v8, 9 }
 0x29a   : > { %v5048_v63 = vpack.c.b16 %v5024_v3, %v5023_v33  ;;  %v4942_v33 = vrot.slane %v8264_v26, 5 }
 0x29b   : > { %v3357_v10 = vpop.f32.mrf.mxu0  ;;  %v2362_v55 = vpop.f32.mrf.mxu2 }
 0x29c   : > { %v2399_v52 = vadd.f32 %v2362_v55, %v1983_v35  ;;  %v2676_v38 = vpop.f32.mrf.mxu3  ;;  %v4398_v35 = vrot.slane %v4396_v41, 5  ;;  %v4163_v55 = vld [vmem:[#allocation2 + $0x84] sm:$0xf] }
 0x29d   : > { %v1985_v44 = vpop.f32.mrf.mxu1  ;;  %v4401_v34 = vshrl.u32 %v4163_v55, 16  ;;  %v4404_v2 = vshll.u32 %v4163_v55, 16 }
 0x29e   : > { %v2713_v6 = vadd.f32 %v2676_v38, %v2399_v52  ;;  %v1986_v45 = vadd.f32 %v1985_v44, %v7914_v0  ;;  %v3523_v38 = vsel %vm7762_vm14, %v3521_v39, %v3522_v24  ;;  %v4389_v0 = vsel %vm7548_vm11, %v4384_v11, %v8260_v54 }
 0x29f   : > { %v3606_v3 = vunpack.c.l.b16 %v3523_v38  ;;  %v4600_v54 = vunpack.c.l.b16 %v4389_v0  ;;  %v4403_v28 = vrot.slane %v4401_v34, 4  ;;  %v4406_v24 = vrot.slane %v4404_v2, 5  ;;  %v6635_v38 = vld [vmem:[#allocation2 + $0x7c] sm:$0xf]  ;;  %v3406_v34 = vld [vmem:[#allocation2 + $0x78] sm:$0xe] }
 0x2a0   : > { %3744 = vmatmul.bf16.gmra.mxu1 %v3628_v37  ;;  %4058 = vmatmul.bf16.gmra.mxu2 %v6279_v40  ;;  %v8273_v27 = vadd.f32 %v3357_v10, %v2713_v6  ;;  %v3520_v37 = vsel %vm7762_vm14, %v5968_v1, %v3519_v9  ;;  %v4399_v10 = vsel %vm7548_vm11, %v4394_v25, %v4398_v35  ;;  %v4825_v40 = vld [vmem:[#allocation2 + $0x78] sm:$0xe]  ;;  %v4410_v9 = vshll.u32 %v8276_v18, 16 }
 0x2a1   : > { %4739 = vmatmul.bf16.gmra.mxu3 %v4623_v47  ;;  %v3605_v44 = vunpack.c.l.b16 %v3520_v37  ;;  %v6144_v47 = vrot.slane %v4825_v40, 9  ;;  %v4941_v6 = vrot.slane %v4939_v17, 4  ;;  %v4601_v1 = vunpack.c.l.b16 %v4399_v10 }
 0x2a2   : > { %v8293_v11 = vrot.slane %v4410_v9, 5  ;;  %v4416_v25 = vrot.slane %v4414_v59, 4  ;;  %v3526_v0 = vrot.slane %v6635_v38, 5 }
 0x2a3   : > { %v3360_v43 = vpop.f32.mrf.mxu0  ;;  %v2365_v57 = vpop.f32.mrf.mxu2  ;;  %v4943_v26 = vsel %vm7762_vm14, %v4941_v6, %v4942_v33  ;;  %v4624_v40 = vpack.c.b16 %v4601_v1, %v4600_v54 }
 0x2a4   : > { %v2400_v53 = vadd.f32 %v2365_v57, %v1986_v45  ;;  %v2679_v52 = vpop.f32.mrf.mxu3  ;;  %v8296_v45 = vld [vmem:[#allocation2 + $0x8c] sm:$0x1]  ;;  %v4940_v57 = vsel %vm7762_vm14, %v6144_v47, %v4939_v17  ;;  %v5026_v17 = vunpack.c.l.b16 %v4943_v26  ;;  %v5969_v47 = vrot.slane %v3406_v34, 9 }
 0x2a5   : > { %v1987_v8 = vpop.f32.mrf.mxu1  ;;  %v4420_v2 = vshll.u32 %v8296_v45, 16  ;;  %v5025_v59 = vunpack.c.l.b16 %v4940_v57  ;;  %v3528_v6 = vrot.slane %v3526_v0, 4 }
 0x2a6   : > { %5164 = vmatmul.bf16.gmra.mxu0 %v5048_v63  ;;  %v2714_v41 = vadd.f32 %v2679_v52, %v2400_v53  ;;  %v1988_v35 = vadd.f32 %v1987_v8, %v7930_v32  ;;  %v3629_v53 = vpack.c.b16 %v3606_v3, %v3605_v44  ;;  %v6280_v52 = vld [vmem:[#allocation2 + $0x78] sm:$0xff]  ;;  %v4407_v32 = vor.u32 %v4406_v24, %v4403_v28  ;;  %v6636_v44 = vld [vmem:[#allocation2 + $0x80] sm:$0x1]  ;;  %v8304_v3 = vld [vmem:[#allocation2 + $0x94] sm:$0xf] }
 0x2a7   : > { %v4417_v8 = vor.u32 %v4416_v25, %v8293_v11  ;;  %v3529_v33 = vrot.slane %v6636_v44, 5  ;;  %v4422_v28 = vrot.slane %v4420_v2, 5  ;;  %v5049_v25 = vpack.c.b16 %v5026_v17, %v5025_v59 }
 0x2a8   : > { %v8291_v39 = vadd.f32 %v3360_v43, %v2714_v41  ;;  %v4166_v41 = vld [vmem:[#allocation2 + $0x90] sm:$0xf]  ;;  %v4408_v54 = vrot.slane %v4407_v32, 4  ;;  %v4438_v38 = vshrl.u32 %v8304_v3, 16  ;;  %v3527_v34 = vsel %vm7762_vm14, %v5969_v47, %v3526_v0 }
 0x2a9   : > { %v4418_v1 = vrot.slane %v4417_v8, 4  ;;  %v3607_v47 = vunpack.c.l.b16 %v3527_v34 }
 0x2aa   : > { %8708 = vst [vmem:[#allocation30_spill] sm:$0xff] %v8291_v39 }
 0x2ab   : > { %v3362_v63 = vpop.f32.mrf.mxu0  ;;  %v2367_v55 = vpop.f32.mrf.mxu2 }
 0x2ac   : > { %v2401_v37 = vadd.f32 %v2367_v55, %v1988_v35  ;;  %v2681_v43 = vpop.f32.mrf.mxu3  ;;  %v4946_v35 = vrot.slane %v8276_v18, 5  ;;  %v4425_v55 = vshrl.u32 %v4166_v41, 16  ;;  %v3530_v18 = vsel %vm7762_vm14, %v3528_v6, %v3529_v33 }
 0x2ad   : > { %v3710_v10 = vpop.f32.mrf.mxu1  ;;  %v3608_v44 = vunpack.c.l.b16 %v3530_v18 }
 0x2ae   : > { %v2715_v9 = vadd.f32 %v2681_v43, %v2401_v37  ;;  %v3790_v57 = vadd.f32 %v3710_v10, %v7941_v36  ;;  %v4826_v43 = vld [vmem:[#allocation2 + $0x84] sm:$0xe]  ;;  %v4413_v36 = vsel %vm7548_vm11, %v4408_v54, %v8293_v11  ;;  %v4423_v10 = vsel %vm7548_vm11, %v4418_v1, %v4422_v28 }
 0x2af   : > { %v6145_v8 = vrot.slane %v4826_v43, 9  ;;  %v4948_v2 = vrot.slane %v4946_v35, 4  ;;  %v4427_v59 = vrot.slane %v4425_v55, 4  ;;  %v4602_v6 = vunpack.c.l.b16 %v4413_v36  ;;  %v3407_v28 = vld [vmem:[#allocation2 + $0x84] sm:$0xe] }
 0x2b0   : > { %3749 = vmatmul.bf16.gmra.mxu1 %v3629_v53  ;;  %4063 = vmatmul.bf16.gmra.mxu2 %v6280_v52  ;;  %v8306_v24 = vadd.f32 %v3362_v63, %v2715_v9  ;;  %v4428_v53 = vshll.u32 %v4166_v41, 16  ;;  %v4434_v52 = vshll.u32 %v8304_v3, 16  ;;  %v4949_v9 = vrot.slane %v8296_v45, 5 }
 0x2b1   : > { %4744 = vmatmul.bf16.gmra.mxu3 %v4624_v40  ;;  %v4440_v41 = vrot.slane %v4438_v38, 4  ;;  %v4603_v33 = vunpack.c.l.b16 %v4423_v10  ;;  %v4947_v1 = vsel %vm7762_vm14, %v6145_v8, %v4946_v35  ;;  %v5970_v8 = vrot.slane %v3407_v28, 9  ;;  %v4169_v28 = vld [vmem:[#allocation2 + $0x9c] sm:$0xf] }
 0x2b2   : > { %8709 = vst [vmem:[#allocation31_spill] sm:$0xff] %v8306_v24  ;;  %v4430_v17 = vrot.slane %v4428_v53, 5  ;;  %v8322_v0 = vrot.slane %v4434_v52, 5  ;;  %v4950_v45 = vsel %vm7762_vm14, %v4948_v2, %v4949_v9  ;;  %v5027_v36 = vunpack.c.l.b16 %v4947_v1 }
 0x2b3   : > { %v5130_v26 = vpop.f32.mrf.mxu0  ;;  %v4024_v37 = vpop.f32.mrf.mxu2  ;;  %v5028_v10 = vunpack.c.l.b16 %v4950_v45 }
 0x2b4   : > { %v4705_v40 = vpop.f32.mrf.mxu3  ;;  %v4104_v63 = vadd.f32 %v4024_v37, %v3790_v57  ;;  %v8324_v57 = vld [vmem:[#allocation2 + $0x98] sm:$0x1]  ;;  %v4431_v53 = vor.u32 %v4430_v17, %v4427_v59  ;;  %v4441_v52 = vor.u32 %v4440_v41, %v8322_v0 }
 0x2b5   : > { %v3712_v32 = vpop.f32.mrf.mxu1  ;;  %v4444_v38 = vshll.u32 %v8324_v57, 16 }
 0x2b6   : > { %5169 = vmatmul.bf16.gmra.mxu0 %v5049_v25  ;;  %v4785_v11 = vadd.f32 %v4705_v40, %v4104_v63  ;;  %v3791_v54 = vadd.f32 %v3712_v32, %v7949_v30  ;;  %v6637_v25 = vld [vmem:[#allocation2 + $0x88] sm:$0xf]  ;;  %v3630_v63 = vpack.c.b16 %v3608_v44, %v3607_v47  ;;  %v4625_v32 = vpack.c.b16 %v4603_v33, %v4602_v6 }
 0x2b7   : > { %v3533_v55 = vrot.slane %v6637_v25, 5  ;;  %v6281_v30 = vld [vmem:[#allocation2 + $0x84] sm:$0xff]  ;;  %v6638_v25 = vld [vmem:[#allocation2 + $0x8c] sm:$0x1]  ;;  %v4432_v39 = vrot.slane %v4431_v53, 4  ;;  %v4442_v59 = vrot.slane %v4441_v52, 4 }
 0x2b8   : > { %v5210_v18 = vadd.f32 %v5130_v26, %v4785_v11  ;;  %v3536_v24 = vrot.slane %v6638_v25, 5  ;;  %v4446_v17 = vrot.slane %v4444_v38, 5  ;;  %v4953_v47 = vrot.slane %v8304_v3, 5 }
 0x2b9   : > { %v3535_v9 = vrot.slane %v3533_v55, 4  ;;  %v5050_v26 = vpack.c.b16 %v5028_v10, %v5027_v36  ;;  %v3534_v6 = vsel %vm7762_vm14, %v5970_v8, %v3533_v55  ;;  %v4437_v52 = vsel %vm7548_vm11, %v4432_v39, %v8322_v0 }
 0x2ba   : > { %v5344_v44 = vmul.f32 %v5210_v18, %v5210_v18  ;;  %v4447_v55 = vsel %vm7548_vm11, %v4442_v59, %v4446_v17  ;;  %v3609_v0 = vunpack.c.l.b16 %v3534_v6  ;;  %v4604_v8 = vunpack.c.l.b16 %v4437_v52  ;;  %v8357_v6 = vld [vmem:[#allocation2 + $0xa4] sm:$0x1]  ;;  %v6282_v52 = vld [vmem:[#allocation2 + $0x90] sm:$0xff] }
 0x2bb   : > { %v5132_v37 = vpop.f32.mrf.mxu0  ;;  %v4026_v43 = vpop.f32.mrf.mxu2  ;;  %v3537_v3 = vsel %vm7762_vm14, %v3535_v9, %v3536_v24  ;;  %v4605_v9 = vunpack.c.l.b16 %v4447_v55 }
 0x2bc   : > { %v4105_v34 = vadd.f32 %v4026_v43, %v3791_v54  ;;  %v4707_v40 = vpop.f32.mrf.mxu3  ;;  %v4827_v54 = vld [vmem:[#allocation2 + $0x90] sm:$0xe]  ;;  %v8337_v43 = vld [vmem:[#allocation2 + $0xa0] sm:$0xf]  ;;  %v3610_v10 = vunpack.c.l.b16 %v3537_v3 }
 0x2bd   : > { %v3715_v35 = vpop.f32.mrf.mxu1  ;;  %v6146_v38 = vrot.slane %v4827_v54, 9  ;;  %v4458_v24 = vshll.u32 %v8337_v43, 16  ;;  %v4462_v36 = vshrl.u32 %v8337_v43, 16 }
 0x2be   : > { %v4786_v2 = vadd.f32 %v4707_v40, %v4105_v34  ;;  %v3792_v45 = vadd.f32 %v3715_v35, %v7956_v42  ;;  %v4452_v35 = vshll.u32 %v4169_v28, 16 }
 0x2bf   : > { %v4954_v25 = vsel %vm7762_vm14, %v6146_v38, %v4953_v47  ;;  %v4464_v54 = vrot.slane %v4462_v36, 4  ;;  %v3408_v38 = vld [vmem:[#allocation2 + $0x90] sm:$0xe] }
 0x2c0   : > { %v5211_v41 = vadd.f32 %v5132_v37, %v4786_v2  ;;  %3754 = vmatmul.bf16.gmra.mxu1 %v3630_v63  ;;  %4068 = vmatmul.bf16.gmra.mxu2 %v6281_v30  ;;  %v4955_v63 = vrot.slane %v4953_v47, 4  ;;  %v4956_v30 = vrot.slane %v8324_v57, 5  ;;  %v4454_v17 = vrot.slane %v4452_v35, 5 }
 0x2c1   : > { %4749 = vmatmul.bf16.gmra.mxu3 %v4625_v32  ;;  %v5971_v35 = vrot.slane %v3408_v38, 9 }
 0x2c2   : > { %v6315_v33 = vpack.c.bf16 %v5211_v41, %v5210_v18  ;;  %v5306_v11 = vadd.f32 %v5211_v41, %v5210_v18  ;;  %v5345_v1 = vmul.f32 %v5211_v41, %v5211_v41  ;;  %v4449_v18 = vshrl.u32 %v4169_v28, 16 }
 0x2c3   : > { %v5135_v37 = vpop.f32.mrf.mxu0  ;;  %v4029_v53 = vpop.f32.mrf.mxu2  ;;  %v4957_v57 = vsel %vm7762_vm14, %v4955_v63, %v4956_v30  ;;  %v8354_v41 = vrot.slane %v4458_v24, 5  ;;  %v3631_v28 = vpack.c.b16 %v3610_v10, %v3609_v0  ;;  %v4626_v30 = vpack.c.b16 %v4605_v9, %v4604_v8  ;;  %v4172_v10 = vld [vmem:[#allocation2 + $0xa8] sm:$0xf] }
 0x2c4   : > { %6316 = vst [vmem:[%s7230_s12] sm:$0xff] %v6315_v33   ;;  %v5376_v34 = vadd.f32 %v5345_v1, %v5344_v44  ;;  %v4106_v40 = vadd.f32 %v4029_v53, %v3792_v45  ;;  %v4710_v42 = vpop.f32.mrf.mxu3  ;;  %v4451_v59 = vrot.slane %v4449_v18, 4  ;;  %v5030_v55 = vunpack.c.l.b16 %v4957_v57 }
 0x2c5   : > { %v3717_v32 = vpop.f32.mrf.mxu1  ;;  %v4465_v18 = vor.u32 %v4464_v54, %v8354_v41 }
 0x2c6   : > { %5174 = vmatmul.bf16.gmra.mxu0 %v5050_v26  ;;  %v4787_v39 = vadd.f32 %v4710_v42, %v4106_v40  ;;  %v3793_v26 = vadd.f32 %v3717_v32, %v7963_v19  ;;  %v6639_v40 = vld [vmem:[#allocation2 + $0x94] sm:$0xf]  ;;  %v4468_v19 = vshll.u32 %v8357_v6, 16 }
 0x2c7   : > { %v3540_v42 = vrot.slane %v6639_v40, 5  ;;  %v4466_v9 = vrot.slane %v4465_v18, 4 }
 0x2c8   : > { %v5212_v2 = vadd.f32 %v5135_v37, %v4787_v39  ;;  %v5029_v37 = vunpack.c.l.b16 %v4954_v25  ;;  %v6640_v39 = vld [vmem:[#allocation2 + $0x98] sm:$0x1]  ;;  %v8361_v25 = vld [vmem:[#allocation2 + $0xac] sm:$0xf]  ;;  %v4470_v57 = vrot.slane %v4468_v19, 5 }
 0x2c9   : > { %v3542_v36 = vrot.slane %v3540_v42, 4  ;;  %v3543_v0 = vrot.slane %v6640_v39, 5 }
 0x2ca   : > { %v5307_v44 = vadd.f32 %v5306_v11, %v5212_v2  ;;  %v5346_v33 = vmul.f32 %v5212_v2, %v5212_v2  ;;  %v4455_v11 = vor.u32 %v4454_v17, %v4451_v59  ;;  %v4960_v59 = vrot.slane %v8337_v43, 5 }
 0x2cb   : > { %v5137_v1 = vpop.f32.mrf.mxu0  ;;  %v4031_v45 = vpop.f32.mrf.mxu2  ;;  %v3541_v43 = vsel %vm7762_vm14, %v5971_v35, %v3540_v42 }
 0x2cc   : > { %v5377_v53 = vadd.f32 %v5376_v34, %v5346_v33  ;;  %v4107_v47 = vadd.f32 %v4031_v45, %v3793_v26  ;;  %v4712_v3 = vpop.f32.mrf.mxu3  ;;  %v5051_v34 = vpack.c.b16 %v5030_v55, %v5029_v37  ;;  %v4456_v8 = vrot.slane %v4455_v11, 4 }
 0x2cd   : > { %v3720_v63 = vpop.f32.mrf.mxu1  ;;  %v4473_v37 = vshrl.u32 %v4172_v10, 16 }
 0x2ce   : > { %v4788_v32 = vadd.f32 %v4712_v3, %v4107_v47  ;;  %v3794_v26 = vadd.f32 %v3720_v63, %v7973_v48  ;;  %v4476_v47 = vshll.u32 %v4172_v10, 16  ;;  %v4482_v3 = vshll.u32 %v8361_v25, 16 }
 0x2cf   : > { %v3544_v48 = vsel %vm7762_vm14, %v3542_v36, %v3543_v0  ;;  %v4962_v63 = vrot.slane %v4960_v59, 4  ;;  %v4461_v18 = vsel %vm7548_vm11, %v4456_v8, %v8354_v41  ;;  %v4475_v19 = vrot.slane %v4473_v37, 4  ;;  %v8380_v0 = vld [vmem:[#allocation2 + $0xb0] sm:$0x1] }
 0x2d0   : > { %v5213_v24 = vadd.f32 %v5137_v1, %v4788_v32  ;;  %3759 = vmatmul.bf16.gmra.mxu1 %v3631_v28  ;;  %4073 = vmatmul.bf16.gmra.mxu2 %v6282_v52  ;;  %v4828_v1 = vld [vmem:[#allocation2 + $0x9c] sm:$0xe]  ;;  %v4486_v52 = vshrl.u32 %v8361_v25, 16  ;;  %v4478_v32 = vrot.slane %v4476_v47, 5  ;;  %v8378_v42 = vrot.slane %v4482_v3, 5 }
 0x2d1   : > { %4754 = vmatmul.bf16.gmra.mxu3 %v4626_v30  ;;  %v4963_v30 = vrot.slane %v8357_v6, 5  ;;  %v3611_v36 = vunpack.c.l.b16 %v3541_v43  ;;  %v3612_v39 = vunpack.c.l.b16 %v3544_v48  ;;  %v4606_v6 = vunpack.c.l.b16 %v4461_v18 }
 0x2d2   : > { %v6320_v17 = vpack.c.bf16 %v5213_v24, %v5212_v2  ;;  %v5308_v54 = vadd.f32 %v5307_v44, %v5213_v24  ;;  %v5347_v33 = vmul.f32 %v5213_v24, %v5213_v24  ;;  %v6147_v44 = vrot.slane %v4828_v1, 9 }
 0x2d3   : > { %v5140_v45 = vpop.f32.mrf.mxu0  ;;  %v4034_v28 = vpop.f32.mrf.mxu2  ;;  %v4488_v35 = vrot.slane %v4486_v52, 4  ;;  %v4964_v41 = vsel %vm7762_vm14, %v4962_v63, %v4963_v30  ;;  %v4492_v47 = vshll.u32 %v8380_v0, 16  ;;  %v6642_v30 = vld [vmem:[#allocation2 + $0xa4] sm:$0x1] }
 0x2d4   : > { %6392 = vst [vmem:[%s7230_s12 + $0x8] sm:$0xff] %v6320_v17   ;;  %v5378_v55 = vadd.f32 %v5377_v53, %v5347_v33  ;;  %v4108_v38 = vadd.f32 %v4034_v28, %v3794_v26  ;;  %v4715_v40 = vpop.f32.mrf.mxu3  ;;  %v4471_v53 = vsel %vm7548_vm11, %v4466_v9, %v4470_v57  ;;  %v4961_v10 = vsel %vm7762_vm14, %v6147_v44, %v4960_v59  ;;  %v3409_v17 = vld [vmem:[#allocation2 + $0x9c] sm:$0xe]  ;;  %v6641_v33 = vld [vmem:[#allocation2 + $0xa0] sm:$0xf] }
 0x2d5   : > { %v3722_v2 = vpop.f32.mrf.mxu1  ;;  %v3547_v26 = vrot.slane %v6641_v33, 5  ;;  %v4479_v28 = vor.u32 %v4478_v32, %v4475_v19  ;;  %v4489_v37 = vor.u32 %v4488_v35, %v8378_v42  ;;  %v5031_v48 = vunpack.c.l.b16 %v4961_v10 }
 0x2d6   : > { %5179 = vmatmul.bf16.gmra.mxu0 %v5051_v34  ;;  %v4789_v11 = vadd.f32 %v4715_v40, %v4108_v38  ;;  %v4607_v34 = vunpack.c.l.b16 %v4471_v53  ;;  %v3795_v57 = vadd.f32 %v3722_v2, %v7981_v15  ;;  %v3632_v38 = vpack.c.b16 %v3612_v39, %v3611_v36  ;;  %v6283_v40 = vld [vmem:[#allocation2 + $0x9c] sm:$0xff] }
 0x2d7   : > { %v5032_v44 = vunpack.c.l.b16 %v4964_v41  ;;  %v5972_v15 = vrot.slane %v3409_v17, 9  ;;  %v3549_v63 = vrot.slane %v3547_v26, 4  ;;  %v4480_v18 = vrot.slane %v4479_v28, 4 }
 0x2d8   : > { %v5214_v24 = vadd.f32 %v5140_v45, %v4789_v11  ;;  %v3550_v11 = vrot.slane %v6642_v30, 5  ;;  %v4490_v53 = vrot.slane %v4489_v37, 4  ;;  %v4494_v19 = vrot.slane %v4492_v47, 5 }
 0x2d9   : > { %v4967_v35 = vrot.slane %v8361_v25, 5  ;;  %v5052_v36 = vpack.c.b16 %v5032_v44, %v5031_v48  ;;  %v3548_v39 = vsel %vm7762_vm14, %v5972_v15, %v3547_v26  ;;  %v4485_v25 = vsel %vm7548_vm11, %v4480_v18, %v8378_v42 }
 0x2da   : > { %v5309_v8 = vadd.f32 %v5308_v54, %v5214_v24  ;;  %v5348_v9 = vmul.f32 %v5214_v24, %v5214_v24  ;;  %v4627_v54 = vpack.c.b16 %v4607_v34, %v4606_v6  ;;  %v4495_v26 = vsel %vm7548_vm11, %v4490_v53, %v4494_v19 }
 0x2db   : > { %v5142_v1 = vpop.f32.mrf.mxu0  ;;  %v4036_v45 = vpop.f32.mrf.mxu2  ;;  %v4969_v28 = vrot.slane %v4967_v35, 4  ;;  %v4970_v37 = vrot.slane %v8380_v0, 5  ;;  %v4608_v48 = vunpack.c.l.b16 %v4485_v25  ;;  %v4609_v15 = vunpack.c.l.b16 %v4495_v26 }
 0x2dc   : > { %v5379_v3 = vadd.f32 %v5378_v55, %v5348_v9  ;;  %v4109_v52 = vadd.f32 %v4036_v45, %v3795_v57  ;;  %v4717_v59 = vpop.f32.mrf.mxu3  ;;  %v4829_v55 = vld [vmem:[#allocation2 + $0xa8] sm:$0xe]  ;;  %v4175_v9 = vld [vmem:[#allocation2 + $0xb4] sm:$0xf]  ;;  %v8393_v57 = vld [vmem:[#allocation2 + $0xb8] sm:$0xf] }
 0x2dd   : > { %v3725_v43 = vpop.f32.mrf.mxu1  ;;  %v4971_v0 = vsel %vm7762_vm14, %v4969_v28, %v4970_v37 }
 0x2de   : > { %v4790_v2 = vadd.f32 %v4717_v59, %v4109_v52  ;;  %v3796_v41 = vadd.f32 %v3725_v43, %v7988_v56  ;;  %v4497_v52 = vshrl.u32 %v4175_v9, 16  ;;  %v4500_v59 = vshll.u32 %v4175_v9, 16  ;;  %v6284_v9 = vld [vmem:[#allocation2 + $0xa8] sm:$0xff] }
 0x2df   : > { %v3613_v43 = vunpack.c.l.b16 %v3548_v39 }
 0x2e0   : > { %v5215_v32 = vadd.f32 %v5142_v1, %v4790_v2  ;;  %3764 = vmatmul.bf16.gmra.mxu1 %v3632_v38  ;;  %4078 = vmatmul.bf16.gmra.mxu2 %v6283_v40  ;;  %v3551_v1 = vsel %vm7762_vm14, %v3549_v63, %v3550_v11  ;;  %v4506_v38 = vshll.u32 %v8393_v57, 16  ;;  %v4510_v40 = vshrl.u32 %v8393_v57, 16 }
 0x2e1   : > { %4759 = vmatmul.bf16.gmra.mxu3 %v4627_v54  ;;  %v3614_v54 = vunpack.c.l.b16 %v3551_v1  ;;  %v4499_v2 = vrot.slane %v4497_v52, 4  ;;  %v4502_v63 = vrot.slane %v4500_v59, 5  ;;  %v6643_v1 = vld [vmem:[#allocation2 + $0xac] sm:$0xf]  ;;  %v6644_v52 = vld [vmem:[#allocation2 + $0xb0] sm:$0x1] }
 0x2e2   : > { %v6325_v6 = vpack.c.bf16 %v5215_v32, %v5214_v24  ;;  %v5310_v34 = vadd.f32 %v5309_v8, %v5215_v32  ;;  %v5349_v10 = vmul.f32 %v5215_v32, %v5215_v32  ;;  %v6148_v24 = vrot.slane %v4829_v55, 9  ;;  %v8413_v32 = vld [vmem:[#allocation2 + $0xbc] sm:$0x1] }
 0x2e3   : > { %v5145_v17 = vpop.f32.mrf.mxu0  ;;  %v4039_v33 = vpop.f32.mrf.mxu2  ;;  %v8410_v30 = vrot.slane %v4506_v38, 5  ;;  %v4512_v11 = vrot.slane %v4510_v40, 4  ;;  %v3633_v39 = vpack.c.b16 %v3614_v54, %v3613_v43  ;;  %v3554_v25 = vrot.slane %v6643_v1, 5  ;;  %v4178_v38 = vld [vmem:[#allocation2 + $0xc0] sm:$0xf] }
 0x2e4   : > { %6393 = vst [vmem:[%s7230_s12 + $0x10] sm:$0xff] %v6325_v6   ;;  %v5380_v8 = vadd.f32 %v5379_v3, %v5349_v10  ;;  %v4110_v45 = vadd.f32 %v4039_v33, %v3796_v41  ;;  %v4720_v56 = vpop.f32.mrf.mxu3  ;;  %v4968_v3 = vsel %vm7762_vm14, %v6148_v24, %v4967_v35  ;;  %v3410_v33 = vld [vmem:[#allocation2 + $0xa8] sm:$0xe]  ;;  %v4628_v24 = vpack.c.b16 %v4609_v15, %v4608_v48  ;;  %v8417_v40 = vld [vmem:[#allocation2 + $0xc4] sm:$0xf] }
 0x2e5   : > { %v3727_v47 = vpop.f32.mrf.mxu1  ;;  %v5033_v6 = vunpack.c.l.b16 %v4968_v3  ;;  %v5973_v28 = vrot.slane %v3410_v33, 9  ;;  %v3557_v59 = vrot.slane %v6644_v52, 5  ;;  %v4974_v48 = vrot.slane %v8393_v57, 5 }
 0x2e6   : > { %5184 = vmatmul.bf16.gmra.mxu0 %v5052_v36  ;;  %v4791_v42 = vadd.f32 %v4720_v56, %v4110_v45  ;;  %v3797_v19 = vadd.f32 %v3727_v47, %v7996_v29  ;;  %v4513_v45 = vor.u32 %v4512_v11, %v8410_v30  ;;  %v4516_v29 = vshll.u32 %v8413_v32, 16  ;;  %v4830_v11 = vld [vmem:[#allocation2 + $0xb4] sm:$0xe] }
 0x2e7   : > { %v3556_v47 = vrot.slane %v3554_v25, 4  ;;  %v3555_v57 = vsel %vm7762_vm14, %v5973_v28, %v3554_v25  ;;  %v4976_v33 = vrot.slane %v4974_v48, 4  ;;  %v4977_v1 = vrot.slane %v8413_v32, 5 }
 0x2e8   : > { %v5216_v44 = vadd.f32 %v5145_v17, %v4791_v42  ;;  %v5034_v17 = vunpack.c.l.b16 %v4971_v0  ;;  %v4514_v43 = vrot.slane %v4513_v45, 4  ;;  %v4518_v54 = vrot.slane %v4516_v29, 5 }
 0x2e9   : > { %v3615_v28 = vunpack.c.l.b16 %v3555_v57 }
 0x2ea   : > { %v5311_v18 = vadd.f32 %v5310_v34, %v5216_v44  ;;  %v5350_v53 = vmul.f32 %v5216_v44, %v5216_v44  ;;  %v4503_v34 = vor.u32 %v4502_v63, %v4499_v2  ;;  %v8710_v2 = vld [vmem:[#allocation27_spill] sm:$0xff] }
 0x2eb   : > { %v5147_v55 = vpop.f32.mrf.mxu0  ;;  %v4041_v36 = vpop.f32.mrf.mxu2 }
 0x2ec   : > { %v5381_v10 = vadd.f32 %v5380_v8, %v5350_v53  ;;  %v4111_v35 = vadd.f32 %v4041_v36, %v3797_v19  ;;  %v4722_v41 = vpop.f32.mrf.mxu3  ;;  %v5053_v8 = vpack.c.b16 %v5034_v17, %v5033_v6  ;;  %v4504_v42 = vrot.slane %v4503_v34, 4 }
 0x2ed   : > { %v3730_v26 = vpop.f32.mrf.mxu1  ;;  %v4524_v36 = vshll.u32 %v4178_v38, 16  ;;  %v4534_v6 = vshrl.u32 %v8417_v40, 16  ;;  %v6149_v17 = vrot.slane %v4830_v11, 9 }
 0x2ee   : > { %v4792_v56 = vadd.f32 %v4722_v41, %v4111_v35  ;;  %v3798_v63 = vadd.f32 %v3730_v26, %v8710_v2 }
 0x2ef   : > { %v4526_v45 = vrot.slane %v4524_v36, 5  ;;  %v4536_v29 = vrot.slane %v4534_v6, 4  ;;  %v4975_v52 = vsel %vm7762_vm14, %v6149_v17, %v4974_v48  ;;  %v6285_v6 = vld [vmem:[#allocation2 + $0xb4] sm:$0xff] }
 0x2f0   : > { %v5217_v37 = vadd.f32 %v5147_v55, %v4792_v56  ;;  %3769 = vmatmul.bf16.gmra.mxu1 %v3633_v39  ;;  %4083 = vmatmul.bf16.gmra.mxu2 %v6284_v9  ;;  %v4521_v55 = vshrl.u32 %v4178_v38, 16  ;;  %v4530_v39 = vshll.u32 %v8417_v40, 16 }
 0x2f1   : > { %4764 = vmatmul.bf16.gmra.mxu3 %v4628_v24  ;;  %v4509_v24 = vsel %vm7548_vm11, %v4504_v42, %v8410_v30  ;;  %v4978_v30 = vsel %vm7762_vm14, %v4976_v33, %v4977_v1  ;;  %v8711_v42 = vld [vmem:[#allocation28_spill] sm:$0xff]  ;;  %v6646_v33 = vld [vmem:[#allocation2 + $0xbc] sm:$0x1] }
 0x2f2   : > { %v6330_v15 = vpack.c.bf16 %v5217_v37, %v5216_v44  ;;  %v5312_v3 = vadd.f32 %v5311_v18, %v5217_v37  ;;  %v5351_v0 = vmul.f32 %v5217_v37, %v5217_v37  ;;  %v3558_v18 = vsel %vm7762_vm14, %v3556_v47, %v3557_v59  ;;  %v8436_v47 = vld [vmem:[#allocation2 + $0xc8] sm:$0x1] }
 0x2f3   : > { %v5150_v53 = vpop.f32.mrf.mxu0  ;;  %v4044_v19 = vpop.f32.mrf.mxu2  ;;  %v4523_v34 = vrot.slane %v4521_v55, 4  ;;  %v8434_v25 = vrot.slane %v4530_v39, 5  ;;  %v3616_v37 = vunpack.c.l.b16 %v3558_v18  ;;  %v4610_v32 = vunpack.c.l.b16 %v4509_v24 }
 0x2f4   : > { %6394 = vst [vmem:[%s7230_s12 + $0x18] sm:$0xff] %v6330_v15   ;;  %v5382_v35 = vadd.f32 %v5381_v10, %v5351_v0  ;;  %v4112_v41 = vadd.f32 %v4044_v19, %v3798_v63  ;;  %v4725_v9 = vpop.f32.mrf.mxu3  ;;  %v4519_v10 = vsel %vm7548_vm11, %v4514_v43, %v4518_v54  ;;  %v3411_v54 = vld [vmem:[#allocation2 + $0xb4] sm:$0xe]  ;;  %v6645_v15 = vld [vmem:[#allocation2 + $0xb8] sm:$0xf]  ;;  %v4540_v19 = vshll.u32 %v8436_v47, 16 }
 0x2f5   : > { %v3732_v44 = vpop.f32.mrf.mxu1  ;;  %v3561_v0 = vrot.slane %v6645_v15, 5  ;;  %v4527_v11 = vor.u32 %v4526_v45, %v4523_v34  ;;  %v3634_v39 = vpack.c.b16 %v3616_v37, %v3615_v28  ;;  %v5036_v57 = vunpack.c.l.b16 %v4978_v30 }
 0x2f6   : > { %5189 = vmatmul.bf16.gmra.mxu0 %v5053_v8  ;;  %v4793_v26 = vadd.f32 %v4725_v9, %v4112_v41  ;;  %v4611_v8 = vunpack.c.l.b16 %v4519_v10  ;;  %v3799_v43 = vadd.f32 %v3732_v44, %v8711_v42  ;;  %v5035_v9 = vunpack.c.l.b16 %v4975_v52  ;;  %v8712_v52 = vld [vmem:[#allocation29_spill] sm:$0xff] }
 0x2f7   : > { %v5974_v44 = vrot.slane %v3411_v54, 9  ;;  %v3563_v17 = vrot.slane %v3561_v0, 4  ;;  %v3564_v1 = vrot.slane %v6646_v33, 5  ;;  %v4542_v10 = vrot.slane %v4540_v19, 5  ;;  %v8449_v42 = vld [vmem:[#allocation2 + $0xd0] sm:$0xf] }
 0x2f8   : > { %v5218_v56 = vadd.f32 %v5150_v53, %v4793_v26  ;;  %v4537_v53 = vor.u32 %v4536_v29, %v8434_v25  ;;  %v4528_v26 = vrot.slane %v4527_v11, 4  ;;  %v4981_v45 = vrot.slane %v8417_v40, 5 }
 0x2f9   : > { %v5054_v29 = vpack.c.b16 %v5036_v57, %v5035_v9  ;;  %v3562_v28 = vsel %vm7762_vm14, %v5974_v44, %v3561_v0  ;;  %v3565_v15 = vsel %vm7762_vm14, %v3563_v17, %v3564_v1 }
 0x2fa   : > { %v5313_v59 = vadd.f32 %v5312_v3, %v5218_v56  ;;  %v5352_v38 = vmul.f32 %v5218_v56, %v5218_v56  ;;  %v4629_v3 = vpack.c.b16 %v4611_v8, %v4610_v32  ;;  %v4538_v24 = vrot.slane %v4537_v53, 4 }
 0x2fb   : > { %v5152_v2 = vpop.f32.mrf.mxu0  ;;  %v4046_v63 = vpop.f32.mrf.mxu2  ;;  %v4533_v40 = vsel %vm7548_vm11, %v4528_v26, %v8434_v25  ;;  %v4983_v11 = vrot.slane %v4981_v45, 4  ;;  %v4984_v53 = vrot.slane %v8436_v47, 5 }
 0x2fc   : > { %v5383_v55 = vadd.f32 %v5382_v35, %v5352_v38  ;;  %v4113_v36 = vadd.f32 %v4046_v63, %v3799_v43  ;;  %v4727_v48 = vpop.f32.mrf.mxu3  ;;  %v4831_v35 = vld [vmem:[#allocation2 + $0xc0] sm:$0xe]  ;;  %v4181_v38 = vld [vmem:[#allocation2 + $0xcc] sm:$0xf]  ;;  %v4543_v0 = vsel %vm7548_vm11, %v4538_v24, %v4542_v10  ;;  %v4612_v9 = vunpack.c.l.b16 %v4533_v40 }
 0x2fd   : > { %v3735_v41 = vpop.f32.mrf.mxu1  ;;  %v4613_v44 = vunpack.c.l.b16 %v4543_v0  ;;  %v4985_v47 = vsel %vm7762_vm14, %v4983_v11, %v4984_v53  ;;  %v3412_v0 = vld [vmem:[#allocation2 + $0xc0] sm:$0xe] }
 0x2fe   : > { %v4794_v18 = vadd.f32 %v4727_v48, %v4113_v36  ;;  %v3800_v30 = vadd.f32 %v3735_v41, %v8712_v52  ;;  %v4545_v36 = vshrl.u32 %v4181_v38, 16  ;;  %v4548_v48 = vshll.u32 %v4181_v38, 16  ;;  %v6286_v38 = vld [vmem:[#allocation2 + $0xc0] sm:$0xff] }
 0x2ff   : > { %v3617_v41 = vunpack.c.l.b16 %v3562_v28  ;;  %v4630_v40 = vpack.c.b16 %v4613_v44, %v4612_v9  ;;  %v5975_v53 = vrot.slane %v3412_v0, 9 }
 0x300   : > { %v5219_v34 = vadd.f32 %v5152_v2, %v4794_v18  ;;  %3774 = vmatmul.bf16.gmra.mxu1 %v3634_v39  ;;  %4088 = vmatmul.bf16.gmra.mxu2 %v6285_v6  ;;  %v4554_v39 = vshll.u32 %v8449_v42, 16  ;;  %v4558_v6 = vshrl.u32 %v8449_v42, 16  ;;  %v4547_v18 = vrot.slane %v4545_v36, 4 }
 0x301   : > { %4769 = vmatmul.bf16.gmra.mxu3 %v4629_v3  ;;  %v3618_v3 = vunpack.c.l.b16 %v3565_v15  ;;  %v4550_v17 = vrot.slane %v4548_v48, 5 }
 0x302   : > { %v6335_v37 = vpack.c.bf16 %v5219_v34, %v5218_v56  ;;  %v5314_v32 = vadd.f32 %v5313_v59, %v5219_v34  ;;  %v5353_v8 = vmul.f32 %v5219_v34, %v5219_v34  ;;  %v6150_v56 = vrot.slane %v4831_v35, 9  ;;  %v8467_v34 = vld [vmem:[#allocation2 + $0xd4] sm:$0x1] }
 0x303   : > { %v5155_v43 = vpop.f32.mrf.mxu0  ;;  %v4049_v54 = vpop.f32.mrf.mxu2  ;;  %v4556_v33 = vrot.slane %v4554_v39, 5  ;;  %v4560_v1 = vrot.slane %v4558_v6, 4 }
 0x304   : > { %6395 = vst [vmem:[%s7230_s12 + $0x20] sm:$0xff] %v6335_v37   ;;  %v5384_v59 = vadd.f32 %v5383_v55, %v5353_v8  ;;  %v4114_v2 = vadd.f32 %v4049_v54, %v3800_v30  ;;  %v4730_v63 = vpop.f32.mrf.mxu3  ;;  %v4982_v55 = vsel %vm7762_vm14, %v6150_v56, %v4981_v45  ;;  %v5038_v37 = vunpack.c.l.b16 %v4985_v47 }
 0x305   : > { %v3737_v19 = vpop.f32.mrf.mxu1  ;;  %v5037_v28 = vunpack.c.l.b16 %v4982_v55  ;;  %v3635_v30 = vpack.c.b16 %v3618_v3, %v3617_v41  ;;  %v4561_v56 = vor.u32 %v4560_v1, %v4556_v33  ;;  %v4832_v55 = vld [vmem:[#allocation2 + $0xcc] sm:$0xe] }
 0x306   : > { %5194 = vmatmul.bf16.gmra.mxu0 %v5054_v29  ;;  %v4795_v25 = vadd.f32 %v4730_v63, %v4114_v2  ;;  %v3801_v10 = vadd.f32 %v3737_v19, %v8034_v61  ;;  %v4564_v61 = vshll.u32 %v8467_v34, 16  ;;  %v6648_v19 = vld [vmem:[#allocation2 + $0xc8] sm:$0x1] }
 0x307   : > { %v5055_v63 = vpack.c.b16 %v5038_v37, %v5037_v28  ;;  %v3571_v36 = vrot.slane %v6648_v19, 5  ;;  %v4562_v39 = vrot.slane %v4561_v56, 4  ;;  %v4991_v37 = vrot.slane %v8467_v34, 5 }
 0x308   : > { %v5220_v57 = vadd.f32 %v5155_v43, %v4795_v25  ;;  %v6647_v43 = vld [vmem:[#allocation2 + $0xc4] sm:$0xf]  ;;  %v4566_v6 = vrot.slane %v4564_v61, 5  ;;  %v4988_v25 = vrot.slane %v8449_v42, 5 }
 0x309   : > { %v3568_v54 = vrot.slane %v6647_v43, 5 }
 0x30a   : > { %v5315_v26 = vadd.f32 %v5314_v32, %v5220_v57  ;;  %v5354_v24 = vmul.f32 %v5220_v57, %v5220_v57  ;;  %v4551_v32 = vor.u32 %v4550_v17, %v4547_v18  ;;  %v4990_v28 = vrot.slane %v4988_v25, 4 }
 0x30b   : > { %v5157_v35 = vpop.f32.mrf.mxu0  ;;  %v4051_v29 = vpop.f32.mrf.mxu2 }
 0x30c   : > { %v5385_v8 = vadd.f32 %v5384_v59, %v5354_v24  ;;  %v4115_v52 = vadd.f32 %v4051_v29, %v3801_v10  ;;  %v4732_v45 = vpop.f32.mrf.mxu3  ;;  %v3570_v59 = vrot.slane %v3568_v54, 4  ;;  %v4552_v48 = vrot.slane %v4551_v32, 4 }
 0x30d   : > { %v3740_v15 = vpop.f32.mrf.mxu1 }
 0x30e   : > { %v4796_v2 = vadd.f32 %v4732_v45, %v4115_v52  ;;  %v3802_v44 = vadd.f32 %v3740_v15, %v8047_v49  ;;  %v3572_v29 = vsel %vm7762_vm14, %v3570_v59, %v3571_v36  ;;  %v4557_v42 = vsel %vm7548_vm11, %v4552_v48, %v4556_v33 }
 0x30f   : > { %v3620_v45 = vunpack.c.l.b16 %v3572_v29 }
 0x310   : > { %v5221_v11 = vadd.f32 %v5157_v35, %v4796_v2  ;;  %3779 = vmatmul.bf16.gmra.mxu1 %v3635_v30  ;;  %4093 = vmatmul.bf16.gmra.mxu2 %v6286_v38  ;;  %v3569_v35 = vsel %vm7762_vm14, %v5975_v53, %v3568_v54  ;;  %v4614_v30 = vunpack.c.l.b16 %v4557_v42  ;;  %v6287_v2 = vld [vmem:[#allocation2 + $0xcc] sm:$0xff] }
 0x311   : > { %4774 = vmatmul.bf16.gmra.mxu3 %v4630_v40  ;;  %v3619_v52 = vunpack.c.l.b16 %v3569_v35  ;;  %v4992_v40 = vsel %vm7762_vm14, %v4990_v28, %v4991_v37 }
 0x312   : > { %v6340_v41 = vpack.c.bf16 %v5221_v11, %v5220_v57  ;;  %v5316_v3 = vadd.f32 %v5315_v26, %v5221_v11  ;;  %v5355_v9 = vmul.f32 %v5221_v11, %v5221_v11  ;;  %v6151_v57 = vrot.slane %v4832_v55, 9 }
 0x313   : > { %v5160_v47 = vpop.f32.mrf.mxu0  ;;  %v4054_v18 = vpop.f32.mrf.mxu2  ;;  %v4567_v26 = vsel %vm7548_vm11, %v4562_v39, %v4566_v6  ;;  %v3636_v61 = vpack.c.b16 %v3620_v45, %v3619_v52  ;;  %v5040_v59 = vunpack.c.l.b16 %v4992_v40 }
 0x314   : > { %6396 = vst [vmem:[%s7230_s12 + $0x28] sm:$0xff] %v6340_v41   ;;  %v5386_v17 = vadd.f32 %v5385_v8, %v5355_v9  ;;  %v4116_v1 = vadd.f32 %v4054_v18, %v3802_v44  ;;  %v4735_v24 = vpop.f32.mrf.mxu3  ;;  %v4615_v38 = vunpack.c.l.b16 %v4567_v26  ;;  %v4989_v43 = vsel %vm7762_vm14, %v6151_v57, %v4988_v25 }
 0x315   : > { %v3742_v10 = vpop.f32.mrf.mxu1  ;;  %v5039_v53 = vunpack.c.l.b16 %v4989_v43 }
 0x316   : > { %5199 = vmatmul.bf16.gmra.mxu0 %v5055_v63  ;;  %v4797_v49 = vadd.f32 %v4735_v24, %v4116_v1  ;;  %v3803_v33 = vadd.f32 %v3742_v10, %v8054_v4  ;;  %v4631_v11 = vpack.c.b16 %v4615_v38, %v4614_v30 }
 0x317   : > { %v5056_v4 = vpack.c.b16 %v5040_v59, %v5039_v53 }
 0x318   : > { %v5222_v8 = vadd.f32 %v5160_v47, %v4797_v49 }
 0x31a   : > { %v5317_v54 = vadd.f32 %v5316_v3, %v5222_v8  ;;  %v5356_v15 = vmul.f32 %v5222_v8, %v5222_v8 }
 0x31b   : > { %v5162_v20 = vpop.f32.mrf.mxu0  ;;  %v4056_v0 = vpop.f32.mrf.mxu2 }
 0x31c   : > { %v5387_v32 = vadd.f32 %v5386_v17, %v5356_v15  ;;  %v4117_v56 = vadd.f32 %v4056_v0, %v3803_v33  ;;  %v4737_v34 = vpop.f32.mrf.mxu3 }
 0x31d   : > { %v3745_v63 = vpop.f32.mrf.mxu1 }
 0x31e   : > { %v4798_v19 = vadd.f32 %v4737_v34, %v4117_v56  ;;  %v3804_v6 = vadd.f32 %v3745_v63, %v8066_v50 }
 0x320   : > { %v5223_v36 = vadd.f32 %v5162_v20, %v4798_v19  ;;  %3784 = vmatmul.bf16.gmra.mxu1 %v3636_v61  ;;  %4098 = vmatmul.bf16.gmra.mxu2 %v6287_v2 }
 0x321   : > { %4779 = vmatmul.bf16.gmra.mxu3 %v4631_v11 }
 0x322   : > { %v6345_v46 = vpack.c.bf16 %v5223_v36, %v5222_v8  ;;  %v5318_v48 = vadd.f32 %v5317_v54, %v5223_v36  ;;  %v5357_v39 = vmul.f32 %v5223_v36, %v5223_v36 }
 0x323   : > { %v5165_v25 = vpop.f32.mrf.mxu0  ;;  %v4059_v41 = vpop.f32.mrf.mxu2 }
 0x324   : > { %6397 = vst [vmem:[%s7230_s12 + $0x30] sm:$0xff] %v6345_v46   ;;  %v5388_v3 = vadd.f32 %v5387_v32, %v5357_v39  ;;  %v4118_v9 = vadd.f32 %v4059_v41, %v3804_v6  ;;  %v4740_v44 = vpop.f32.mrf.mxu3 }
 0x325   : > { %v3747_v55 = vpop.f32.mrf.mxu1 }
 0x326   : > { %5204 = vmatmul.bf16.gmra.mxu0 %v5056_v4  ;;  %v4799_v47 = vadd.f32 %v4740_v44, %v4118_v9  ;;  %v3805_v24 = vadd.f32 %v3747_v55, %v8077_v16 }
 0x328   : > { %v5224_v18 = vadd.f32 %v5165_v25, %v4799_v47 }
 0x32a   : > { %v5319_v17 = vadd.f32 %v5318_v48, %v5224_v18  ;;  %v5358_v1 = vmul.f32 %v5224_v18, %v5224_v18 }
 0x32b   : > { %v5167_v10 = vpop.f32.mrf.mxu0  ;;  %v4061_v35 = vpop.f32.mrf.mxu2 }
 0x32c   : > { %v5389_v29 = vadd.f32 %v5388_v3, %v5358_v1  ;;  %v4119_v42 = vadd.f32 %v4061_v35, %v3805_v24  ;;  %v4742_v50 = vpop.f32.mrf.mxu3 }
 0x32d   : > { %v3750_v57 = vpop.f32.mrf.mxu1 }
 0x32e   : > { %v4800_v49 = vadd.f32 %v4742_v50, %v4119_v42  ;;  %v3806_v52 = vadd.f32 %v3750_v57, %v8094_v14 }
 0x330   : > { %v5225_v26 = vadd.f32 %v5167_v10, %v4800_v49 }
 0x332   : > { %v6350_v28 = vpack.c.bf16 %v5225_v26, %v5224_v18  ;;  %v5320_v37 = vadd.f32 %v5319_v17, %v5225_v26  ;;  %v5359_v8 = vmul.f32 %v5225_v26, %v5225_v26 }
 0x333   : > { %v5170_v45 = vpop.f32.mrf.mxu0  ;;  %v4064_v30 = vpop.f32.mrf.mxu2 }
 0x334   : > { %6398 = vst [vmem:[%s7230_s12 + $0x38] sm:$0xff] %v6350_v28   ;;  %v5390_v38 = vadd.f32 %v5389_v29, %v5359_v8  ;;  %v4120_v43 = vadd.f32 %v4064_v30, %v3806_v52  ;;  %v4745_v54 = vpop.f32.mrf.mxu3 }
 0x335   : > { %v3752_v16 = vpop.f32.mrf.mxu1 }
 0x336   : > { %v4801_v15 = vadd.f32 %v4745_v54, %v4120_v43  ;;  %v3807_v0 = vadd.f32 %v3752_v16, %v8104_v58 }
 0x338   : > { %v5226_v33 = vadd.f32 %v5170_v45, %v4801_v15 }
 0x33a   : > { %v5321_v40 = vadd.f32 %v5320_v37, %v5226_v33  ;;  %v5360_v20 = vmul.f32 %v5226_v33, %v5226_v33 }
 0x33b   : > { %v5172_v32 = vpop.f32.mrf.mxu0  ;;  %v4066_v56 = vpop.f32.mrf.mxu2 }
 0x33c   : > { %v5391_v34 = vadd.f32 %v5390_v38, %v5360_v20  ;;  %v4121_v61 = vadd.f32 %v4066_v56, %v3807_v0  ;;  %v4747_v2 = vpop.f32.mrf.mxu3 }
 0x33d   : > { %v3755_v14 = vpop.f32.mrf.mxu1 }
 0x33e   : > { %v4802_v63 = vadd.f32 %v4747_v2, %v4121_v61  ;;  %v3808_v36 = vadd.f32 %v3755_v14, %v8121_v62 }
 0x340   : > { %v5227_v11 = vadd.f32 %v5172_v32, %v4802_v63 }
 0x342   : > { %v6355_v53 = vpack.c.bf16 %v5227_v11, %v5226_v33  ;;  %v5322_v59 = vadd.f32 %v5321_v40, %v5227_v11  ;;  %v5361_v19 = vmul.f32 %v5227_v11, %v5227_v11 }
 0x343   : > { %v5175_v4 = vpop.f32.mrf.mxu0  ;;  %v4069_v46 = vpop.f32.mrf.mxu2 }
 0x344   : > { %6399 = vst [vmem:[%s7230_s12 + $0x40] sm:$0xff] %v6355_v53   ;;  %v5392_v48 = vadd.f32 %v5391_v34, %v5361_v19  ;;  %v4122_v39 = vadd.f32 %v4069_v46, %v3808_v36  ;;  %v4750_v6 = vpop.f32.mrf.mxu3 }
 0x345   : > { %v3757_v58 = vpop.f32.mrf.mxu1 }
 0x346   : > { %v4803_v25 = vadd.f32 %v4750_v6, %v4122_v39  ;;  %v3809_v44 = vadd.f32 %v3757_v58, %v8131_v7 }
 0x348   : > { %v5228_v41 = vadd.f32 %v5175_v4, %v4803_v25 }
 0x34a   : > { %v5323_v3 = vadd.f32 %v5322_v59, %v5228_v41  ;;  %v5362_v9 = vmul.f32 %v5228_v41, %v5228_v41 }
 0x34b   : > { %v5177_v55 = vpop.f32.mrf.mxu0  ;;  %v4071_v47 = vpop.f32.mrf.mxu2 }
 0x34c   : > { %v5393_v18 = vadd.f32 %v5392_v48, %v5362_v9  ;;  %v4123_v17 = vadd.f32 %v4071_v47, %v3809_v44  ;;  %v4752_v1 = vpop.f32.mrf.mxu3 }
 0x34d   : > { %v3760_v62 = vpop.f32.mrf.mxu1 }
 0x34e   : > { %v4804_v24 = vadd.f32 %v4752_v1, %v4123_v17  ;;  %v3810_v50 = vadd.f32 %v3760_v62, %v8148_v21 }
 0x350   : > { %v5229_v10 = vadd.f32 %v5177_v55, %v4804_v24 }
 0x352   : > { %v6360_v35 = vpack.c.bf16 %v5229_v10, %v5228_v41  ;;  %v5324_v29 = vadd.f32 %v5323_v3, %v5229_v10  ;;  %v5363_v42 = vmul.f32 %v5229_v10, %v5229_v10 }
 0x353   : > { %v5180_v57 = vpop.f32.mrf.mxu0  ;;  %v4074_v49 = vpop.f32.mrf.mxu2 }
 0x354   : > { %6400 = vst [vmem:[%s7230_s12 + $0x48] sm:$0xff] %v6360_v35   ;;  %v5394_v26 = vadd.f32 %v5393_v18, %v5363_v42  ;;  %v4124_v28 = vadd.f32 %v4074_v49, %v3810_v50  ;;  %v4755_v37 = vpop.f32.mrf.mxu3 }
 0x355   : > { %v3762_v7 = vpop.f32.mrf.mxu1 }
 0x356   : > { %v4805_v8 = vadd.f32 %v4755_v37, %v4124_v28  ;;  %v3811_v38 = vadd.f32 %v3762_v7, %v8158_v51 }
 0x358   : > { %v5230_v52 = vadd.f32 %v5180_v57, %v4805_v8 }
 0x35a   : > { %v5325_v45 = vadd.f32 %v5324_v29, %v5230_v52  ;;  %v5364_v30 = vmul.f32 %v5230_v52, %v5230_v52 }
 0x35b   : > { %v5182_v43 = vpop.f32.mrf.mxu0  ;;  %v4076_v54 = vpop.f32.mrf.mxu2 }
 0x35c   : > { %v5395_v16 = vadd.f32 %v5394_v26, %v5364_v30  ;;  %v4125_v15 = vadd.f32 %v4076_v54, %v3811_v38  ;;  %v4757_v33 = vpop.f32.mrf.mxu3 }
 0x35d   : > { %v3765_v21 = vpop.f32.mrf.mxu1 }
 0x35e   : > { %v4806_v40 = vadd.f32 %v4757_v33, %v4125_v15  ;;  %v3812_v34 = vadd.f32 %v3765_v21, %v8175_v60 }
 0x360   : > { %v5231_v20 = vadd.f32 %v5182_v43, %v4806_v40 }
 0x362   : > { %v6365_v0 = vpack.c.bf16 %v5231_v20, %v5230_v52  ;;  %v5326_v32 = vadd.f32 %v5325_v45, %v5231_v20  ;;  %v5365_v56 = vmul.f32 %v5231_v20, %v5231_v20 }
 0x363   : > { %v5185_v61 = vpop.f32.mrf.mxu0  ;;  %v4079_v2 = vpop.f32.mrf.mxu2 }
 0x364   : > { %6401 = vst [vmem:[%s7230_s12 + $0x50] sm:$0xff] %v6365_v0   ;;  %v5396_v14 = vadd.f32 %v5395_v16, %v5365_v56  ;;  %v4126_v63 = vadd.f32 %v4079_v2, %v3812_v34  ;;  %v4760_v11 = vpop.f32.mrf.mxu3 }
 0x365   : > { %v3767_v51 = vpop.f32.mrf.mxu1 }
 0x366   : > { %v4807_v53 = vadd.f32 %v4760_v11, %v4126_v63  ;;  %v3813_v4 = vadd.f32 %v3767_v51, %v8185_v12 }
 0x368   : > { %v5232_v59 = vadd.f32 %v5185_v61, %v4807_v53 }
 0x36a   : > { %v5327_v19 = vadd.f32 %v5326_v32, %v5232_v59  ;;  %v5366_v36 = vmul.f32 %v5232_v59, %v5232_v59 }
 0x36b   : > { %v5187_v46 = vpop.f32.mrf.mxu0  ;;  %v4081_v48 = vpop.f32.mrf.mxu2 }
 0x36c   : > { %v5397_v39 = vadd.f32 %v5396_v14, %v5366_v36  ;;  %v4127_v6 = vadd.f32 %v4081_v48, %v3813_v4  ;;  %v4762_v58 = vpop.f32.mrf.mxu3 }
 0x36d   : > { %v3770_v60 = vpop.f32.mrf.mxu1 }
 0x36e   : > { %v4808_v25 = vadd.f32 %v4762_v58, %v4127_v6  ;;  %v3814_v55 = vadd.f32 %v3770_v60, %v8202_v5 }
 0x370   : > { %v5233_v41 = vadd.f32 %v5187_v46, %v4808_v25 }
 0x372   : > { %v6370_v3 = vpack.c.bf16 %v5233_v41, %v5232_v59  ;;  %v5328_v9 = vadd.f32 %v5327_v19, %v5233_v41  ;;  %v5367_v44 = vmul.f32 %v5233_v41, %v5233_v41 }
 0x373   : > { %v5190_v47 = vpop.f32.mrf.mxu0  ;;  %v4084_v18 = vpop.f32.mrf.mxu2 }
 0x374   : > { %6402 = vst [vmem:[%s7230_s12 + $0x58] sm:$0xff] %v6370_v3   ;;  %v5398_v17 = vadd.f32 %v5397_v39, %v5367_v44  ;;  %v4128_v1 = vadd.f32 %v4084_v18, %v3814_v55  ;;  %v4765_v62 = vpop.f32.mrf.mxu3 }
 0x375   : > { %v3772_v12 = vpop.f32.mrf.mxu1 }
 0x376   : > { %v4809_v24 = vadd.f32 %v4765_v62, %v4128_v1  ;;  %v3815_v42 = vadd.f32 %v3772_v12, %v8212_v13  ;;  %v8714_v12 = vld [vmem:[#allocation30_spill] sm:$0xff] }
 0x378   : > { %v5234_v10 = vadd.f32 %v5190_v47, %v4809_v24 }
 0x37a   : > { %v5329_v35 = vadd.f32 %v5328_v9, %v5234_v10  ;;  %v5368_v29 = vmul.f32 %v5234_v10, %v5234_v10 }
 0x37b   : > { %v5192_v50 = vpop.f32.mrf.mxu0  ;;  %v4086_v57 = vpop.f32.mrf.mxu2 }
 0x37c   : > { %v5399_v49 = vadd.f32 %v5398_v17, %v5368_v29  ;;  %v4129_v26 = vadd.f32 %v4086_v57, %v3815_v42  ;;  %v4767_v28 = vpop.f32.mrf.mxu3 }
 0x37d   : > { %v3775_v5 = vpop.f32.mrf.mxu1 }
 0x37e   : > { %v4810_v37 = vadd.f32 %v4767_v28, %v4129_v26  ;;  %v3816_v30 = vadd.f32 %v3775_v5, %v8229_v31  ;;  %v8715_v5 = vld [vmem:[#allocation31_spill] sm:$0xff] }
 0x380   : > { %v5235_v7 = vadd.f32 %v5192_v50, %v4810_v37 }
 0x382   : > { %v6375_v8 = vpack.c.bf16 %v5235_v7, %v5234_v10  ;;  %v5330_v52 = vadd.f32 %v5329_v35, %v5235_v7  ;;  %v5369_v45 = vmul.f32 %v5235_v7, %v5235_v7 }
 0x383   : > { %v5195_v38 = vpop.f32.mrf.mxu0  ;;  %v4089_v43 = vpop.f32.mrf.mxu2 }
 0x384   : > { %6403 = vst [vmem:[%s7230_s12 + $0x60] sm:$0xff] %v6375_v8   ;;  %v5400_v54 = vadd.f32 %v5399_v49, %v5369_v45  ;;  %v4130_v16 = vadd.f32 %v4089_v43, %v3816_v30  ;;  %v4770_v15 = vpop.f32.mrf.mxu3 }
 0x385   : > { %v3777_v13 = vpop.f32.mrf.mxu1 }
 0x386   : > { %v4811_v33 = vadd.f32 %v4770_v15, %v4130_v16  ;;  %v3817_v0 = vadd.f32 %v3777_v13, %v8244_v22 }
 0x388   : > { %v5236_v21 = vadd.f32 %v5195_v38, %v4811_v33 }
 0x38a   : > { %v5331_v40 = vadd.f32 %v5330_v52, %v5236_v21  ;;  %v5370_v20 = vmul.f32 %v5236_v21, %v5236_v21 }
 0x38b   : > { %v5197_v32 = vpop.f32.mrf.mxu0  ;;  %v4091_v56 = vpop.f32.mrf.mxu2 }
 0x38c   : > { %v5401_v34 = vadd.f32 %v5400_v54, %v5370_v20  ;;  %v4131_v61 = vadd.f32 %v4091_v56, %v3817_v0  ;;  %v4772_v2 = vpop.f32.mrf.mxu3 }
 0x38d   : > { %v3780_v31 = vpop.f32.mrf.mxu1 }
 0x38e   : > { %v4812_v14 = vadd.f32 %v4772_v2, %v4131_v61  ;;  %v3818_v59 = vadd.f32 %v3780_v31, %v8262_v23 }
 0x390   : > { %v5237_v63 = vadd.f32 %v5197_v32, %v4812_v14 }
 0x392   : > { %v6380_v11 = vpack.c.bf16 %v5237_v63, %v5236_v21  ;;  %v5332_v51 = vadd.f32 %v5331_v40, %v5237_v63  ;;  %v5371_v53 = vmul.f32 %v5237_v63, %v5237_v63 }
 0x393   : > { %v5200_v19 = vpop.f32.mrf.mxu0  ;;  %v4094_v36 = vpop.f32.mrf.mxu2 }
 0x394   : > { %6404 = vst [vmem:[%s7230_s12 + $0x68] sm:$0xff] %v6380_v11   ;;  %v5402_v4 = vadd.f32 %v5401_v34, %v5371_v53  ;;  %v4132_v46 = vadd.f32 %v4094_v36, %v3818_v59  ;;  %v4775_v48 = vpop.f32.mrf.mxu3 }
 0x395   : > { %v3782_v22 = vpop.f32.mrf.mxu1 }
 0x396   : > { %v4813_v39 = vadd.f32 %v4775_v48, %v4132_v46  ;;  %v3819_v25 = vadd.f32 %v3782_v22, %v8273_v27 }
 0x398   : > { %v5238_v6 = vadd.f32 %v5200_v19, %v4813_v39 }
 0x39a   : > { %v5333_v58 = vadd.f32 %v5332_v51, %v5238_v6  ;;  %v5372_v60 = vmul.f32 %v5238_v6, %v5238_v6 }
 0x39b   : > { %v5202_v41 = vpop.f32.mrf.mxu0  ;;  %v4096_v3 = vpop.f32.mrf.mxu2 }
 0x39c   : > { %v5403_v9 = vadd.f32 %v5402_v4, %v5372_v60  ;;  %v4133_v44 = vadd.f32 %v4096_v3, %v3819_v25  ;;  %v4777_v23 = vpop.f32.mrf.mxu3 }
 0x39d   : > { %v3785_v55 = vpop.f32.mrf.mxu1 }
 0x39e   : > { %v4814_v47 = vadd.f32 %v4777_v23, %v4133_v44  ;;  %v3820_v24 = vadd.f32 %v3785_v55, %v8714_v12 }
 0x3a0   : > { %v5239_v18 = vadd.f32 %v5202_v41, %v4814_v47 }
 0x3a2   : > { %v6385_v17 = vpack.c.bf16 %v5239_v18, %v5238_v6  ;;  %v5334_v1 = vadd.f32 %v5333_v58, %v5239_v18  ;;  %v5373_v62 = vmul.f32 %v5239_v18, %v5239_v18 }
 0x3a3   : > { %v4099_v10 = vpop.f32.mrf.mxu2  ;;  %v5205_v42 = vpop.f32.mrf.mxu0 }
 0x3a4   : > { %6405 = vst [vmem:[%s7230_s12 + $0x70] sm:$0xff] %v6385_v17   ;;  %v5404_v35 = vadd.f32 %v5403_v9, %v5373_v62  ;;  %v4134_v29 = vadd.f32 %v4099_v10, %v3820_v24  ;;  %v4780_v27 = vpop.f32.mrf.mxu3 }
 0x3a5   : > { %v3787_v57 = vpop.f32.mrf.mxu1 }
 0x3a6   : > { %v4815_v50 = vadd.f32 %v4780_v27, %v4134_v29  ;;  %v3821_v37 = vadd.f32 %v3787_v57, %v8715_v5 }
 0x3a8   : > { %v5240_v49 = vadd.f32 %v5205_v42, %v4815_v50 }
 0x3aa   : > { %v5335_v26 = vadd.f32 %v5334_v1, %v5240_v49  ;;  %v5374_v28 = vmul.f32 %v5240_v49, %v5240_v49 }
 0x3ab   : > { %v4101_v7 = vpop.f32.mrf.mxu2  ;;  %v5207_v38 = vpop.f32.mrf.mxu0 }
 0x3ac   : > { %v5405_v8 = vadd.f32 %v5404_v35, %v5374_v28  ;;  %v4135_v52 = vadd.f32 %v4101_v7, %v3821_v37  ;;  %v4782_v45 = vpop.f32.mrf.mxu3 }
 0x3ae   : > { %v4816_v30 = vadd.f32 %v4782_v45, %v4135_v52 }
 0x3b0   : > { %v5241_v43 = vadd.f32 %v5207_v38, %v4816_v30 }
 0x3b2   : > { %v6390_v54 = vpack.c.bf16 %v5241_v43, %v5240_v49  ;;  %v5336_v16 = vadd.f32 %v5335_v26, %v5241_v43  ;;  %v5375_v15 = vmul.f32 %v5241_v43, %v5241_v43 }
 0x3b4   : > { %6406 = vst [vmem:[%s7230_s12 + $0x78] sm:$0xff] %v6390_v54   ;;  %v5337_v13 = vrot.slane %v5336_v16, 4  ;;  %v5406_v33 = vadd.f32 %v5405_v8, %v5375_v15 }
 0x3b5   : > { %6766 = shalt.err (!%p6763_p13)
}
 0x3b6   : > { %s6961_s30 = smov 64   ;;  %s6962_s12 = smov 128   ;;  %v5407_v21 = vrot.slane %v5406_v33, 4  ;;  %v5338_v40 = vadd.f32 %v5337_v13, %v5336_v16 }
 0x3b7   : > { %s6963_s23 = smov 4   ;;  %s8718_s11 = sld [smem:[#allocation36_spill]] }
 0x3b8   : > { %6441 = dma.vmem_to_hbm [thread:$0]  (%p7161_p7), %s8521_s29, 2048, %s5439_s27, %s5415_s19, %s6961_s30, %s6962_s12, %s6963_s23   ;;  %v5339_v20 = vrot.slane %v5338_v40, 2  ;;  %v5408_v0 = vadd.f32 %v5407_v21, %v5406_v33 }
 0x3b9   : > { %s8719_s5 = sld [smem:[#allocation37_spill]]  ;;  %s8549_s1 = sshll.u32 %s352_s15, 4  ;;  %s5455_s1 = int_to_ptr.vmem [resolvable:$true] %s8549_s1 }
 0x3ba   : > { %v5340_v32 = vadd.f32 %v5339_v20, %v5338_v40  ;;  %v5409_v56 = vrot.slane %v5408_v0, 2  ;;  %s8553_s27 = sshll.u32 %s358_s13, 4  ;;  %s5470_s27 = int_to_ptr.vmem [resolvable:$true] %s8553_s27 }
 0x3bc   : > { %v5341_v34 = vrot.slane %v5340_v32, 1  ;;  %v5410_v61 = vadd.f32 %v5409_v56, %v5408_v0 }
 0x3bd   : > { %s5452_s20 = scalar_lea.hbm %s8718_s11, %s8525_s16 }
 0x3be   : > { %s5456_s29 = sshll.u32 %s5452_s20, 4  ;;  %v5342_v2 = vadd.f32 %v5341_v34, %v5340_v32  ;;  %v5411_v31 = vrot.slane %v5410_v61, 1  ;;  %s6787_s20 = scalar_lea.hbm %s8718_s11, 4  ;;  %s5457_s29 = int_to_ptr.hbm [resolvable:$true] %s5456_s29 }
 0x3bf   : > { %s5467_s7 = scalar_lea.hbm %s8719_s5, %s8525_s16  ;;  %s8720_s16 = sand.u32 1, %s7118_s2  }
 0x3c0   : > { %s8555_s19 = sshll.u32 %s5467_s7, 4  ;;  %5343 = vst [vmem:[%s352_s15] sm:$0x1] %v5342_v2  ;;  %v5412_v14 = vadd.f32 %v5411_v31, %v5410_v61  ;;  %s5420_s30 = scalar_lea.sflag [#allocation11], %s8720_s16  ;;  %s5472_s19 = int_to_ptr.hbm [resolvable:$true] %s8555_s19 }
 0x3c1   : > { %s6781_s12 = sshra.s32 %s5457_s29, 4  ;;  %s6782_s12 = int_to_ptr.hbm [resolvable:$true] %s6781_s12 }
 0x3c2   : > { %s6783_s23 = scalar_lea.hbm %s6782_s12, 1  ;;  %p6788_p2 = scmp.lt.s32.totalorder %s6782_s12, %s8718_s11 }
 0x3c3   : > { %p6784_p8 = scmp.ne.s32.totalorder %s6782_s12, %s6783_s23  ;;  %p6789_p6 = scmp.lt.s32.totalorder %s6787_s20, %s6783_s23 }
 0x3c5   : > { %p6785_p3 = pnand %p6784_p8, %p7161_p7  ;;  %p6790_p11 = por %p6789_p6, %p6788_p2 }
 0x3c7   : > { %p6786_p5 = pneg %p6785_p3 }
 0x3c9   : > { %p6791_p12 = pnand %p6790_p11, %p6786_p5 }
 0x3cb   : > { %6794 = shalt.err (!%p6791_p12)
}
 0x3cc   : > { %6442 = dma.vmem_to_hbm [thread:$0]  (%p7161_p7), %s5455_s1, 16, %s5457_s29, %s5420_s30   ;;  %5413 = vst [vmem:[%s358_s13] sm:$0x1] %v5412_v14 }
 0x3cd   : > { %s6809_s2 = sshra.s32 %s5472_s19, 4  ;;  %s6815_s12 = scalar_lea.hbm %s8719_s5, 4  ;;  %s6810_s2 = int_to_ptr.hbm [resolvable:$true] %s6809_s2 }
 0x3ce   : > { %s6811_s15 = scalar_lea.hbm %s6810_s2, 1  ;;  %p6816_p10 = scmp.lt.s32.totalorder %s6810_s2, %s8719_s5 }
 0x3cf   : > { %p6812_p1 = scmp.ne.s32.totalorder %s6810_s2, %s6811_s15  ;;  %p6817_p13 = scmp.lt.s32.totalorder %s6815_s12, %s6811_s15 }
 0x3d1   : > { %p6813_p4 = pnand %p6812_p1, %p7161_p7  ;;  %p6818_p8 = por %p6817_p13, %p6816_p10 }
 0x3d3   : > { %p6814_p9 = pneg %p6813_p4 }
 0x3d5   : > { %p6819_p3 = pnand %p6818_p8, %p6814_p9 }
 0x3d7   : > { %6822 = shalt.err (!%p6819_p3)
}
 0x3d8   : > { %6443 = dma.vmem_to_hbm [thread:$0]  (%p7161_p7), %s5470_s27, 16, %s5472_s19, %s5420_s30  }
 0x3d9 PF: > { %p6471_p5 = scmp.ge.s32.totalorder %s6953_s10, 2  ;;  %s5483_s1 = sand.u32 1, %s6901_s21  }
 0x3da   : > { %s5484_s4 = scalar_lea.sflag [#allocation5], %s5483_s1 }
 0x3db   : > { %p6459_p2 = pnand %p6471_p5, %p7171_p0 }
 0x3dd   : > { %p6460_p6 = pneg %p6459_p2 }
 0x3df   : > { %6892 = dma.done.wait (%p6460_p6), %s5484_s4, 2048  }
 0x3e0   : > { %6894 = vsyncadd (%p6460_p6), %s5484_s4, 4294965248  ;;  %s8721_s13 = sadd.s32 4294967294, %s6953_s10  }
 0x3e1   : > { %s5493_s24 = sand.u32 1, %s8721_s13  }
 0x3e2   : > { %s5494_s29 = scalar_lea.sflag [#allocation11], %s5493_s24 }
 0x3e3   : > { %6896 = dma.done.wait (%p6460_p6), %s5494_s29, 32  }
 0x3e4   : > { %6898 = vsyncadd (%p6460_p6), %s5494_s29, 4294967264  ;;  %s27_s10 = sadd.s32 1, %s6953_s10   ;;  %s8723_s19 = sld [smem:[#allocation18_spill]] }
 0x3e5   : > { %p8599_p7 = scmp.ge.s32.totalorder %s27_s10, 6   ;;  %s8724_s23 = sld [smem:[#allocation26_spill]] }
 0x3e6   : > { %s8725_s18 = sld [smem:[#allocation25_spill]]  ;;  %s8732_s21 = smov %s6905_s22 }
 0x3e7   : > { %s8726_s30 = sld [smem:[#allocation19_spill]]  ;;  %s8734_s24 = smov %s6917_s25 }
 0x3e8   : > { %s8727_s29 = sld [smem:[#allocation24_spill]]  ;;  %s8735_s25 = smov %s6921_s26 }
 0x3e9   : > { %s8728_s7 = sld [smem:[#allocation21_spill]]  ;;  %s8737_s27 = smov %s6929_s28 }
 0x3ea   : > { %s8729_s17 = sld [smem:[#allocation22_spill]]  ;;  %s8733_s22 = smov %s8723_s19 }
 0x3eb   : > { %s8730_s9 = sld [smem:[#allocation23_spill]] }
 0x3ec   : > { %s8736_s26 = smov %s8725_s18  ;;  %26 = sbr.rel (!%p8599_p7) target bundleno = 20 (0x14), region = 136 }
 0x3ed   : > { %s8738_s28 = smov %s8726_s30  ;;  %s8739_s30 = smov %s6945_s8 }
 0x3f0   : > { %s8740_s8 = smov %s8729_s17 }
 0x3f1   :  { %5508 = vsyncpa [#allocation4], 1 }
 0x3f2   :  { %5510 = vsyncpa [#allocation4 + $0x1], 1 }
 0x3f3   :  { %5511 = vsyncpa [#allocation7], 1 }
 0x3f4   :  { %5512 = vsyncpa [#allocation5], 1 }
 0x3f5   :  { %5514 = vsyncpa [#allocation5 + $0x1], 1 }
 0x3f6   :  { %5515 = vsyncpa [#allocation11], 1 }
 0x3f7   :  { %5517 = vsyncpa [#allocation11 + $0x1], 1 }

</bundles_post_ra>
